<compile_context>
chip_gen: v6e
topology: v6e:2x2x1
jax: 0.10.0
libtpu: 0.0.40
codegen_flags: <defaults>
</compile_context>

<pallas_src>
import numpy as np
import jax
import jax.numpy as jnp
from jax.experimental import pallas as pl
from jax.experimental.pallas import tpu as pltpu


# ----------------------------------------------------------------------------
# Fused kernel factory (num_layers / shapes are static Python config).
# Weight layout per layer (pre-transposed at init time):
#   wih_cat : (Din, 8H)  = [W_ih_fwd^T | W_ih_bwd^T]   (gate order i,f,g,o per direction)
#   whh_f   : (H, 4H)    = W_hh_fwd^T
#   whh_b   : (H, 4H)    = W_hh_bwd^T
#   b_cat   : (1, 8H)    = [b_ih_fwd + b_hh_fwd | b_ih_bwd + b_hh_bwd]
# ----------------------------------------------------------------------------
def make_fused_kernel(num_layers, T, B, H):
    H4, H8 = 4 * H, 8 * H

    def kernel(*refs):
        x_ref = refs[0]                                  # (B, T, E) batch-first
        w_refs = refs[1:1 + 4 * num_layers]
        wlin_ref = refs[1 + 4 * num_layers]              # (2H, 2)
        blin_ref = refs[2 + 4 * num_layers]              # (1, 2)
        out_ref = refs[3 + 4 * num_layers]               # (B, 2)
        xin_scr, xp_scr, act_a, act_b = refs[4 + 4 * num_layers:]

        # ---- Stage batch-first input into a time-major 2-D slab (row = t*B + b)
        #      so each layer's input projection is a single matmul.
        for b in range(B):
            xb = x_ref[b]                                # (T, E)
            for t in range(T):
                r = t * B + b
                xin_scr[r:r + 1, :] = xb[t:t + 1, :]

        def lstm_gates(g, c_prev):
            # PyTorch gate order: i, f, g, o
            i_g = jax.nn.sigmoid(g[:, 0:H])
            f_g = jax.nn.sigmoid(g[:, H:2 * H])
            g_g = jnp.tanh(g[:, 2 * H:3 * H])
            o_g = jax.nn.sigmoid(g[:, 3 * H:4 * H])
            c_new = f_g * c_prev + i_g * g_g
            return o_g * jnp.tanh(c_new), c_new

        def bidir_layer(in_scr, out_scr, wih_ref, whhf_ref, whhb_ref, b_ref):
            # Hoisted input projection: all T timesteps x both directions at once.
            xp_scr[...] = (jnp.dot(in_scr[...], wih_ref[...],
                                   preferred_element_type=jnp.float32)
                           + b_ref[...])                 # (T*B, 8H)
            whh_f = whhf_ref[...]                        # (H, 4H)
            whh_b = whhb_ref[...]
            h_f = jnp.zeros((B, H), jnp.float32)
            c_f = jnp.zeros((B, H), jnp.float32)
            h_b = jnp.zeros((B, H), jnp.float32)
            c_b = jnp.zeros((B, H), jnp.float32)
            # Fully unrolled recurrence; only h @ W_hh^T stays on the serial path.
            for t in range(T):
                tr = T - 1 - t
                g_f = xp_scr[t * B:(t + 1) * B, 0:H4] + jnp.dot(
                    h_f, whh_f, preferred_element_type=jnp.float32)
                g_b = xp_scr[tr * B:(tr + 1) * B, H4:H8] + jnp.dot(
                    h_b, whh_b, preferred_element_type=jnp.float32)
                h_f, c_f = lstm_gates(g_f, c_f)
                h_b, c_b = lstm_gates(g_b, c_b)
                # out[:, t, :H] = fwd hidden at t ; out[:, tr, H:] = bwd hidden at tr
                out_scr[t * B:(t + 1) * B, 0:H] = h_f
                out_scr[tr * B:(tr + 1) * B, H:2 * H] = h_b

        # ---- Layer stack (ping-pong the activation scratch between layers) ----
        act_bufs = (act_a, act_b)
        cur_in = xin_scr
        for layer in range(num_layers):
            wih_ref, whhf_ref, whhb_ref, b_ref = w_refs[4 * layer:4 * layer + 4]
            cur_out = act_bufs[layer % 2]
            bidir_layer(cur_in, cur_out, wih_ref, whhf_ref, whhb_ref, b_ref)
            cur_in = cur_out

        # ---- Head: take output[:, T-1, :], Linear(2H -> 2), softmax over classes ----
        last = cur_in[(T - 1) * B:T * B, :]              # (B, 2H)
        logits = (jnp.dot(last, wlin_ref[...],
                          preferred_element_type=jnp.float32)
                  + blin_ref[...])                       # (B, 2)
        m = jnp.max(logits, axis=1, keepdims=True)
        e = jnp.exp(logits - m)
        denom = jnp.sum(e, axis=1, keepdims=True)
        out_ref[...] = (e * pl.reciprocal(denom, approx=True)).astype(out_ref.dtype)

    return kernel


# ----------------------------------------------------------------------------
# Forward wrapper: a single pallas_call, everything resident in VMEM.
# ----------------------------------------------------------------------------
@jax.jit
def protein_lstm_forward(x_bte, params):
    B, T, E = x_bte.shape
    layers = params["layers"]
    num_layers = len(layers)
    H = layers[0][1].shape[0]                            # whh_f is (H, 4H)

    flat_w = [w for layer_p in layers for w in layer_p]
    kernel = make_fused_kernel(num_layers, T, B, H)

    return pl.pallas_call(
        kernel,
        out_shape=jax.ShapeDtypeStruct((B, 2), jnp.float32),
        scratch_shapes=[
            pltpu.VMEM((T * B, E), jnp.float32),         # time-major staged input
            pltpu.VMEM((T * B, 8 * H), jnp.float32),     # hoisted gate pre-activations
            pltpu.VMEM((T * B, 2 * H), jnp.float32),     # layer activations (ping)
            pltpu.VMEM((T * B, 2 * H), jnp.float32),     # layer activations (pong)
        ],
    )(x_bte.astype(jnp.float32), *flat_w, params["w_lin"], params["b_lin"])


# ----------------------------------------------------------------------------
# Parameter init (deterministic, mimics PyTorch uniform(-1/sqrt(H), 1/sqrt(H)))
# in the fused kernel layout.
# ----------------------------------------------------------------------------
def init_params(key, embedding_dim, hidden_dim, num_layers):
    H = hidden_dim
    k_lstm = 1.0 / np.sqrt(H)
    keys = iter(jax.random.split(key, num_layers * 8 + 2))

    def u(kk, shape, bound):
        return jax.random.uniform(kk, shape, jnp.float32, -bound, bound)

    layers = []
    for layer in range(num_layers):
        in_size = embedding_dim if layer == 0 else 2 * H
        per_dir = []
        for _d in range(2):                              # 0 = forward, 1 = backward
            w_ih = u(next(keys), (4 * H, in_size), k_lstm)   # PyTorch layout (4H, Din)
            w_hh = u(next(keys), (4 * H, H), k_lstm)
            b_ih = u(next(keys), (4 * H,), k_lstm)
            b_hh = u(next(keys), (4 * H,), k_lstm)
            per_dir.append((w_ih, w_hh, b_ih, b_hh))
        (wih_f, whh_f, bih_f, bhh_f), (wih_b, whh_b, bih_b, bhh_b) = per_dir
        wih_cat = jnp.concatenate([wih_f.T, wih_b.T], axis=1)          # (Din, 8H)
        b_cat = jnp.concatenate([bih_f + bhh_f, bih_b + bhh_b])[None]  # (1, 8H)
        layers.append((wih_cat, whh_f.T, whh_b.T, b_cat))

    k_lin = 1.0 / np.sqrt(2 * H)
    w_lin = u(next(keys), (2, 2 * H), k_lin)             # PyTorch (out, in)
    b_lin = u(next(keys), (2,), k_lin)
    return {"layers": layers, "w_lin": w_lin.T, "b_lin": b_lin[None, :]}


# ----------------------------------------------------------------------------
# Pure-JAX reference (mirrors torch.nn.LSTM(bidirectional=True) + Linear + Softmax)
# ----------------------------------------------------------------------------
def reference_forward(x, params):
    B, T, _ = x.shape
    h = x.astype(jnp.float32)                            # (B, T, Din)
    for (wih_cat, whhT_f, whhT_b, b_cat) in params["layers"]:
        H4 = whhT_f.shape[1]
        H = H4 // 4
        wih_f, wih_b = wih_cat[:, :H4], wih_cat[:, H4:]
        b_f, b_b = b_cat[0, :H4], b_cat[0, H4:]

        def cell(carry, xt, whhT, wih, b):
            h_prev, c_prev = carry
            g = xt @ wih + h_prev @ whhT + b
            i = jax.nn.sigmoid(g[:, :H]); f = jax.nn.sigmoid(g[:, H:2 * H])
            gg = jnp.tanh(g[:, 2 * H:3 * H]); o = jax.nn.sigmoid(g[:, 3 * H:4 * H])
            c = f * c_prev + i * gg
            hh = o * jnp.tanh(c)
            return (hh, c), hh

        x_tbd = jnp.swapaxes(h, 0, 1)                    # (T, B, Din)
        init = (jnp.zeros((B, H), jnp.float32), jnp.zeros((B, H), jnp.float32))
        _, out_f = jax.lax.scan(lambda c, xt: cell(c, xt, whhT_f, wih_f, b_f),
                                init, x_tbd)
        _, out_b = jax.lax.scan(lambda c, xt: cell(c, xt, whhT_b, wih_b, b_b),
                                init, x_tbd[::-1])
        out_b = out_b[::-1]
        h = jnp.swapaxes(jnp.concatenate([out_f, out_b], axis=-1), 0, 1)  # (B, T, 2H)
    last = h[:, -1, :]
    logits = last @ params["w_lin"] + params["b_lin"]
    return jax.nn.softmax(logits, axis=1)


if __name__ == "__main__":
    batch_size = 2
    seq_len = 8
    embedding_dim = 32
    hidden_dim = 32
    num_layers = 2

    root = jax.random.PRNGKey(0)
    k_params, k_x = jax.random.split(root)

    params = init_params(k_params, embedding_dim, hidden_dim, num_layers)
    x = jax.random.normal(k_x, (batch_size, seq_len, embedding_dim), jnp.float32)

    out = jax.block_until_ready(protein_lstm_forward(x, params))
    ref = jax.block_until_ready(reference_forward(x, params))

    assert out.shape == (batch_size, 2)
    assert bool(jnp.all(jnp.isfinite(out)))
    assert bool(jnp.allclose(out, ref, atol=5e-3)), (out, ref)
    print("KERNEL_OK")
</pallas_src>

<mosaic_0001>
module attributes {stable_mosaic.version = 11 : i64} {
  func.func @kernel(%arg0: memref<2x8x32xf32, #tpu.memory_space<vmem>>, %arg1: memref<32x256xf32, #tpu.memory_space<vmem>>, %arg2: memref<32x128xf32, #tpu.memory_space<vmem>>, %arg3: memref<32x128xf32, #tpu.memory_space<vmem>>, %arg4: memref<1x256xf32, #tpu.memory_space<vmem>>, %arg5: memref<64x256xf32, #tpu.memory_space<vmem>>, %arg6: memref<32x128xf32, #tpu.memory_space<vmem>>, %arg7: memref<32x128xf32, #tpu.memory_space<vmem>>, %arg8: memref<1x256xf32, #tpu.memory_space<vmem>>, %arg9: memref<64x2xf32, #tpu.memory_space<vmem>>, %arg10: memref<1x2xf32, #tpu.memory_space<vmem>>, %arg11: memref<2x2xf32, #tpu.memory_space<vmem>>, %arg12: memref<16x32xf32, #tpu.memory_space<vmem>>, %arg13: memref<16x256xf32, #tpu.memory_space<vmem>>, %arg14: memref<16x64xf32, #tpu.memory_space<vmem>>, %arg15: memref<16x64xf32, #tpu.memory_space<vmem>>) attributes {dimension_semantics = [], scalar_prefetch = 0 : i64, scratch_operands = 4 : i64, tpu.core_type = #tpu.core_type<tc>} {
    %c0 = arith.constant 0 : index
    %c0_0 = arith.constant 0 : index
    %c0_1 = arith.constant 0 : index
    %0 = vector.load %arg0[%c0, %c0_0, %c0_1] : memref<2x8x32xf32, #tpu.memory_space<vmem>>, vector<1x8x32xf32>
    %1 = vector.shape_cast %0 : vector<1x8x32xf32> to vector<8x32xf32>
    %2 = vector.extract_strided_slice %1 {offsets = [0, 0], sizes = [1, 32], strides = [1, 1]} : vector<8x32xf32> to vector<1x32xf32>
    %c0_2 = arith.constant 0 : index
    %c0_3 = arith.constant 0 : index
    %3 = vector.load %arg12[%c0_2, %c0_3] : memref<16x32xf32, #tpu.memory_space<vmem>>, vector<1x32xf32>
    tpu.vector_store %arg12[%c0_2, %c0_3], %2 {strides = array<i32>} : memref<16x32xf32, #tpu.memory_space<vmem>>, vector<1x32xf32>,
    %4 = vector.extract_strided_slice %1 {offsets = [1, 0], sizes = [1, 32], strides = [1, 1]} : vector<8x32xf32> to vector<1x32xf32>
    %c2 = arith.constant 2 : index
    %c0_4 = arith.constant 0 : index
    %5 = vector.load %arg12[%c2, %c0_4] : memref<16x32xf32, #tpu.memory_space<vmem>>, vector<1x32xf32>
    tpu.vector_store %arg12[%c2, %c0_4], %4 {strides = array<i32>} : memref<16x32xf32, #tpu.memory_space<vmem>>, vector<1x32xf32>,
    %6 = vector.extract_strided_slice %1 {offsets = [2, 0], sizes = [1, 32], strides = [1, 1]} : vector<8x32xf32> to vector<1x32xf32>
    %c4 = arith.constant 4 : index
    %c0_5 = arith.constant 0 : index
    %7 = vector.load %arg12[%c4, %c0_5] : memref<16x32xf32, #tpu.memory_space<vmem>>, vector<1x32xf32>
    tpu.vector_store %arg12[%c4, %c0_5], %6 {strides = array<i32>} : memref<16x32xf32, #tpu.memory_space<vmem>>, vector<1x32xf32>,
    %8 = vector.extract_strided_slice %1 {offsets = [3, 0], sizes = [1, 32], strides = [1, 1]} : vector<8x32xf32> to vector<1x32xf32>
    %c6 = arith.constant 6 : index
    %c0_6 = arith.constant 0 : index
    %9 = vector.load %arg12[%c6, %c0_6] : memref<16x32xf32, #tpu.memory_space<vmem>>, vector<1x32xf32>
    tpu.vector_store %arg12[%c6, %c0_6], %8 {strides = array<i32>} : memref<16x32xf32, #tpu.memory_space<vmem>>, vector<1x32xf32>,
    %10 = vector.extract_strided_slice %1 {offsets = [4, 0], sizes = [1, 32], strides = [1, 1]} : vector<8x32xf32> to vector<1x32xf32>
    %c8 = arith.constant 8 : index
    %c0_7 = arith.constant 0 : index
    %11 = vector.load %arg12[%c8, %c0_7] : memref<16x32xf32, #tpu.memory_space<vmem>>, vector<1x32xf32>
    tpu.vector_store %arg12[%c8, %c0_7], %10 {strides = array<i32>} : memref<16x32xf32, #tpu.memory_space<vmem>>, vector<1x32xf32>,
    %12 = vector.extract_strided_slice %1 {offsets = [5, 0], sizes = [1, 32], strides = [1, 1]} : vector<8x32xf32> to vector<1x32xf32>
    %c10 = arith.constant 10 : index
    %c0_8 = arith.constant 0 : index
    %13 = vector.load %arg12[%c10, %c0_8] : memref<16x32xf32, #tpu.memory_space<vmem>>, vector<1x32xf32>
    tpu.vector_store %arg12[%c10, %c0_8], %12 {strides = array<i32>} : memref<16x32xf32, #tpu.memory_space<vmem>>, vector<1x32xf32>,
    %14 = vector.extract_strided_slice %1 {offsets = [6, 0], sizes = [1, 32], strides = [1, 1]} : vector<8x32xf32> to vector<1x32xf32>
    %c12 = arith.constant 12 : index
    %c0_9 = arith.constant 0 : index
    %15 = vector.load %arg12[%c12, %c0_9] : memref<16x32xf32, #tpu.memory_space<vmem>>, vector<1x32xf32>
    tpu.vector_store %arg12[%c12, %c0_9], %14 {strides = array<i32>} : memref<16x32xf32, #tpu.memory_space<vmem>>, vector<1x32xf32>,
    %16 = vector.extract_strided_slice %1 {offsets = [7, 0], sizes = [1, 32], strides = [1, 1]} : vector<8x32xf32> to vector<1x32xf32>
    %c14 = arith.constant 14 : index
    %c0_10 = arith.constant 0 : index
    %17 = vector.load %arg12[%c14, %c0_10] : memref<16x32xf32, #tpu.memory_space<vmem>>, vector<1x32xf32>
    tpu.vector_store %arg12[%c14, %c0_10], %16 {strides = array<i32>} : memref<16x32xf32, #tpu.memory_space<vmem>>, vector<1x32xf32>,
    %c1 = arith.constant 1 : index
    %c0_11 = arith.constant 0 : index
    %c0_12 = arith.constant 0 : index
    %18 = vector.load %arg0[%c1, %c0_11, %c0_12] : memref<2x8x32xf32, #tpu.memory_space<vmem>>, vector<1x8x32xf32>
    %19 = vector.shape_cast %18 : vector<1x8x32xf32> to vector<8x32xf32>
    %20 = vector.extract_strided_slice %19 {offsets = [0, 0], sizes = [1, 32], strides = [1, 1]} : vector<8x32xf32> to vector<1x32xf32>
    %c1_13 = arith.constant 1 : index
    %c0_14 = arith.constant 0 : index
    %21 = vector.load %arg12[%c1_13, %c0_14] : memref<16x32xf32, #tpu.memory_space<vmem>>, vector<1x32xf32>
    tpu.vector_store %arg12[%c1_13, %c0_14], %20 {strides = array<i32>} : memref<16x32xf32, #tpu.memory_space<vmem>>, vector<1x32xf32>,
    %22 = vector.extract_strided_slice %19 {offsets = [1, 0], sizes = [1, 32], strides = [1, 1]} : vector<8x32xf32> to vector<1x32xf32>
    %c3 = arith.constant 3 : index
    %c0_15 = arith.constant 0 : index
    %23 = vector.load %arg12[%c3, %c0_15] : memref<16x32xf32, #tpu.memory_space<vmem>>, vector<1x32xf32>
    tpu.vector_store %arg12[%c3, %c0_15], %22 {strides = array<i32>} : memref<16x32xf32, #tpu.memory_space<vmem>>, vector<1x32xf32>,
    %24 = vector.extract_strided_slice %19 {offsets = [2, 0], sizes = [1, 32], strides = [1, 1]} : vector<8x32xf32> to vector<1x32xf32>
    %c5 = arith.constant 5 : index
    %c0_16 = arith.constant 0 : index
    %25 = vector.load %arg12[%c5, %c0_16] : memref<16x32xf32, #tpu.memory_space<vmem>>, vector<1x32xf32>
    tpu.vector_store %arg12[%c5, %c0_16], %24 {strides = array<i32>} : memref<16x32xf32, #tpu.memory_space<vmem>>, vector<1x32xf32>,
    %26 = vector.extract_strided_slice %19 {offsets = [3, 0], sizes = [1, 32], strides = [1, 1]} : vector<8x32xf32> to vector<1x32xf32>
    %c7 = arith.constant 7 : index
    %c0_17 = arith.constant 0 : index
    %27 = vector.load %arg12[%c7, %c0_17] : memref<16x32xf32, #tpu.memory_space<vmem>>, vector<1x32xf32>
    tpu.vector_store %arg12[%c7, %c0_17], %26 {strides = array<i32>} : memref<16x32xf32, #tpu.memory_space<vmem>>, vector<1x32xf32>,
    %28 = vector.extract_strided_slice %19 {offsets = [4, 0], sizes = [1, 32], strides = [1, 1]} : vector<8x32xf32> to vector<1x32xf32>
    %c9 = arith.constant 9 : index
    %c0_18 = arith.constant 0 : index
    %29 = vector.load %arg12[%c9, %c0_18] : memref<16x32xf32, #tpu.memory_space<vmem>>, vector<1x32xf32>
    tpu.vector_store %arg12[%c9, %c0_18], %28 {strides = array<i32>} : memref<16x32xf32, #tpu.memory_space<vmem>>, vector<1x32xf32>,
    %30 = vector.extract_strided_slice %19 {offsets = [5, 0], sizes = [1, 32], strides = [1, 1]} : vector<8x32xf32> to vector<1x32xf32>
    %c11 = arith.constant 11 : index
    %c0_19 = arith.constant 0 : index
    %31 = vector.load %arg12[%c11, %c0_19] : memref<16x32xf32, #tpu.memory_space<vmem>>, vector<1x32xf32>
    tpu.vector_store %arg12[%c11, %c0_19], %30 {strides = array<i32>} : memref<16x32xf32, #tpu.memory_space<vmem>>, vector<1x32xf32>,
    %32 = vector.extract_strided_slice %19 {offsets = [6, 0], sizes = [1, 32], strides = [1, 1]} : vector<8x32xf32> to vector<1x32xf32>
    %c13 = arith.constant 13 : index
    %c0_20 = arith.constant 0 : index
    %33 = vector.load %arg12[%c13, %c0_20] : memref<16x32xf32, #tpu.memory_space<vmem>>, vector<1x32xf32>
    tpu.vector_store %arg12[%c13, %c0_20], %32 {strides = array<i32>} : memref<16x32xf32, #tpu.memory_space<vmem>>, vector<1x32xf32>,
    %34 = vector.extract_strided_slice %19 {offsets = [7, 0], sizes = [1, 32], strides = [1, 1]} : vector<8x32xf32> to vector<1x32xf32>
    %c15 = arith.constant 15 : index
    %c0_21 = arith.constant 0 : index
    %35 = vector.load %arg12[%c15, %c0_21] : memref<16x32xf32, #tpu.memory_space<vmem>>, vector<1x32xf32>
    tpu.vector_store %arg12[%c15, %c0_21], %34 {strides = array<i32>} : memref<16x32xf32, #tpu.memory_space<vmem>>, vector<1x32xf32>,
    %c0_22 = arith.constant 0 : index
    %c0_23 = arith.constant 0 : index
    %36 = vector.load %arg12[%c0_22, %c0_23] : memref<16x32xf32, #tpu.memory_space<vmem>>, vector<16x32xf32>
    %c0_24 = arith.constant 0 : index
    %c0_25 = arith.constant 0 : index
    %37 = vector.load %arg1[%c0_24, %c0_25] : memref<32x256xf32, #tpu.memory_space<vmem>>, vector<32x256xf32>
    %cst = arith.constant dense<0.000000e+00> : vector<16x256xf32>
    %38 = tpu.matmul %36, %37, %cst {dimension_numbers = #tpu.dot_dimension_numbers<[1], [0], [0], [1], [0, 0, 1, 1], [], []>} : vector<16x32xf32>, vector<32x256xf32>, vector<16x256xf32> -> vector<16x256xf32>
    %c0_26 = arith.constant 0 : index
    %c0_27 = arith.constant 0 : index
    %39 = vector.load %arg4[%c0_26, %c0_27] : memref<1x256xf32, #tpu.memory_space<vmem>>, vector<1x256xf32>
    %40 = vector.broadcast %39 : vector<1x256xf32> to vector<16x256xf32>
    %41 = arith.addf %38, %40 : vector<16x256xf32>
    %c0_28 = arith.constant 0 : index
    %c0_29 = arith.constant 0 : index
    %42 = vector.load %arg13[%c0_28, %c0_29] : memref<16x256xf32, #tpu.memory_space<vmem>>, vector<16x256xf32>
    tpu.vector_store %arg13[%c0_28, %c0_29], %41 {strides = array<i32>} : memref<16x256xf32, #tpu.memory_space<vmem>>, vector<16x256xf32>,
    %c0_30 = arith.constant 0 : index
    %c0_31 = arith.constant 0 : index
    %43 = vector.load %arg2[%c0_30, %c0_31] : memref<32x128xf32, #tpu.memory_space<vmem>>, vector<32x128xf32>
    %c0_32 = arith.constant 0 : index
    %c0_33 = arith.constant 0 : index
    %44 = vector.load %arg3[%c0_32, %c0_33] : memref<32x128xf32, #tpu.memory_space<vmem>>, vector<32x128xf32>
    %cst_34 = arith.constant 0.000000e+00 : f32
    %45 = vector.broadcast %cst_34 : f32 to vector<2x32xf32>
    %cst_35 = arith.constant 0.000000e+00 : f32
    %46 = vector.broadcast %cst_35 : f32 to vector<2x32xf32>
    %cst_36 = arith.constant 0.000000e+00 : f32
    %47 = vector.broadcast %cst_36 : f32 to vector<2x32xf32>
    %cst_37 = arith.constant 0.000000e+00 : f32
    %48 = vector.broadcast %cst_37 : f32 to vector<2x32xf32>
    %c0_38 = arith.constant 0 : index
    %c0_39 = arith.constant 0 : index
    %49 = vector.load %arg13[%c0_38, %c0_39] : memref<16x256xf32, #tpu.memory_space<vmem>>, vector<2x128xf32>
    %cst_40 = arith.constant dense<0.000000e+00> : vector<2x128xf32>
    %50 = tpu.matmul %45, %43, %cst_40 {dimension_numbers = #tpu.dot_dimension_numbers<[1], [0], [0], [1], [0, 0, 1, 1], [], []>} : vector<2x32xf32>, vector<32x128xf32>, vector<2x128xf32> -> vector<2x128xf32>
    %51 = arith.addf %49, %50 : vector<2x128xf32>
    %c14_41 = arith.constant 14 : index
    %c128 = arith.constant 128 : index
    %52 = vector.load %arg13[%c14_41, %c128] : memref<16x256xf32, #tpu.memory_space<vmem>>, vector<2x128xf32>
    %cst_42 = arith.constant dense<0.000000e+00> : vector<2x128xf32>
    %53 = tpu.matmul %47, %44, %cst_42 {dimension_numbers = #tpu.dot_dimension_numbers<[1], [0], [0], [1], [0, 0, 1, 1], [], []>} : vector<2x32xf32>, vector<32x128xf32>, vector<2x128xf32> -> vector<2x128xf32>
    %54 = arith.addf %52, %53 : vector<2x128xf32>
    %55 = vector.extract_strided_slice %51 {offsets = [0, 0], sizes = [2, 32], strides = [1, 1]} : vector<2x128xf32> to vector<2x32xf32>
    %56 = arith.negf %55 : vector<2x32xf32>
    %57 = math.exp %56 : vector<2x32xf32>
    %cst_43 = arith.constant 1.000000e+00 : f32
    %58 = vector.broadcast %cst_43 : f32 to vector<2x32xf32>
    %59 = arith.addf %58, %57 : vector<2x32xf32>
    %60 = arith.divf %58, %59 : vector<2x32xf32>
    %61 = vector.extract_strided_slice %51 {offsets = [0, 32], sizes = [2, 32], strides = [1, 1]} : vector<2x128xf32> to vector<2x32xf32>
    %62 = arith.negf %61 : vector<2x32xf32>
    %63 = math.exp %62 : vector<2x32xf32>
    %cst_44 = arith.constant 1.000000e+00 : f32
    %64 = vector.broadcast %cst_44 : f32 to vector<2x32xf32>
    %65 = arith.addf %64, %63 : vector<2x32xf32>
    %66 = arith.divf %64, %65 : vector<2x32xf32>
    %67 = vector.extract_strided_slice %51 {offsets = [0, 64], sizes = [2, 32], strides = [1, 1]} : vector<2x128xf32> to vector<2x32xf32>
    %68 = math.tanh %67 : vector<2x32xf32>
    %69 = vector.extract_strided_slice %51 {offsets = [0, 96], sizes = [2, 32], strides = [1, 1]} : vector<2x128xf32> to vector<2x32xf32>
    %70 = arith.negf %69 : vector<2x32xf32>
    %71 = math.exp %70 : vector<2x32xf32>
    %cst_45 = arith.constant 1.000000e+00 : f32
    %72 = vector.broadcast %cst_45 : f32 to vector<2x32xf32>
    %73 = arith.addf %72, %71 : vector<2x32xf32>
    %74 = arith.divf %72, %73 : vector<2x32xf32>
    %75 = arith.mulf %66, %46 : vector<2x32xf32>
    %76 = arith.mulf %60, %68 : vector<2x32xf32>
    %77 = arith.addf %75, %76 : vector<2x32xf32>
    %78 = math.tanh %77 : vector<2x32xf32>
    %79 = arith.mulf %74, %78 : vector<2x32xf32>
    %80 = vector.extract_strided_slice %54 {offsets = [0, 0], sizes = [2, 32], strides = [1, 1]} : vector<2x128xf32> to vector<2x32xf32>
    %81 = arith.negf %80 : vector<2x32xf32>
    %82 = math.exp %81 : vector<2x32xf32>
    %cst_46 = arith.constant 1.000000e+00 : f32
    %83 = vector.broadcast %cst_46 : f32 to vector<2x32xf32>
    %84 = arith.addf %83, %82 : vector<2x32xf32>
    %85 = arith.divf %83, %84 : vector<2x32xf32>
    %86 = vector.extract_strided_slice %54 {offsets = [0, 32], sizes = [2, 32], strides = [1, 1]} : vector<2x128xf32> to vector<2x32xf32>
    %87 = arith.negf %86 : vector<2x32xf32>
    %88 = math.exp %87 : vector<2x32xf32>
    %cst_47 = arith.constant 1.000000e+00 : f32
    %89 = vector.broadcast %cst_47 : f32 to vector<2x32xf32>
    %90 = arith.addf %89, %88 : vector<2x32xf32>
    %91 = arith.divf %89, %90 : vector<2x32xf32>
    %92 = vector.extract_strided_slice %54 {offsets = [0, 64], sizes = [2, 32], strides = [1, 1]} : vector<2x128xf32> to vector<2x32xf32>
    %93 = math.tanh %92 : vector<2x32xf32>
    %94 = vector.extract_strided_slice %54 {offsets = [0, 96], sizes = [2, 32], strides = [1, 1]} : vector<2x128xf32> to vector<2x32xf32>
    %95 = arith.negf %94 : vector<2x32xf32>
    %96 = math.exp %95 : vector<2x32xf32>
    %cst_48 = arith.constant 1.000000e+00 : f32
    %97 = vector.broadcast %cst_48 : f32 to vector<2x32xf32>
    %98 = arith.addf %97, %96 : vector<2x32xf32>
    %99 = arith.divf %97, %98 : vector<2x32xf32>
    %100 = arith.mulf %91, %48 : vector<2x32xf32>
    %101 = arith.mulf %85, %93 : vector<2x32xf32>
    %102 = arith.addf %100, %101 : vector<2x32xf32>
    %103 = math.tanh %102 : vector<2x32xf32>
    %104 = arith.mulf %99, %103 : vector<2x32xf32>
    %c0_49 = arith.constant 0 : index
    %c0_50 = arith.constant 0 : index
    %105 = vector.load %arg14[%c0_49, %c0_50] : memref<16x64xf32, #tpu.memory_space<vmem>>, vector<2x32xf32>
    tpu.vector_store %arg14[%c0_49, %c0_50], %79 {strides = array<i32>} : memref<16x64xf32, #tpu.memory_space<vmem>>, vector<2x32xf32>,
    %c14_51 = arith.constant 14 : index
    %c32 = arith.constant 32 : index
    %106 = vector.load %arg14[%c14_51, %c32] : memref<16x64xf32, #tpu.memory_space<vmem>>, vector<2x32xf32>
    tpu.vector_store %arg14[%c14_51, %c32], %104 {strides = array<i32>} : memref<16x64xf32, #tpu.memory_space<vmem>>, vector<2x32xf32>,
    %c2_52 = arith.constant 2 : index
    %c0_53 = arith.constant 0 : index
    %107 = vector.load %arg13[%c2_52, %c0_53] : memref<16x256xf32, #tpu.memory_space<vmem>>, vector<2x128xf32>
    %cst_54 = arith.constant dense<0.000000e+00> : vector<2x128xf32>
    %108 = tpu.matmul %79, %43, %cst_54 {dimension_numbers = #tpu.dot_dimension_numbers<[1], [0], [0], [1], [0, 0, 1, 1], [], []>} : vector<2x32xf32>, vector<32x128xf32>, vector<2x128xf32> -> vector<2x128xf32>
    %109 = arith.addf %107, %108 : vector<2x128xf32>
    %c12_55 = arith.constant 12 : index
    %c128_56 = arith.constant 128 : index
    %110 = vector.load %arg13[%c12_55, %c128_56] : memref<16x256xf32, #tpu.memory_space<vmem>>, vector<2x128xf32>
    %cst_57 = arith.constant dense<0.000000e+00> : vector<2x128xf32>
    %111 = tpu.matmul %104, %44, %cst_57 {dimension_numbers = #tpu.dot_dimension_numbers<[1], [0], [0], [1], [0, 0, 1, 1], [], []>} : vector<2x32xf32>, vector<32x128xf32>, vector<2x128xf32> -> vector<2x128xf32>
    %112 = arith.addf %110, %111 : vector<2x128xf32>
    %113 = vector.extract_strided_slice %109 {offsets = [0, 0], sizes = [2, 32], strides = [1, 1]} : vector<2x128xf32> to vector<2x32xf32>
    %114 = arith.negf %113 : vector<2x32xf32>
    %115 = math.exp %114 : vector<2x32xf32>
    %cst_58 = arith.constant 1.000000e+00 : f32
    %116 = vector.broadcast %cst_58 : f32 to vector<2x32xf32>
    %117 = arith.addf %116, %115 : vector<2x32xf32>
    %118 = arith.divf %116, %117 : vector<2x32xf32>
    %119 = vector.extract_strided_slice %109 {offsets = [0, 32], sizes = [2, 32], strides = [1, 1]} : vector<2x128xf32> to vector<2x32xf32>
    %120 = arith.negf %119 : vector<2x32xf32>
    %121 = math.exp %120 : vector<2x32xf32>
    %cst_59 = arith.constant 1.000000e+00 : f32
    %122 = vector.broadcast %cst_59 : f32 to vector<2x32xf32>
    %123 = arith.addf %122, %121 : vector<2x32xf32>
    %124 = arith.divf %122, %123 : vector<2x32xf32>
    %125 = vector.extract_strided_slice %109 {offsets = [0, 64], sizes = [2, 32], strides = [1, 1]} : vector<2x128xf32> to vector<2x32xf32>
    %126 = math.tanh %125 : vector<2x32xf32>
    %127 = vector.extract_strided_slice %109 {offsets = [0, 96], sizes = [2, 32], strides = [1, 1]} : vector<2x128xf32> to vector<2x32xf32>
    %128 = arith.negf %127 : vector<2x32xf32>
    %129 = math.exp %128 : vector<2x32xf32>
    %cst_60 = arith.constant 1.000000e+00 : f32
    %130 = vector.broadcast %cst_60 : f32 to vector<2x32xf32>
    %131 = arith.addf %130, %129 : vector<2x32xf32>
    %132 = arith.divf %130, %131 : vector<2x32xf32>
    %133 = arith.mulf %124, %77 : vector<2x32xf32>
    %134 = arith.mulf %118, %126 : vector<2x32xf32>
    %135 = arith.addf %133, %134 : vector<2x32xf32>
    %136 = math.tanh %135 : vector<2x32xf32>
    %137 = arith.mulf %132, %136 : vector<2x32xf32>
    %138 = vector.extract_strided_slice %112 {offsets = [0, 0], sizes = [2, 32], strides = [1, 1]} : vector<2x128xf32> to vector<2x32xf32>
    %139 = arith.negf %138 : vector<2x32xf32>
    %140 = math.exp %139 : vector<2x32xf32>
    %cst_61 = arith.constant 1.000000e+00 : f32
    %141 = vector.broadcast %cst_61 : f32 to vector<2x32xf32>
    %142 = arith.addf %141, %140 : vector<2x32xf32>
    %143 = arith.divf %141, %142 : vector<2x32xf32>
    %144 = vector.extract_strided_slice %112 {offsets = [0, 32], sizes = [2, 32], strides = [1, 1]} : vector<2x128xf32> to vector<2x32xf32>
    %145 = arith.negf %144 : vector<2x32xf32>
    %146 = math.exp %145 : vector<2x32xf32>
    %cst_62 = arith.constant 1.000000e+00 : f32
    %147 = vector.broadcast %cst_62 : f32 to vector<2x32xf32>
    %148 = arith.addf %147, %146 : vector<2x32xf32>
    %149 = arith.divf %147, %148 : vector<2x32xf32>
    %150 = vector.extract_strided_slice %112 {offsets = [0, 64], sizes = [2, 32], strides = [1, 1]} : vector<2x128xf32> to vector<2x32xf32>
    %151 = math.tanh %150 : vector<2x32xf32>
    %152 = vector.extract_strided_slice %112 {offsets = [0, 96], sizes = [2, 32], strides = [1, 1]} : vector<2x128xf32> to vector<2x32xf32>
    %153 = arith.negf %152 : vector<2x32xf32>
    %154 = math.exp %153 : vector<2x32xf32>
    %cst_63 = arith.constant 1.000000e+00 : f32
    %155 = vector.broadcast %cst_63 : f32 to vector<2x32xf32>
    %156 = arith.addf %155, %154 : vector<2x32xf32>
    %157 = arith.divf %155, %156 : vector<2x32xf32>
    %158 = arith.mulf %149, %102 : vector<2x32xf32>
    %159 = arith.mulf %143, %151 : vector<2x32xf32>
    %160 = arith.addf %158, %159 : vector<2x32xf32>
    %161 = math.tanh %160 : vector<2x32xf32>
    %162 = arith.mulf %157, %161 : vector<2x32xf32>
    %c2_64 = arith.constant 2 : index
    %c0_65 = arith.constant 0 : index
    %163 = vector.load %arg14[%c2_64, %c0_65] : memref<16x64xf32, #tpu.memory_space<vmem>>, vector<2x32xf32>
    tpu.vector_store %arg14[%c2_64, %c0_65], %137 {strides = array<i32>} : memref<16x64xf32, #tpu.memory_space<vmem>>, vector<2x32xf32>,
    %c12_66 = arith.constant 12 : index
    %c32_67 = arith.constant 32 : index
    %164 = vector.load %arg14[%c12_66, %c32_67] : memref<16x64xf32, #tpu.memory_space<vmem>>, vector<2x32xf32>
    tpu.vector_store %arg14[%c12_66, %c32_67], %162 {strides = array<i32>} : memref<16x64xf32, #tpu.memory_space<vmem>>, vector<2x32xf32>,
    %c4_68 = arith.constant 4 : index
    %c0_69 = arith.constant 0 : index
    %165 = vector.load %arg13[%c4_68, %c0_69] : memref<16x256xf32, #tpu.memory_space<vmem>>, vector<2x128xf32>
    %cst_70 = arith.constant dense<0.000000e+00> : vector<2x128xf32>
    %166 = tpu.matmul %137, %43, %cst_70 {dimension_numbers = #tpu.dot_dimension_numbers<[1], [0], [0], [1], [0, 0, 1, 1], [], []>} : vector<2x32xf32>, vector<32x128xf32>, vector<2x128xf32> -> vector<2x128xf32>
    %167 = arith.addf %165, %166 : vector<2x128xf32>
    %c10_71 = arith.constant 10 : index
    %c128_72 = arith.constant 128 : index
    %168 = vector.load %arg13[%c10_71, %c128_72] : memref<16x256xf32, #tpu.memory_space<vmem>>, vector<2x128xf32>
    %cst_73 = arith.constant dense<0.000000e+00> : vector<2x128xf32>
    %169 = tpu.matmul %162, %44, %cst_73 {dimension_numbers = #tpu.dot_dimension_numbers<[1], [0], [0], [1], [0, 0, 1, 1], [], []>} : vector<2x32xf32>, vector<32x128xf32>, vector<2x128xf32> -> vector<2x128xf32>
    %170 = arith.addf %168, %169 : vector<2x128xf32>
    %171 = vector.extract_strided_slice %167 {offsets = [0, 0], sizes = [2, 32], strides = [1, 1]} : vector<2x128xf32> to vector<2x32xf32>
    %172 = arith.negf %171 : vector<2x32xf32>
    %173 = math.exp %172 : vector<2x32xf32>
    %cst_74 = arith.constant 1.000000e+00 : f32
    %174 = vector.broadcast %cst_74 : f32 to vector<2x32xf32>
    %175 = arith.addf %174, %173 : vector<2x32xf32>
    %176 = arith.divf %174, %175 : vector<2x32xf32>
    %177 = vector.extract_strided_slice %167 {offsets = [0, 32], sizes = [2, 32], strides = [1, 1]} : vector<2x128xf32> to vector<2x32xf32>
    %178 = arith.negf %177 : vector<2x32xf32>
    %179 = math.exp %178 : vector<2x32xf32>
    %cst_75 = arith.constant 1.000000e+00 : f32
    %180 = vector.broadcast %cst_75 : f32 to vector<2x32xf32>
    %181 = arith.addf %180, %179 : vector<2x32xf32>
    %182 = arith.divf %180, %181 : vector<2x32xf32>
    %183 = vector.extract_strided_slice %167 {offsets = [0, 64], sizes = [2, 32], strides = [1, 1]} : vector<2x128xf32> to vector<2x32xf32>
    %184 = math.tanh %183 : vector<2x32xf32>
    %185 = vector.extract_strided_slice %167 {offsets = [0, 96], sizes = [2, 32], strides = [1, 1]} : vector<2x128xf32> to vector<2x32xf32>
    %186 = arith.negf %185 : vector<2x32xf32>
    %187 = math.exp %186 : vector<2x32xf32>
    %cst_76 = arith.constant 1.000000e+00 : f32
    %188 = vector.broadcast %cst_76 : f32 to vector<2x32xf32>
    %189 = arith.addf %188, %187 : vector<2x32xf32>
    %190 = arith.divf %188, %189 : vector<2x32xf32>
    %191 = arith.mulf %182, %135 : vector<2x32xf32>
    %192 = arith.mulf %176, %184 : vector<2x32xf32>
    %193 = arith.addf %191, %192 : vector<2x32xf32>
    %194 = math.tanh %193 : vector<2x32xf32>
    %195 = arith.mulf %190, %194 : vector<2x32xf32>
    %196 = vector.extract_strided_slice %170 {offsets = [0, 0], sizes = [2, 32], strides = [1, 1]} : vector<2x128xf32> to vector<2x32xf32>
    %197 = arith.negf %196 : vector<2x32xf32>
    %198 = math.exp %197 : vector<2x32xf32>
    %cst_77 = arith.constant 1.000000e+00 : f32
    %199 = vector.broadcast %cst_77 : f32 to vector<2x32xf32>
    %200 = arith.addf %199, %198 : vector<2x32xf32>
    %201 = arith.divf %199, %200 : vector<2x32xf32>
    %202 = vector.extract_strided_slice %170 {offsets = [0, 32], sizes = [2, 32], strides = [1, 1]} : vector<2x128xf32> to vector<2x32xf32>
    %203 = arith.negf %202 : vector<2x32xf32>
    %204 = math.exp %203 : vector<2x32xf32>
    %cst_78 = arith.constant 1.000000e+00 : f32
    %205 = vector.broadcast %cst_78 : f32 to vector<2x32xf32>
    %206 = arith.addf %205, %204 : vector<2x32xf32>
    %207 = arith.divf %205, %206 : vector<2x32xf32>
    %208 = vector.extract_strided_slice %170 {offsets = [0, 64], sizes = [2, 32], strides = [1, 1]} : vector<2x128xf32> to vector<2x32xf32>
    %209 = math.tanh %208 : vector<2x32xf32>
    %210 = vector.extract_strided_slice %170 {offsets = [0, 96], sizes = [2, 32], strides = [1, 1]} : vector<2x128xf32> to vector<2x32xf32>
    %211 = arith.negf %210 : vector<2x32xf32>
    %212 = math.exp %211 : vector<2x32xf32>
    %cst_79 = arith.constant 1.000000e+00 : f32
    %213 = vector.broadcast %cst_79 : f32 to vector<2x32xf32>
    %214 = arith.addf %213, %212 : vector<2x32xf32>
    %215 = arith.divf %213, %214 : vector<2x32xf32>
    %216 = arith.mulf %207, %160 : vector<2x32xf32>
    %217 = arith.mulf %201, %209 : vector<2x32xf32>
    %218 = arith.addf %216, %217 : vector<2x32xf32>
    %219 = math.tanh %218 : vector<2x32xf32>
    %220 = arith.mulf %215, %219 : vector<2x32xf32>
    %c4_80 = arith.constant 4 : index
    %c0_81 = arith.constant 0 : index
    %221 = vector.load %arg14[%c4_80, %c0_81] : memref<16x64xf32, #tpu.memory_space<vmem>>, vector<2x32xf32>
    tpu.vector_store %arg14[%c4_80, %c0_81], %195 {strides = array<i32>} : memref<16x64xf32, #tpu.memory_space<vmem>>, vector<2x32xf32>,
    %c10_82 = arith.constant 10 : index
    %c32_83 = arith.constant 32 : index
    %222 = vector.load %arg14[%c10_82, %c32_83] : memref<16x64xf32, #tpu.memory_space<vmem>>, vector<2x32xf32>
    tpu.vector_store %arg14[%c10_82, %c32_83], %220 {strides = array<i32>} : memref<16x64xf32, #tpu.memory_space<vmem>>, vector<2x32xf32>,
    %c6_84 = arith.constant 6 : index
    %c0_85 = arith.constant 0 : index
    %223 = vector.load %arg13[%c6_84, %c0_85] : memref<16x256xf32, #tpu.memory_space<vmem>>, vector<2x128xf32>
    %cst_86 = arith.constant dense<0.000000e+00> : vector<2x128xf32>
    %224 = tpu.matmul %195, %43, %cst_86 {dimension_numbers = #tpu.dot_dimension_numbers<[1], [0], [0], [1], [0, 0, 1, 1], [], []>} : vector<2x32xf32>, vector<32x128xf32>, vector<2x128xf32> -> vector<2x128xf32>
    %225 = arith.addf %223, %224 : vector<2x128xf32>
    %c8_87 = arith.constant 8 : index
    %c128_88 = arith.constant 128 : index
    %226 = vector.load %arg13[%c8_87, %c128_88] : memref<16x256xf32, #tpu.memory_space<vmem>>, vector<2x128xf32>
    %cst_89 = arith.constant dense<0.000000e+00> : vector<2x128xf32>
    %227 = tpu.matmul %220, %44, %cst_89 {dimension_numbers = #tpu.dot_dimension_numbers<[1], [0], [0], [1], [0, 0, 1, 1], [], []>} : vector<2x32xf32>, vector<32x128xf32>, vector<2x128xf32> -> vector<2x128xf32>
    %228 = arith.addf %226, %227 : vector<2x128xf32>
    %229 = vector.extract_strided_slice %225 {offsets = [0, 0], sizes = [2, 32], strides = [1, 1]} : vector<2x128xf32> to vector<2x32xf32>
    %230 = arith.negf %229 : vector<2x32xf32>
    %231 = math.exp %230 : vector<2x32xf32>
    %cst_90 = arith.constant 1.000000e+00 : f32
    %232 = vector.broadcast %cst_90 : f32 to vector<2x32xf32>
    %233 = arith.addf %232, %231 : vector<2x32xf32>
    %234 = arith.divf %232, %233 : vector<2x32xf32>
    %235 = vector.extract_strided_slice %225 {offsets = [0, 32], sizes = [2, 32], strides = [1, 1]} : vector<2x128xf32> to vector<2x32xf32>
    %236 = arith.negf %235 : vector<2x32xf32>
    %237 = math.exp %236 : vector<2x32xf32>
    %cst_91 = arith.constant 1.000000e+00 : f32
    %238 = vector.broadcast %cst_91 : f32 to vector<2x32xf32>
    %239 = arith.addf %238, %237 : vector<2x32xf32>
    %240 = arith.divf %238, %239 : vector<2x32xf32>
    %241 = vector.extract_strided_slice %225 {offsets = [0, 64], sizes = [2, 32], strides = [1, 1]} : vector<2x128xf32> to vector<2x32xf32>
    %242 = math.tanh %241 : vector<2x32xf32>
    %243 = vector.extract_strided_slice %225 {offsets = [0, 96], sizes = [2, 32], strides = [1, 1]} : vector<2x128xf32> to vector<2x32xf32>
    %244 = arith.negf %243 : vector<2x32xf32>
    %245 = math.exp %244 : vector<2x32xf32>
    %cst_92 = arith.constant 1.000000e+00 : f32
    %246 = vector.broadcast %cst_92 : f32 to vector<2x32xf32>
    %247 = arith.addf %246, %245 : vector<2x32xf32>
    %248 = arith.divf %246, %247 : vector<2x32xf32>
    %249 = arith.mulf %240, %193 : vector<2x32xf32>
    %250 = arith.mulf %234, %242 : vector<2x32xf32>
    %251 = arith.addf %249, %250 : vector<2x32xf32>
    %252 = math.tanh %251 : vector<2x32xf32>
    %253 = arith.mulf %248, %252 : vector<2x32xf32>
    %254 = vector.extract_strided_slice %228 {offsets = [0, 0], sizes = [2, 32], strides = [1, 1]} : vector<2x128xf32> to vector<2x32xf32>
    %255 = arith.negf %254 : vector<2x32xf32>
    %256 = math.exp %255 : vector<2x32xf32>
    %cst_93 = arith.constant 1.000000e+00 : f32
    %257 = vector.broadcast %cst_93 : f32 to vector<2x32xf32>
    %258 = arith.addf %257, %256 : vector<2x32xf32>
    %259 = arith.divf %257, %258 : vector<2x32xf32>
    %260 = vector.extract_strided_slice %228 {offsets = [0, 32], sizes = [2, 32], strides = [1, 1]} : vector<2x128xf32> to vector<2x32xf32>
    %261 = arith.negf %260 : vector<2x32xf32>
    %262 = math.exp %261 : vector<2x32xf32>
    %cst_94 = arith.constant 1.000000e+00 : f32
    %263 = vector.broadcast %cst_94 : f32 to vector<2x32xf32>
    %264 = arith.addf %263, %262 : vector<2x32xf32>
    %265 = arith.divf %263, %264 : vector<2x32xf32>
    %266 = vector.extract_strided_slice %228 {offsets = [0, 64], sizes = [2, 32], strides = [1, 1]} : vector<2x128xf32> to vector<2x32xf32>
    %267 = math.tanh %266 : vector<2x32xf32>
    %268 = vector.extract_strided_slice %228 {offsets = [0, 96], sizes = [2, 32], strides = [1, 1]} : vector<2x128xf32> to vector<2x32xf32>
    %269 = arith.negf %268 : vector<2x32xf32>
    %270 = math.exp %269 : vector<2x32xf32>
    %cst_95 = arith.constant 1.000000e+00 : f32
    %271 = vector.broadcast %cst_95 : f32 to vector<2x32xf32>
    %272 = arith.addf %271, %270 : vector<2x32xf32>
    %273 = arith.divf %271, %272 : vector<2x32xf32>
    %274 = arith.mulf %265, %218 : vector<2x32xf32>
    %275 = arith.mulf %259, %267 : vector<2x32xf32>
    %276 = arith.addf %274, %275 : vector<2x32xf32>
    %277 = math.tanh %276 : vector<2x32xf32>
    %278 = arith.mulf %273, %277 : vector<2x32xf32>
    %c6_96 = arith.constant 6 : index
    %c0_97 = arith.constant 0 : index
    %279 = vector.load %arg14[%c6_96, %c0_97] : memref<16x64xf32, #tpu.memory_space<vmem>>, vector<2x32xf32>
    tpu.vector_store %arg14[%c6_96, %c0_97], %253 {strides = array<i32>} : memref<16x64xf32, #tpu.memory_space<vmem>>, vector<2x32xf32>,
    %c8_98 = arith.constant 8 : index
    %c32_99 = arith.constant 32 : index
    %280 = vector.load %arg14[%c8_98, %c32_99] : memref<16x64xf32, #tpu.memory_space<vmem>>, vector<2x32xf32>
    tpu.vector_store %arg14[%c8_98, %c32_99], %278 {strides = array<i32>} : memref<16x64xf32, #tpu.memory_space<vmem>>, vector<2x32xf32>,
    %c8_100 = arith.constant 8 : index
    %c0_101 = arith.constant 0 : index
    %281 = vector.load %arg13[%c8_100, %c0_101] : memref<16x256xf32, #tpu.memory_space<vmem>>, vector<2x128xf32>
    %cst_102 = arith.constant dense<0.000000e+00> : vector<2x128xf32>
    %282 = tpu.matmul %253, %43, %cst_102 {dimension_numbers = #tpu.dot_dimension_numbers<[1], [0], [0], [1], [0, 0, 1, 1], [], []>} : vector<2x32xf32>, vector<32x128xf32>, vector<2x128xf32> -> vector<2x128xf32>
    %283 = arith.addf %281, %282 : vector<2x128xf32>
    %c6_103 = arith.constant 6 : index
    %c128_104 = arith.constant 128 : index
    %284 = vector.load %arg13[%c6_103, %c128_104] : memref<16x256xf32, #tpu.memory_space<vmem>>, vector<2x128xf32>
    %cst_105 = arith.constant dense<0.000000e+00> : vector<2x128xf32>
    %285 = tpu.matmul %278, %44, %cst_105 {dimension_numbers = #tpu.dot_dimension_numbers<[1], [0], [0], [1], [0, 0, 1, 1], [], []>} : vector<2x32xf32>, vector<32x128xf32>, vector<2x128xf32> -> vector<2x128xf32>
    %286 = arith.addf %284, %285 : vector<2x128xf32>
    %287 = vector.extract_strided_slice %283 {offsets = [0, 0], sizes = [2, 32], strides = [1, 1]} : vector<2x128xf32> to vector<2x32xf32>
    %288 = arith.negf %287 : vector<2x32xf32>
    %289 = math.exp %288 : vector<2x32xf32>
    %cst_106 = arith.constant 1.000000e+00 : f32
    %290 = vector.broadcast %cst_106 : f32 to vector<2x32xf32>
    %291 = arith.addf %290, %289 : vector<2x32xf32>
    %292 = arith.divf %290, %291 : vector<2x32xf32>
    %293 = vector.extract_strided_slice %283 {offsets = [0, 32], sizes = [2, 32], strides = [1, 1]} : vector<2x128xf32> to vector<2x32xf32>
    %294 = arith.negf %293 : vector<2x32xf32>
    %295 = math.exp %294 : vector<2x32xf32>
    %cst_107 = arith.constant 1.000000e+00 : f32
    %296 = vector.broadcast %cst_107 : f32 to vector<2x32xf32>
    %297 = arith.addf %296, %295 : vector<2x32xf32>
    %298 = arith.divf %296, %297 : vector<2x32xf32>
    %299 = vector.extract_strided_slice %283 {offsets = [0, 64], sizes = [2, 32], strides = [1, 1]} : vector<2x128xf32> to vector<2x32xf32>
    %300 = math.tanh %299 : vector<2x32xf32>
    %301 = vector.extract_strided_slice %283 {offsets = [0, 96], sizes = [2, 32], strides = [1, 1]} : vector<2x128xf32> to vector<2x32xf32>
    %302 = arith.negf %301 : vector<2x32xf32>
    %303 = math.exp %302 : vector<2x32xf32>
    %cst_108 = arith.constant 1.000000e+00 : f32
    %304 = vector.broadcast %cst_108 : f32 to vector<2x32xf32>
    %305 = arith.addf %304, %303 : vector<2x32xf32>
    %306 = arith.divf %304, %305 : vector<2x32xf32>
    %307 = arith.mulf %298, %251 : vector<2x32xf32>
    %308 = arith.mulf %292, %300 : vector<2x32xf32>
    %309 = arith.addf %307, %308 : vector<2x32xf32>
    %310 = math.tanh %309 : vector<2x32xf32>
    %311 = arith.mulf %306, %310 : vector<2x32xf32>
    %312 = vector.extract_strided_slice %286 {offsets = [0, 0], sizes = [2, 32], strides = [1, 1]} : vector<2x128xf32> to vector<2x32xf32>
    %313 = arith.negf %312 : vector<2x32xf32>
    %314 = math.exp %313 : vector<2x32xf32>
    %cst_109 = arith.constant 1.000000e+00 : f32
    %315 = vector.broadcast %cst_109 : f32 to vector<2x32xf32>
    %316 = arith.addf %315, %314 : vector<2x32xf32>
    %317 = arith.divf %315, %316 : vector<2x32xf32>
    %318 = vector.extract_strided_slice %286 {offsets = [0, 32], sizes = [2, 32], strides = [1, 1]} : vector<2x128xf32> to vector<2x32xf32>
    %319 = arith.negf %318 : vector<2x32xf32>
    %320 = math.exp %319 : vector<2x32xf32>
    %cst_110 = arith.constant 1.000000e+00 : f32
    %321 = vector.broadcast %cst_110 : f32 to vector<2x32xf32>
    %322 = arith.addf %321, %320 : vector<2x32xf32>
    %323 = arith.divf %321, %322 : vector<2x32xf32>
    %324 = vector.extract_strided_slice %286 {offsets = [0, 64], sizes = [2, 32], strides = [1, 1]} : vector<2x128xf32> to vector<2x32xf32>
    %325 = math.tanh %324 : vector<2x32xf32>
    %326 = vector.extract_strided_slice %286 {offsets = [0, 96], sizes = [2, 32], strides = [1, 1]} : vector<2x128xf32> to vector<2x32xf32>
    %327 = arith.negf %326 : vector<2x32xf32>
    %328 = math.exp %327 : vector<2x32xf32>
    %cst_111 = arith.constant 1.000000e+00 : f32
    %329 = vector.broadcast %cst_111 : f32 to vector<2x32xf32>
    %330 = arith.addf %329, %328 : vector<2x32xf32>
    %331 = arith.divf %329, %330 : vector<2x32xf32>
    %332 = arith.mulf %323, %276 : vector<2x32xf32>
    %333 = arith.mulf %317, %325 : vector<2x32xf32>
    %334 = arith.addf %332, %333 : vector<2x32xf32>
    %335 = math.tanh %334 : vector<2x32xf32>
    %336 = arith.mulf %331, %335 : vector<2x32xf32>
    %c8_112 = arith.constant 8 : index
    %c0_113 = arith.constant 0 : index
    %337 = vector.load %arg14[%c8_112, %c0_113] : memref<16x64xf32, #tpu.memory_space<vmem>>, vector<2x32xf32>
    tpu.vector_store %arg14[%c8_112, %c0_113], %311 {strides = array<i32>} : memref<16x64xf32, #tpu.memory_space<vmem>>, vector<2x32xf32>,
    %c6_114 = arith.constant 6 : index
    %c32_115 = arith.constant 32 : index
    %338 = vector.load %arg14[%c6_114, %c32_115] : memref<16x64xf32, #tpu.memory_space<vmem>>, vector<2x32xf32>
    tpu.vector_store %arg14[%c6_114, %c32_115], %336 {strides = array<i32>} : memref<16x64xf32, #tpu.memory_space<vmem>>, vector<2x32xf32>,
    %c10_116 = arith.constant 10 : index
    %c0_117 = arith.constant 0 : index
    %339 = vector.load %arg13[%c10_116, %c0_117] : memref<16x256xf32, #tpu.memory_space<vmem>>, vector<2x128xf32>
    %cst_118 = arith.constant dense<0.000000e+00> : vector<2x128xf32>
    %340 = tpu.matmul %311, %43, %cst_118 {dimension_numbers = #tpu.dot_dimension_numbers<[1], [0], [0], [1], [0, 0, 1, 1], [], []>} : vector<2x32xf32>, vector<32x128xf32>, vector<2x128xf32> -> vector<2x128xf32>
    %341 = arith.addf %339, %340 : vector<2x128xf32>
    %c4_119 = arith.constant 4 : index
    %c128_120 = arith.constant 128 : index
    %342 = vector.load %arg13[%c4_119, %c128_120] : memref<16x256xf32, #tpu.memory_space<vmem>>, vector<2x128xf32>
    %cst_121 = arith.constant dense<0.000000e+00> : vector<2x128xf32>
    %343 = tpu.matmul %336, %44, %cst_121 {dimension_numbers = #tpu.dot_dimension_numbers<[1], [0], [0], [1], [0, 0, 1, 1], [], []>} : vector<2x32xf32>, vector<32x128xf32>, vector<2x128xf32> -> vector<2x128xf32>
    %344 = arith.addf %342, %343 : vector<2x128xf32>
    %345 = vector.extract_strided_slice %341 {offsets = [0, 0], sizes = [2, 32], strides = [1, 1]} : vector<2x128xf32> to vector<2x32xf32>
    %346 = arith.negf %345 : vector<2x32xf32>
    %347 = math.exp %346 : vector<2x32xf32>
    %cst_122 = arith.constant 1.000000e+00 : f32
    %348 = vector.broadcast %cst_122 : f32 to vector<2x32xf32>
    %349 = arith.addf %348, %347 : vector<2x32xf32>
    %350 = arith.divf %348, %349 : vector<2x32xf32>
    %351 = vector.extract_strided_slice %341 {offsets = [0, 32], sizes = [2, 32], strides = [1, 1]} : vector<2x128xf32> to vector<2x32xf32>
    %352 = arith.negf %351 : vector<2x32xf32>
    %353 = math.exp %352 : vector<2x32xf32>
    %cst_123 = arith.constant 1.000000e+00 : f32
    %354 = vector.broadcast %cst_123 : f32 to vector<2x32xf32>
    %355 = arith.addf %354, %353 : vector<2x32xf32>
    %356 = arith.divf %354, %355 : vector<2x32xf32>
    %357 = vector.extract_strided_slice %341 {offsets = [0, 64], sizes = [2, 32], strides = [1, 1]} : vector<2x128xf32> to vector<2x32xf32>
    %358 = math.tanh %357 : vector<2x32xf32>
    %359 = vector.extract_strided_slice %341 {offsets = [0, 96], sizes = [2, 32], strides = [1, 1]} : vector<2x128xf32> to vector<2x32xf32>
    %360 = arith.negf %359 : vector<2x32xf32>
    %361 = math.exp %360 : vector<2x32xf32>
    %cst_124 = arith.constant 1.000000e+00 : f32
    %362 = vector.broadcast %cst_124 : f32 to vector<2x32xf32>
    %363 = arith.addf %362, %361 : vector<2x32xf32>
    %364 = arith.divf %362, %363 : vector<2x32xf32>
    %365 = arith.mulf %356, %309 : vector<2x32xf32>
    %366 = arith.mulf %350, %358 : vector<2x32xf32>
    %367 = arith.addf %365, %366 : vector<2x32xf32>
    %368 = math.tanh %367 : vector<2x32xf32>
    %369 = arith.mulf %364, %368 : vector<2x32xf32>
    %370 = vector.extract_strided_slice %344 {offsets = [0, 0], sizes = [2, 32], strides = [1, 1]} : vector<2x128xf32> to vector<2x32xf32>
    %371 = arith.negf %370 : vector<2x32xf32>
    %372 = math.exp %371 : vector<2x32xf32>
    %cst_125 = arith.constant 1.000000e+00 : f32
    %373 = vector.broadcast %cst_125 : f32 to vector<2x32xf32>
    %374 = arith.addf %373, %372 : vector<2x32xf32>
    %375 = arith.divf %373, %374 : vector<2x32xf32>
    %376 = vector.extract_strided_slice %344 {offsets = [0, 32], sizes = [2, 32], strides = [1, 1]} : vector<2x128xf32> to vector<2x32xf32>
    %377 = arith.negf %376 : vector<2x32xf32>
    %378 = math.exp %377 : vector<2x32xf32>
    %cst_126 = arith.constant 1.000000e+00 : f32
    %379 = vector.broadcast %cst_126 : f32 to vector<2x32xf32>
    %380 = arith.addf %379, %378 : vector<2x32xf32>
    %381 = arith.divf %379, %380 : vector<2x32xf32>
    %382 = vector.extract_strided_slice %344 {offsets = [0, 64], sizes = [2, 32], strides = [1, 1]} : vector<2x128xf32> to vector<2x32xf32>
    %383 = math.tanh %382 : vector<2x32xf32>
    %384 = vector.extract_strided_slice %344 {offsets = [0, 96], sizes = [2, 32], strides = [1, 1]} : vector<2x128xf32> to vector<2x32xf32>
    %385 = arith.negf %384 : vector<2x32xf32>
    %386 = math.exp %385 : vector<2x32xf32>
    %cst_127 = arith.constant 1.000000e+00 : f32
    %387 = vector.broadcast %cst_127 : f32 to vector<2x32xf32>
    %388 = arith.addf %387, %386 : vector<2x32xf32>
    %389 = arith.divf %387, %388 : vector<2x32xf32>
    %390 = arith.mulf %381, %334 : vector<2x32xf32>
    %391 = arith.mulf %375, %383 : vector<2x32xf32>
    %392 = arith.addf %390, %391 : vector<2x32xf32>
    %393 = math.tanh %392 : vector<2x32xf32>
    %394 = arith.mulf %389, %393 : vector<2x32xf32>
    %c10_128 = arith.constant 10 : index
    %c0_129 = arith.constant 0 : index
    %395 = vector.load %arg14[%c10_128, %c0_129] : memref<16x64xf32, #tpu.memory_space<vmem>>, vector<2x32xf32>
    tpu.vector_store %arg14[%c10_128, %c0_129], %369 {strides = array<i32>} : memref<16x64xf32, #tpu.memory_space<vmem>>, vector<2x32xf32>,
    %c4_130 = arith.constant 4 : index
    %c32_131 = arith.constant 32 : index
    %396 = vector.load %arg14[%c4_130, %c32_131] : memref<16x64xf32, #tpu.memory_space<vmem>>, vector<2x32xf32>
    tpu.vector_store %arg14[%c4_130, %c32_131], %394 {strides = array<i32>} : memref<16x64xf32, #tpu.memory_space<vmem>>, vector<2x32xf32>,
    %c12_132 = arith.constant 12 : index
    %c0_133 = arith.constant 0 : index
    %397 = vector.load %arg13[%c12_132, %c0_133] : memref<16x256xf32, #tpu.memory_space<vmem>>, vector<2x128xf32>
    %cst_134 = arith.constant dense<0.000000e+00> : vector<2x128xf32>
    %398 = tpu.matmul %369, %43, %cst_134 {dimension_numbers = #tpu.dot_dimension_numbers<[1], [0], [0], [1], [0, 0, 1, 1], [], []>} : vector<2x32xf32>, vector<32x128xf32>, vector<2x128xf32> -> vector<2x128xf32>
    %399 = arith.addf %397, %398 : vector<2x128xf32>
    %c2_135 = arith.constant 2 : index
    %c128_136 = arith.constant 128 : index
    %400 = vector.load %arg13[%c2_135, %c128_136] : memref<16x256xf32, #tpu.memory_space<vmem>>, vector<2x128xf32>
    %cst_137 = arith.constant dense<0.000000e+00> : vector<2x128xf32>
    %401 = tpu.matmul %394, %44, %cst_137 {dimension_numbers = #tpu.dot_dimension_numbers<[1], [0], [0], [1], [0, 0, 1, 1], [], []>} : vector<2x32xf32>, vector<32x128xf32>, vector<2x128xf32> -> vector<2x128xf32>
    %402 = arith.addf %400, %401 : vector<2x128xf32>
    %403 = vector.extract_strided_slice %399 {offsets = [0, 0], sizes = [2, 32], strides = [1, 1]} : vector<2x128xf32> to vector<2x32xf32>
    %404 = arith.negf %403 : vector<2x32xf32>
    %405 = math.exp %404 : vector<2x32xf32>
    %cst_138 = arith.constant 1.000000e+00 : f32
    %406 = vector.broadcast %cst_138 : f32 to vector<2x32xf32>
    %407 = arith.addf %406, %405 : vector<2x32xf32>
    %408 = arith.divf %406, %407 : vector<2x32xf32>
    %409 = vector.extract_strided_slice %399 {offsets = [0, 32], sizes = [2, 32], strides = [1, 1]} : vector<2x128xf32> to vector<2x32xf32>
    %410 = arith.negf %409 : vector<2x32xf32>
    %411 = math.exp %410 : vector<2x32xf32>
    %cst_139 = arith.constant 1.000000e+00 : f32
    %412 = vector.broadcast %cst_139 : f32 to vector<2x32xf32>
    %413 = arith.addf %412, %411 : vector<2x32xf32>
    %414 = arith.divf %412, %413 : vector<2x32xf32>
    %415 = vector.extract_strided_slice %399 {offsets = [0, 64], sizes = [2, 32], strides = [1, 1]} : vector<2x128xf32> to vector<2x32xf32>
    %416 = math.tanh %415 : vector<2x32xf32>
    %417 = vector.extract_strided_slice %399 {offsets = [0, 96], sizes = [2, 32], strides = [1, 1]} : vector<2x128xf32> to vector<2x32xf32>
    %418 = arith.negf %417 : vector<2x32xf32>
    %419 = math.exp %418 : vector<2x32xf32>
    %cst_140 = arith.constant 1.000000e+00 : f32
    %420 = vector.broadcast %cst_140 : f32 to vector<2x32xf32>
    %421 = arith.addf %420, %419 : vector<2x32xf32>
    %422 = arith.divf %420, %421 : vector<2x32xf32>
    %423 = arith.mulf %414, %367 : vector<2x32xf32>
    %424 = arith.mulf %408, %416 : vector<2x32xf32>
    %425 = arith.addf %423, %424 : vector<2x32xf32>
    %426 = math.tanh %425 : vector<2x32xf32>
    %427 = arith.mulf %422, %426 : vector<2x32xf32>
    %428 = vector.extract_strided_slice %402 {offsets = [0, 0], sizes = [2, 32], strides = [1, 1]} : vector<2x128xf32> to vector<2x32xf32>
    %429 = arith.negf %428 : vector<2x32xf32>
    %430 = math.exp %429 : vector<2x32xf32>
    %cst_141 = arith.constant 1.000000e+00 : f32
    %431 = vector.broadcast %cst_141 : f32 to vector<2x32xf32>
    %432 = arith.addf %431, %430 : vector<2x32xf32>
    %433 = arith.divf %431, %432 : vector<2x32xf32>
    %434 = vector.extract_strided_slice %402 {offsets = [0, 32], sizes = [2, 32], strides = [1, 1]} : vector<2x128xf32> to vector<2x32xf32>
    %435 = arith.negf %434 : vector<2x32xf32>
    %436 = math.exp %435 : vector<2x32xf32>
    %cst_142 = arith.constant 1.000000e+00 : f32
    %437 = vector.broadcast %cst_142 : f32 to vector<2x32xf32>
    %438 = arith.addf %437, %436 : vector<2x32xf32>
    %439 = arith.divf %437, %438 : vector<2x32xf32>
    %440 = vector.extract_strided_slice %402 {offsets = [0, 64], sizes = [2, 32], strides = [1, 1]} : vector<2x128xf32> to vector<2x32xf32>
    %441 = math.tanh %440 : vector<2x32xf32>
    %442 = vector.extract_strided_slice %402 {offsets = [0, 96], sizes = [2, 32], strides = [1, 1]} : vector<2x128xf32> to vector<2x32xf32>
    %443 = arith.negf %442 : vector<2x32xf32>
    %444 = math.exp %443 : vector<2x32xf32>
    %cst_143 = arith.constant 1.000000e+00 : f32
    %445 = vector.broadcast %cst_143 : f32 to vector<2x32xf32>
    %446 = arith.addf %445, %444 : vector<2x32xf32>
    %447 = arith.divf %445, %446 : vector<2x32xf32>
    %448 = arith.mulf %439, %392 : vector<2x32xf32>
    %449 = arith.mulf %433, %441 : vector<2x32xf32>
    %450 = arith.addf %448, %449 : vector<2x32xf32>
    %451 = math.tanh %450 : vector<2x32xf32>
    %452 = arith.mulf %447, %451 : vector<2x32xf32>
    %c12_144 = arith.constant 12 : index
    %c0_145 = arith.constant 0 : index
    %453 = vector.load %arg14[%c12_144, %c0_145] : memref<16x64xf32, #tpu.memory_space<vmem>>, vector<2x32xf32>
    tpu.vector_store %arg14[%c12_144, %c0_145], %427 {strides = array<i32>} : memref<16x64xf32, #tpu.memory_space<vmem>>, vector<2x32xf32>,
    %c2_146 = arith.constant 2 : index
    %c32_147 = arith.constant 32 : index
    %454 = vector.load %arg14[%c2_146, %c32_147] : memref<16x64xf32, #tpu.memory_space<vmem>>, vector<2x32xf32>
    tpu.vector_store %arg14[%c2_146, %c32_147], %452 {strides = array<i32>} : memref<16x64xf32, #tpu.memory_space<vmem>>, vector<2x32xf32>,
    %c14_148 = arith.constant 14 : index
    %c0_149 = arith.constant 0 : index
    %455 = vector.load %arg13[%c14_148, %c0_149] : memref<16x256xf32, #tpu.memory_space<vmem>>, vector<2x128xf32>
    %cst_150 = arith.constant dense<0.000000e+00> : vector<2x128xf32>
    %456 = tpu.matmul %427, %43, %cst_150 {dimension_numbers = #tpu.dot_dimension_numbers<[1], [0], [0], [1], [0, 0, 1, 1], [], []>} : vector<2x32xf32>, vector<32x128xf32>, vector<2x128xf32> -> vector<2x128xf32>
    %457 = arith.addf %455, %456 : vector<2x128xf32>
    %c0_151 = arith.constant 0 : index
    %c128_152 = arith.constant 128 : index
    %458 = vector.load %arg13[%c0_151, %c128_152] : memref<16x256xf32, #tpu.memory_space<vmem>>, vector<2x128xf32>
    %cst_153 = arith.constant dense<0.000000e+00> : vector<2x128xf32>
    %459 = tpu.matmul %452, %44, %cst_153 {dimension_numbers = #tpu.dot_dimension_numbers<[1], [0], [0], [1], [0, 0, 1, 1], [], []>} : vector<2x32xf32>, vector<32x128xf32>, vector<2x128xf32> -> vector<2x128xf32>
    %460 = arith.addf %458, %459 : vector<2x128xf32>
    %461 = vector.extract_strided_slice %457 {offsets = [0, 0], sizes = [2, 32], strides = [1, 1]} : vector<2x128xf32> to vector<2x32xf32>
    %462 = arith.negf %461 : vector<2x32xf32>
    %463 = math.exp %462 : vector<2x32xf32>
    %cst_154 = arith.constant 1.000000e+00 : f32
    %464 = vector.broadcast %cst_154 : f32 to vector<2x32xf32>
    %465 = arith.addf %464, %463 : vector<2x32xf32>
    %466 = arith.divf %464, %465 : vector<2x32xf32>
    %467 = vector.extract_strided_slice %457 {offsets = [0, 32], sizes = [2, 32], strides = [1, 1]} : vector<2x128xf32> to vector<2x32xf32>
    %468 = arith.negf %467 : vector<2x32xf32>
    %469 = math.exp %468 : vector<2x32xf32>
    %cst_155 = arith.constant 1.000000e+00 : f32
    %470 = vector.broadcast %cst_155 : f32 to vector<2x32xf32>
    %471 = arith.addf %470, %469 : vector<2x32xf32>
    %472 = arith.divf %470, %471 : vector<2x32xf32>
    %473 = vector.extract_strided_slice %457 {offsets = [0, 64], sizes = [2, 32], strides = [1, 1]} : vector<2x128xf32> to vector<2x32xf32>
    %474 = math.tanh %473 : vector<2x32xf32>
    %475 = vector.extract_strided_slice %457 {offsets = [0, 96], sizes = [2, 32], strides = [1, 1]} : vector<2x128xf32> to vector<2x32xf32>
    %476 = arith.negf %475 : vector<2x32xf32>
    %477 = math.exp %476 : vector<2x32xf32>
    %cst_156 = arith.constant 1.000000e+00 : f32
    %478 = vector.broadcast %cst_156 : f32 to vector<2x32xf32>
    %479 = arith.addf %478, %477 : vector<2x32xf32>
    %480 = arith.divf %478, %479 : vector<2x32xf32>
    %481 = arith.mulf %472, %425 : vector<2x32xf32>
    %482 = arith.mulf %466, %474 : vector<2x32xf32>
    %483 = arith.addf %481, %482 : vector<2x32xf32>
    %484 = math.tanh %483 : vector<2x32xf32>
    %485 = arith.mulf %480, %484 : vector<2x32xf32>
    %486 = vector.extract_strided_slice %460 {offsets = [0, 0], sizes = [2, 32], strides = [1, 1]} : vector<2x128xf32> to vector<2x32xf32>
    %487 = arith.negf %486 : vector<2x32xf32>
    %488 = math.exp %487 : vector<2x32xf32>
    %cst_157 = arith.constant 1.000000e+00 : f32
    %489 = vector.broadcast %cst_157 : f32 to vector<2x32xf32>
    %490 = arith.addf %489, %488 : vector<2x32xf32>
    %491 = arith.divf %489, %490 : vector<2x32xf32>
    %492 = vector.extract_strided_slice %460 {offsets = [0, 32], sizes = [2, 32], strides = [1, 1]} : vector<2x128xf32> to vector<2x32xf32>
    %493 = arith.negf %492 : vector<2x32xf32>
    %494 = math.exp %493 : vector<2x32xf32>
    %cst_158 = arith.constant 1.000000e+00 : f32
    %495 = vector.broadcast %cst_158 : f32 to vector<2x32xf32>
    %496 = arith.addf %495, %494 : vector<2x32xf32>
    %497 = arith.divf %495, %496 : vector<2x32xf32>
    %498 = vector.extract_strided_slice %460 {offsets = [0, 64], sizes = [2, 32], strides = [1, 1]} : vector<2x128xf32> to vector<2x32xf32>
    %499 = math.tanh %498 : vector<2x32xf32>
    %500 = vector.extract_strided_slice %460 {offsets = [0, 96], sizes = [2, 32], strides = [1, 1]} : vector<2x128xf32> to vector<2x32xf32>
    %501 = arith.negf %500 : vector<2x32xf32>
    %502 = math.exp %501 : vector<2x32xf32>
    %cst_159 = arith.constant 1.000000e+00 : f32
    %503 = vector.broadcast %cst_159 : f32 to vector<2x32xf32>
    %504 = arith.addf %503, %502 : vector<2x32xf32>
    %505 = arith.divf %503, %504 : vector<2x32xf32>
    %506 = arith.mulf %497, %450 : vector<2x32xf32>
    %507 = arith.mulf %491, %499 : vector<2x32xf32>
    %508 = arith.addf %506, %507 : vector<2x32xf32>
    %509 = math.tanh %508 : vector<2x32xf32>
    %510 = arith.mulf %505, %509 : vector<2x32xf32>
    %c14_160 = arith.constant 14 : index
    %c0_161 = arith.constant 0 : index
    %511 = vector.load %arg14[%c14_160, %c0_161] : memref<16x64xf32, #tpu.memory_space<vmem>>, vector<2x32xf32>
    tpu.vector_store %arg14[%c14_160, %c0_161], %485 {strides = array<i32>} : memref<16x64xf32, #tpu.memory_space<vmem>>, vector<2x32xf32>,
    %c0_162 = arith.constant 0 : index
    %c32_163 = arith.constant 32 : index
    %512 = vector.load %arg14[%c0_162, %c32_163] : memref<16x64xf32, #tpu.memory_space<vmem>>, vector<2x32xf32>
    tpu.vector_store %arg14[%c0_162, %c32_163], %510 {strides = array<i32>} : memref<16x64xf32, #tpu.memory_space<vmem>>, vector<2x32xf32>,
    %c0_164 = arith.constant 0 : index
    %c0_165 = arith.constant 0 : index
    %513 = vector.load %arg14[%c0_164, %c0_165] : memref<16x64xf32, #tpu.memory_space<vmem>>, vector<16x64xf32>
    %c0_166 = arith.constant 0 : index
    %c0_167 = arith.constant 0 : index
    %514 = vector.load %arg5[%c0_166, %c0_167] : memref<64x256xf32, #tpu.memory_space<vmem>>, vector<64x256xf32>
    %cst_168 = arith.constant dense<0.000000e+00> : vector<16x256xf32>
    %515 = tpu.matmul %513, %514, %cst_168 {dimension_numbers = #tpu.dot_dimension_numbers<[1], [0], [0], [1], [0, 0, 1, 1], [], []>} : vector<16x64xf32>, vector<64x256xf32>, vector<16x256xf32> -> vector<16x256xf32>
    %c0_169 = arith.constant 0 : index
    %c0_170 = arith.constant 0 : index
    %516 = vector.load %arg8[%c0_169, %c0_170] : memref<1x256xf32, #tpu.memory_space<vmem>>, vector<1x256xf32>
    %517 = vector.broadcast %516 : vector<1x256xf32> to vector<16x256xf32>
    %518 = arith.addf %515, %517 : vector<16x256xf32>
    %c0_171 = arith.constant 0 : index
    %c0_172 = arith.constant 0 : index
    %519 = vector.load %arg13[%c0_171, %c0_172] : memref<16x256xf32, #tpu.memory_space<vmem>>, vector<16x256xf32>
    tpu.vector_store %arg13[%c0_171, %c0_172], %518 {strides = array<i32>} : memref<16x256xf32, #tpu.memory_space<vmem>>, vector<16x256xf32>,
    %c0_173 = arith.constant 0 : index
    %c0_174 = arith.constant 0 : index
    %520 = vector.load %arg6[%c0_173, %c0_174] : memref<32x128xf32, #tpu.memory_space<vmem>>, vector<32x128xf32>
    %c0_175 = arith.constant 0 : index
    %c0_176 = arith.constant 0 : index
    %521 = vector.load %arg7[%c0_175, %c0_176] : memref<32x128xf32, #tpu.memory_space<vmem>>, vector<32x128xf32>
    %cst_177 = arith.constant 0.000000e+00 : f32
    %522 = vector.broadcast %cst_177 : f32 to vector<2x32xf32>
    %cst_178 = arith.constant 0.000000e+00 : f32
    %523 = vector.broadcast %cst_178 : f32 to vector<2x32xf32>
    %cst_179 = arith.constant 0.000000e+00 : f32
    %524 = vector.broadcast %cst_179 : f32 to vector<2x32xf32>
    %cst_180 = arith.constant 0.000000e+00 : f32
    %525 = vector.broadcast %cst_180 : f32 to vector<2x32xf32>
    %c0_181 = arith.constant 0 : index
    %c0_182 = arith.constant 0 : index
    %526 = vector.load %arg13[%c0_181, %c0_182] : memref<16x256xf32, #tpu.memory_space<vmem>>, vector<2x128xf32>
    %cst_183 = arith.constant dense<0.000000e+00> : vector<2x128xf32>
    %527 = tpu.matmul %522, %520, %cst_183 {dimension_numbers = #tpu.dot_dimension_numbers<[1], [0], [0], [1], [0, 0, 1, 1], [], []>} : vector<2x32xf32>, vector<32x128xf32>, vector<2x128xf32> -> vector<2x128xf32>
    %528 = arith.addf %526, %527 : vector<2x128xf32>
    %c14_184 = arith.constant 14 : index
    %c128_185 = arith.constant 128 : index
    %529 = vector.load %arg13[%c14_184, %c128_185] : memref<16x256xf32, #tpu.memory_space<vmem>>, vector<2x128xf32>
    %cst_186 = arith.constant dense<0.000000e+00> : vector<2x128xf32>
    %530 = tpu.matmul %524, %521, %cst_186 {dimension_numbers = #tpu.dot_dimension_numbers<[1], [0], [0], [1], [0, 0, 1, 1], [], []>} : vector<2x32xf32>, vector<32x128xf32>, vector<2x128xf32> -> vector<2x128xf32>
    %531 = arith.addf %529, %530 : vector<2x128xf32>
    %532 = vector.extract_strided_slice %528 {offsets = [0, 0], sizes = [2, 32], strides = [1, 1]} : vector<2x128xf32> to vector<2x32xf32>
    %533 = arith.negf %532 : vector<2x32xf32>
    %534 = math.exp %533 : vector<2x32xf32>
    %cst_187 = arith.constant 1.000000e+00 : f32
    %535 = vector.broadcast %cst_187 : f32 to vector<2x32xf32>
    %536 = arith.addf %535, %534 : vector<2x32xf32>
    %537 = arith.divf %535, %536 : vector<2x32xf32>
    %538 = vector.extract_strided_slice %528 {offsets = [0, 32], sizes = [2, 32], strides = [1, 1]} : vector<2x128xf32> to vector<2x32xf32>
    %539 = arith.negf %538 : vector<2x32xf32>
    %540 = math.exp %539 : vector<2x32xf32>
    %cst_188 = arith.constant 1.000000e+00 : f32
    %541 = vector.broadcast %cst_188 : f32 to vector<2x32xf32>
    %542 = arith.addf %541, %540 : vector<2x32xf32>
    %543 = arith.divf %541, %542 : vector<2x32xf32>
    %544 = vector.extract_strided_slice %528 {offsets = [0, 64], sizes = [2, 32], strides = [1, 1]} : vector<2x128xf32> to vector<2x32xf32>
    %545 = math.tanh %544 : vector<2x32xf32>
    %546 = vector.extract_strided_slice %528 {offsets = [0, 96], sizes = [2, 32], strides = [1, 1]} : vector<2x128xf32> to vector<2x32xf32>
    %547 = arith.negf %546 : vector<2x32xf32>
    %548 = math.exp %547 : vector<2x32xf32>
    %cst_189 = arith.constant 1.000000e+00 : f32
    %549 = vector.broadcast %cst_189 : f32 to vector<2x32xf32>
    %550 = arith.addf %549, %548 : vector<2x32xf32>
    %551 = arith.divf %549, %550 : vector<2x32xf32>
    %552 = arith.mulf %543, %523 : vector<2x32xf32>
    %553 = arith.mulf %537, %545 : vector<2x32xf32>
    %554 = arith.addf %552, %553 : vector<2x32xf32>
    %555 = math.tanh %554 : vector<2x32xf32>
    %556 = arith.mulf %551, %555 : vector<2x32xf32>
    %557 = vector.extract_strided_slice %531 {offsets = [0, 0], sizes = [2, 32], strides = [1, 1]} : vector<2x128xf32> to vector<2x32xf32>
    %558 = arith.negf %557 : vector<2x32xf32>
    %559 = math.exp %558 : vector<2x32xf32>
    %cst_190 = arith.constant 1.000000e+00 : f32
    %560 = vector.broadcast %cst_190 : f32 to vector<2x32xf32>
    %561 = arith.addf %560, %559 : vector<2x32xf32>
    %562 = arith.divf %560, %561 : vector<2x32xf32>
    %563 = vector.extract_strided_slice %531 {offsets = [0, 32], sizes = [2, 32], strides = [1, 1]} : vector<2x128xf32> to vector<2x32xf32>
    %564 = arith.negf %563 : vector<2x32xf32>
    %565 = math.exp %564 : vector<2x32xf32>
    %cst_191 = arith.constant 1.000000e+00 : f32
    %566 = vector.broadcast %cst_191 : f32 to vector<2x32xf32>
    %567 = arith.addf %566, %565 : vector<2x32xf32>
    %568 = arith.divf %566, %567 : vector<2x32xf32>
    %569 = vector.extract_strided_slice %531 {offsets = [0, 64], sizes = [2, 32], strides = [1, 1]} : vector<2x128xf32> to vector<2x32xf32>
    %570 = math.tanh %569 : vector<2x32xf32>
    %571 = vector.extract_strided_slice %531 {offsets = [0, 96], sizes = [2, 32], strides = [1, 1]} : vector<2x128xf32> to vector<2x32xf32>
    %572 = arith.negf %571 : vector<2x32xf32>
    %573 = math.exp %572 : vector<2x32xf32>
    %cst_192 = arith.constant 1.000000e+00 : f32
    %574 = vector.broadcast %cst_192 : f32 to vector<2x32xf32>
    %575 = arith.addf %574, %573 : vector<2x32xf32>
    %576 = arith.divf %574, %575 : vector<2x32xf32>
    %577 = arith.mulf %568, %525 : vector<2x32xf32>
    %578 = arith.mulf %562, %570 : vector<2x32xf32>
    %579 = arith.addf %577, %578 : vector<2x32xf32>
    %580 = math.tanh %579 : vector<2x32xf32>
    %581 = arith.mulf %576, %580 : vector<2x32xf32>
    %c0_193 = arith.constant 0 : index
    %c0_194 = arith.constant 0 : index
    %582 = vector.load %arg15[%c0_193, %c0_194] : memref<16x64xf32, #tpu.memory_space<vmem>>, vector<2x32xf32>
    tpu.vector_store %arg15[%c0_193, %c0_194], %556 {strides = array<i32>} : memref<16x64xf32, #tpu.memory_space<vmem>>, vector<2x32xf32>,
    %c14_195 = arith.constant 14 : index
    %c32_196 = arith.constant 32 : index
    %583 = vector.load %arg15[%c14_195, %c32_196] : memref<16x64xf32, #tpu.memory_space<vmem>>, vector<2x32xf32>
    tpu.vector_store %arg15[%c14_195, %c32_196], %581 {strides = array<i32>} : memref<16x64xf32, #tpu.memory_space<vmem>>, vector<2x32xf32>,
    %c2_197 = arith.constant 2 : index
    %c0_198 = arith.constant 0 : index
    %584 = vector.load %arg13[%c2_197, %c0_198] : memref<16x256xf32, #tpu.memory_space<vmem>>, vector<2x128xf32>
    %cst_199 = arith.constant dense<0.000000e+00> : vector<2x128xf32>
    %585 = tpu.matmul %556, %520, %cst_199 {dimension_numbers = #tpu.dot_dimension_numbers<[1], [0], [0], [1], [0, 0, 1, 1], [], []>} : vector<2x32xf32>, vector<32x128xf32>, vector<2x128xf32> -> vector<2x128xf32>
    %586 = arith.addf %584, %585 : vector<2x128xf32>
    %c12_200 = arith.constant 12 : index
    %c128_201 = arith.constant 128 : index
    %587 = vector.load %arg13[%c12_200, %c128_201] : memref<16x256xf32, #tpu.memory_space<vmem>>, vector<2x128xf32>
    %cst_202 = arith.constant dense<0.000000e+00> : vector<2x128xf32>
    %588 = tpu.matmul %581, %521, %cst_202 {dimension_numbers = #tpu.dot_dimension_numbers<[1], [0], [0], [1], [0, 0, 1, 1], [], []>} : vector<2x32xf32>, vector<32x128xf32>, vector<2x128xf32> -> vector<2x128xf32>
    %589 = arith.addf %587, %588 : vector<2x128xf32>
    %590 = vector.extract_strided_slice %586 {offsets = [0, 0], sizes = [2, 32], strides = [1, 1]} : vector<2x128xf32> to vector<2x32xf32>
    %591 = arith.negf %590 : vector<2x32xf32>
    %592 = math.exp %591 : vector<2x32xf32>
    %cst_203 = arith.constant 1.000000e+00 : f32
    %593 = vector.broadcast %cst_203 : f32 to vector<2x32xf32>
    %594 = arith.addf %593, %592 : vector<2x32xf32>
    %595 = arith.divf %593, %594 : vector<2x32xf32>
    %596 = vector.extract_strided_slice %586 {offsets = [0, 32], sizes = [2, 32], strides = [1, 1]} : vector<2x128xf32> to vector<2x32xf32>
    %597 = arith.negf %596 : vector<2x32xf32>
    %598 = math.exp %597 : vector<2x32xf32>
    %cst_204 = arith.constant 1.000000e+00 : f32
    %599 = vector.broadcast %cst_204 : f32 to vector<2x32xf32>
    %600 = arith.addf %599, %598 : vector<2x32xf32>
    %601 = arith.divf %599, %600 : vector<2x32xf32>
    %602 = vector.extract_strided_slice %586 {offsets = [0, 64], sizes = [2, 32], strides = [1, 1]} : vector<2x128xf32> to vector<2x32xf32>
    %603 = math.tanh %602 : vector<2x32xf32>
    %604 = vector.extract_strided_slice %586 {offsets = [0, 96], sizes = [2, 32], strides = [1, 1]} : vector<2x128xf32> to vector<2x32xf32>
    %605 = arith.negf %604 : vector<2x32xf32>
    %606 = math.exp %605 : vector<2x32xf32>
    %cst_205 = arith.constant 1.000000e+00 : f32
    %607 = vector.broadcast %cst_205 : f32 to vector<2x32xf32>
    %608 = arith.addf %607, %606 : vector<2x32xf32>
    %609 = arith.divf %607, %608 : vector<2x32xf32>
    %610 = arith.mulf %601, %554 : vector<2x32xf32>
    %611 = arith.mulf %595, %603 : vector<2x32xf32>
    %612 = arith.addf %610, %611 : vector<2x32xf32>
    %613 = math.tanh %612 : vector<2x32xf32>
    %614 = arith.mulf %609, %613 : vector<2x32xf32>
    %615 = vector.extract_strided_slice %589 {offsets = [0, 0], sizes = [2, 32], strides = [1, 1]} : vector<2x128xf32> to vector<2x32xf32>
    %616 = arith.negf %615 : vector<2x32xf32>
    %617 = math.exp %616 : vector<2x32xf32>
    %cst_206 = arith.constant 1.000000e+00 : f32
    %618 = vector.broadcast %cst_206 : f32 to vector<2x32xf32>
    %619 = arith.addf %618, %617 : vector<2x32xf32>
    %620 = arith.divf %618, %619 : vector<2x32xf32>
    %621 = vector.extract_strided_slice %589 {offsets = [0, 32], sizes = [2, 32], strides = [1, 1]} : vector<2x128xf32> to vector<2x32xf32>
    %622 = arith.negf %621 : vector<2x32xf32>
    %623 = math.exp %622 : vector<2x32xf32>
    %cst_207 = arith.constant 1.000000e+00 : f32
    %624 = vector.broadcast %cst_207 : f32 to vector<2x32xf32>
    %625 = arith.addf %624, %623 : vector<2x32xf32>
    %626 = arith.divf %624, %625 : vector<2x32xf32>
    %627 = vector.extract_strided_slice %589 {offsets = [0, 64], sizes = [2, 32], strides = [1, 1]} : vector<2x128xf32> to vector<2x32xf32>
    %628 = math.tanh %627 : vector<2x32xf32>
    %629 = vector.extract_strided_slice %589 {offsets = [0, 96], sizes = [2, 32], strides = [1, 1]} : vector<2x128xf32> to vector<2x32xf32>
    %630 = arith.negf %629 : vector<2x32xf32>
    %631 = math.exp %630 : vector<2x32xf32>
    %cst_208 = arith.constant 1.000000e+00 : f32
    %632 = vector.broadcast %cst_208 : f32 to vector<2x32xf32>
    %633 = arith.addf %632, %631 : vector<2x32xf32>
    %634 = arith.divf %632, %633 : vector<2x32xf32>
    %635 = arith.mulf %626, %579 : vector<2x32xf32>
    %636 = arith.mulf %620, %628 : vector<2x32xf32>
    %637 = arith.addf %635, %636 : vector<2x32xf32>
    %638 = math.tanh %637 : vector<2x32xf32>
    %639 = arith.mulf %634, %638 : vector<2x32xf32>
    %c2_209 = arith.constant 2 : index
    %c0_210 = arith.constant 0 : index
    %640 = vector.load %arg15[%c2_209, %c0_210] : memref<16x64xf32, #tpu.memory_space<vmem>>, vector<2x32xf32>
    tpu.vector_store %arg15[%c2_209, %c0_210], %614 {strides = array<i32>} : memref<16x64xf32, #tpu.memory_space<vmem>>, vector<2x32xf32>,
    %c12_211 = arith.constant 12 : index
    %c32_212 = arith.constant 32 : index
    %641 = vector.load %arg15[%c12_211, %c32_212] : memref<16x64xf32, #tpu.memory_space<vmem>>, vector<2x32xf32>
    tpu.vector_store %arg15[%c12_211, %c32_212], %639 {strides = array<i32>} : memref<16x64xf32, #tpu.memory_space<vmem>>, vector<2x32xf32>,
    %c4_213 = arith.constant 4 : index
    %c0_214 = arith.constant 0 : index
    %642 = vector.load %arg13[%c4_213, %c0_214] : memref<16x256xf32, #tpu.memory_space<vmem>>, vector<2x128xf32>
    %cst_215 = arith.constant dense<0.000000e+00> : vector<2x128xf32>
    %643 = tpu.matmul %614, %520, %cst_215 {dimension_numbers = #tpu.dot_dimension_numbers<[1], [0], [0], [1], [0, 0, 1, 1], [], []>} : vector<2x32xf32>, vector<32x128xf32>, vector<2x128xf32> -> vector<2x128xf32>
    %644 = arith.addf %642, %643 : vector<2x128xf32>
    %c10_216 = arith.constant 10 : index
    %c128_217 = arith.constant 128 : index
    %645 = vector.load %arg13[%c10_216, %c128_217] : memref<16x256xf32, #tpu.memory_space<vmem>>, vector<2x128xf32>
    %cst_218 = arith.constant dense<0.000000e+00> : vector<2x128xf32>
    %646 = tpu.matmul %639, %521, %cst_218 {dimension_numbers = #tpu.dot_dimension_numbers<[1], [0], [0], [1], [0, 0, 1, 1], [], []>} : vector<2x32xf32>, vector<32x128xf32>, vector<2x128xf32> -> vector<2x128xf32>
    %647 = arith.addf %645, %646 : vector<2x128xf32>
    %648 = vector.extract_strided_slice %644 {offsets = [0, 0], sizes = [2, 32], strides = [1, 1]} : vector<2x128xf32> to vector<2x32xf32>
    %649 = arith.negf %648 : vector<2x32xf32>
    %650 = math.exp %649 : vector<2x32xf32>
    %cst_219 = arith.constant 1.000000e+00 : f32
    %651 = vector.broadcast %cst_219 : f32 to vector<2x32xf32>
    %652 = arith.addf %651, %650 : vector<2x32xf32>
    %653 = arith.divf %651, %652 : vector<2x32xf32>
    %654 = vector.extract_strided_slice %644 {offsets = [0, 32], sizes = [2, 32], strides = [1, 1]} : vector<2x128xf32> to vector<2x32xf32>
    %655 = arith.negf %654 : vector<2x32xf32>
    %656 = math.exp %655 : vector<2x32xf32>
    %cst_220 = arith.constant 1.000000e+00 : f32
    %657 = vector.broadcast %cst_220 : f32 to vector<2x32xf32>
    %658 = arith.addf %657, %656 : vector<2x32xf32>
    %659 = arith.divf %657, %658 : vector<2x32xf32>
    %660 = vector.extract_strided_slice %644 {offsets = [0, 64], sizes = [2, 32], strides = [1, 1]} : vector<2x128xf32> to vector<2x32xf32>
    %661 = math.tanh %660 : vector<2x32xf32>
    %662 = vector.extract_strided_slice %644 {offsets = [0, 96], sizes = [2, 32], strides = [1, 1]} : vector<2x128xf32> to vector<2x32xf32>
    %663 = arith.negf %662 : vector<2x32xf32>
    %664 = math.exp %663 : vector<2x32xf32>
    %cst_221 = arith.constant 1.000000e+00 : f32
    %665 = vector.broadcast %cst_221 : f32 to vector<2x32xf32>
    %666 = arith.addf %665, %664 : vector<2x32xf32>
    %667 = arith.divf %665, %666 : vector<2x32xf32>
    %668 = arith.mulf %659, %612 : vector<2x32xf32>
    %669 = arith.mulf %653, %661 : vector<2x32xf32>
    %670 = arith.addf %668, %669 : vector<2x32xf32>
    %671 = math.tanh %670 : vector<2x32xf32>
    %672 = arith.mulf %667, %671 : vector<2x32xf32>
    %673 = vector.extract_strided_slice %647 {offsets = [0, 0], sizes = [2, 32], strides = [1, 1]} : vector<2x128xf32> to vector<2x32xf32>
    %674 = arith.negf %673 : vector<2x32xf32>
    %675 = math.exp %674 : vector<2x32xf32>
    %cst_222 = arith.constant 1.000000e+00 : f32
    %676 = vector.broadcast %cst_222 : f32 to vector<2x32xf32>
    %677 = arith.addf %676, %675 : vector<2x32xf32>
    %678 = arith.divf %676, %677 : vector<2x32xf32>
    %679 = vector.extract_strided_slice %647 {offsets = [0, 32], sizes = [2, 32], strides = [1, 1]} : vector<2x128xf32> to vector<2x32xf32>
    %680 = arith.negf %679 : vector<2x32xf32>
    %681 = math.exp %680 : vector<2x32xf32>
    %cst_223 = arith.constant 1.000000e+00 : f32
    %682 = vector.broadcast %cst_223 : f32 to vector<2x32xf32>
    %683 = arith.addf %682, %681 : vector<2x32xf32>
    %684 = arith.divf %682, %683 : vector<2x32xf32>
    %685 = vector.extract_strided_slice %647 {offsets = [0, 64], sizes = [2, 32], strides = [1, 1]} : vector<2x128xf32> to vector<2x32xf32>
    %686 = math.tanh %685 : vector<2x32xf32>
    %687 = vector.extract_strided_slice %647 {offsets = [0, 96], sizes = [2, 32], strides = [1, 1]} : vector<2x128xf32> to vector<2x32xf32>
    %688 = arith.negf %687 : vector<2x32xf32>
    %689 = math.exp %688 : vector<2x32xf32>
    %cst_224 = arith.constant 1.000000e+00 : f32
    %690 = vector.broadcast %cst_224 : f32 to vector<2x32xf32>
    %691 = arith.addf %690, %689 : vector<2x32xf32>
    %692 = arith.divf %690, %691 : vector<2x32xf32>
    %693 = arith.mulf %684, %637 : vector<2x32xf32>
    %694 = arith.mulf %678, %686 : vector<2x32xf32>
    %695 = arith.addf %693, %694 : vector<2x32xf32>
    %696 = math.tanh %695 : vector<2x32xf32>
    %697 = arith.mulf %692, %696 : vector<2x32xf32>
    %c4_225 = arith.constant 4 : index
    %c0_226 = arith.constant 0 : index
    %698 = vector.load %arg15[%c4_225, %c0_226] : memref<16x64xf32, #tpu.memory_space<vmem>>, vector<2x32xf32>
    tpu.vector_store %arg15[%c4_225, %c0_226], %672 {strides = array<i32>} : memref<16x64xf32, #tpu.memory_space<vmem>>, vector<2x32xf32>,
    %c10_227 = arith.constant 10 : index
    %c32_228 = arith.constant 32 : index
    %699 = vector.load %arg15[%c10_227, %c32_228] : memref<16x64xf32, #tpu.memory_space<vmem>>, vector<2x32xf32>
    tpu.vector_store %arg15[%c10_227, %c32_228], %697 {strides = array<i32>} : memref<16x64xf32, #tpu.memory_space<vmem>>, vector<2x32xf32>,
    %c6_229 = arith.constant 6 : index
    %c0_230 = arith.constant 0 : index
    %700 = vector.load %arg13[%c6_229, %c0_230] : memref<16x256xf32, #tpu.memory_space<vmem>>, vector<2x128xf32>
    %cst_231 = arith.constant dense<0.000000e+00> : vector<2x128xf32>
    %701 = tpu.matmul %672, %520, %cst_231 {dimension_numbers = #tpu.dot_dimension_numbers<[1], [0], [0], [1], [0, 0, 1, 1], [], []>} : vector<2x32xf32>, vector<32x128xf32>, vector<2x128xf32> -> vector<2x128xf32>
    %702 = arith.addf %700, %701 : vector<2x128xf32>
    %c8_232 = arith.constant 8 : index
    %c128_233 = arith.constant 128 : index
    %703 = vector.load %arg13[%c8_232, %c128_233] : memref<16x256xf32, #tpu.memory_space<vmem>>, vector<2x128xf32>
    %cst_234 = arith.constant dense<0.000000e+00> : vector<2x128xf32>
    %704 = tpu.matmul %697, %521, %cst_234 {dimension_numbers = #tpu.dot_dimension_numbers<[1], [0], [0], [1], [0, 0, 1, 1], [], []>} : vector<2x32xf32>, vector<32x128xf32>, vector<2x128xf32> -> vector<2x128xf32>
    %705 = arith.addf %703, %704 : vector<2x128xf32>
    %706 = vector.extract_strided_slice %702 {offsets = [0, 0], sizes = [2, 32], strides = [1, 1]} : vector<2x128xf32> to vector<2x32xf32>
    %707 = arith.negf %706 : vector<2x32xf32>
    %708 = math.exp %707 : vector<2x32xf32>
    %cst_235 = arith.constant 1.000000e+00 : f32
    %709 = vector.broadcast %cst_235 : f32 to vector<2x32xf32>
    %710 = arith.addf %709, %708 : vector<2x32xf32>
    %711 = arith.divf %709, %710 : vector<2x32xf32>
    %712 = vector.extract_strided_slice %702 {offsets = [0, 32], sizes = [2, 32], strides = [1, 1]} : vector<2x128xf32> to vector<2x32xf32>
    %713 = arith.negf %712 : vector<2x32xf32>
    %714 = math.exp %713 : vector<2x32xf32>
    %cst_236 = arith.constant 1.000000e+00 : f32
    %715 = vector.broadcast %cst_236 : f32 to vector<2x32xf32>
    %716 = arith.addf %715, %714 : vector<2x32xf32>
    %717 = arith.divf %715, %716 : vector<2x32xf32>
    %718 = vector.extract_strided_slice %702 {offsets = [0, 64], sizes = [2, 32], strides = [1, 1]} : vector<2x128xf32> to vector<2x32xf32>
    %719 = math.tanh %718 : vector<2x32xf32>
    %720 = vector.extract_strided_slice %702 {offsets = [0, 96], sizes = [2, 32], strides = [1, 1]} : vector<2x128xf32> to vector<2x32xf32>
    %721 = arith.negf %720 : vector<2x32xf32>
    %722 = math.exp %721 : vector<2x32xf32>
    %cst_237 = arith.constant 1.000000e+00 : f32
    %723 = vector.broadcast %cst_237 : f32 to vector<2x32xf32>
    %724 = arith.addf %723, %722 : vector<2x32xf32>
    %725 = arith.divf %723, %724 : vector<2x32xf32>
    %726 = arith.mulf %717, %670 : vector<2x32xf32>
    %727 = arith.mulf %711, %719 : vector<2x32xf32>
    %728 = arith.addf %726, %727 : vector<2x32xf32>
    %729 = math.tanh %728 : vector<2x32xf32>
    %730 = arith.mulf %725, %729 : vector<2x32xf32>
    %731 = vector.extract_strided_slice %705 {offsets = [0, 0], sizes = [2, 32], strides = [1, 1]} : vector<2x128xf32> to vector<2x32xf32>
    %732 = arith.negf %731 : vector<2x32xf32>
    %733 = math.exp %732 : vector<2x32xf32>
    %cst_238 = arith.constant 1.000000e+00 : f32
    %734 = vector.broadcast %cst_238 : f32 to vector<2x32xf32>
    %735 = arith.addf %734, %733 : vector<2x32xf32>
    %736 = arith.divf %734, %735 : vector<2x32xf32>
    %737 = vector.extract_strided_slice %705 {offsets = [0, 32], sizes = [2, 32], strides = [1, 1]} : vector<2x128xf32> to vector<2x32xf32>
    %738 = arith.negf %737 : vector<2x32xf32>
    %739 = math.exp %738 : vector<2x32xf32>
    %cst_239 = arith.constant 1.000000e+00 : f32
    %740 = vector.broadcast %cst_239 : f32 to vector<2x32xf32>
    %741 = arith.addf %740, %739 : vector<2x32xf32>
    %742 = arith.divf %740, %741 : vector<2x32xf32>
    %743 = vector.extract_strided_slice %705 {offsets = [0, 64], sizes = [2, 32], strides = [1, 1]} : vector<2x128xf32> to vector<2x32xf32>
    %744 = math.tanh %743 : vector<2x32xf32>
    %745 = vector.extract_strided_slice %705 {offsets = [0, 96], sizes = [2, 32], strides = [1, 1]} : vector<2x128xf32> to vector<2x32xf32>
    %746 = arith.negf %745 : vector<2x32xf32>
    %747 = math.exp %746 : vector<2x32xf32>
    %cst_240 = arith.constant 1.000000e+00 : f32
    %748 = vector.broadcast %cst_240 : f32 to vector<2x32xf32>
    %749 = arith.addf %748, %747 : vector<2x32xf32>
    %750 = arith.divf %748, %749 : vector<2x32xf32>
    %751 = arith.mulf %742, %695 : vector<2x32xf32>
    %752 = arith.mulf %736, %744 : vector<2x32xf32>
    %753 = arith.addf %751, %752 : vector<2x32xf32>
    %754 = math.tanh %753 : vector<2x32xf32>
    %755 = arith.mulf %750, %754 : vector<2x32xf32>
    %c6_241 = arith.constant 6 : index
    %c0_242 = arith.constant 0 : index
    %756 = vector.load %arg15[%c6_241, %c0_242] : memref<16x64xf32, #tpu.memory_space<vmem>>, vector<2x32xf32>
    tpu.vector_store %arg15[%c6_241, %c0_242], %730 {strides = array<i32>} : memref<16x64xf32, #tpu.memory_space<vmem>>, vector<2x32xf32>,
    %c8_243 = arith.constant 8 : index
    %c32_244 = arith.constant 32 : index
    %757 = vector.load %arg15[%c8_243, %c32_244] : memref<16x64xf32, #tpu.memory_space<vmem>>, vector<2x32xf32>
    tpu.vector_store %arg15[%c8_243, %c32_244], %755 {strides = array<i32>} : memref<16x64xf32, #tpu.memory_space<vmem>>, vector<2x32xf32>,
    %c8_245 = arith.constant 8 : index
    %c0_246 = arith.constant 0 : index
    %758 = vector.load %arg13[%c8_245, %c0_246] : memref<16x256xf32, #tpu.memory_space<vmem>>, vector<2x128xf32>
    %cst_247 = arith.constant dense<0.000000e+00> : vector<2x128xf32>
    %759 = tpu.matmul %730, %520, %cst_247 {dimension_numbers = #tpu.dot_dimension_numbers<[1], [0], [0], [1], [0, 0, 1, 1], [], []>} : vector<2x32xf32>, vector<32x128xf32>, vector<2x128xf32> -> vector<2x128xf32>
    %760 = arith.addf %758, %759 : vector<2x128xf32>
    %c6_248 = arith.constant 6 : index
    %c128_249 = arith.constant 128 : index
    %761 = vector.load %arg13[%c6_248, %c128_249] : memref<16x256xf32, #tpu.memory_space<vmem>>, vector<2x128xf32>
    %cst_250 = arith.constant dense<0.000000e+00> : vector<2x128xf32>
    %762 = tpu.matmul %755, %521, %cst_250 {dimension_numbers = #tpu.dot_dimension_numbers<[1], [0], [0], [1], [0, 0, 1, 1], [], []>} : vector<2x32xf32>, vector<32x128xf32>, vector<2x128xf32> -> vector<2x128xf32>
    %763 = arith.addf %761, %762 : vector<2x128xf32>
    %764 = vector.extract_strided_slice %760 {offsets = [0, 0], sizes = [2, 32], strides = [1, 1]} : vector<2x128xf32> to vector<2x32xf32>
    %765 = arith.negf %764 : vector<2x32xf32>
    %766 = math.exp %765 : vector<2x32xf32>
    %cst_251 = arith.constant 1.000000e+00 : f32
    %767 = vector.broadcast %cst_251 : f32 to vector<2x32xf32>
    %768 = arith.addf %767, %766 : vector<2x32xf32>
    %769 = arith.divf %767, %768 : vector<2x32xf32>
    %770 = vector.extract_strided_slice %760 {offsets = [0, 32], sizes = [2, 32], strides = [1, 1]} : vector<2x128xf32> to vector<2x32xf32>
    %771 = arith.negf %770 : vector<2x32xf32>
    %772 = math.exp %771 : vector<2x32xf32>
    %cst_252 = arith.constant 1.000000e+00 : f32
    %773 = vector.broadcast %cst_252 : f32 to vector<2x32xf32>
    %774 = arith.addf %773, %772 : vector<2x32xf32>
    %775 = arith.divf %773, %774 : vector<2x32xf32>
    %776 = vector.extract_strided_slice %760 {offsets = [0, 64], sizes = [2, 32], strides = [1, 1]} : vector<2x128xf32> to vector<2x32xf32>
    %777 = math.tanh %776 : vector<2x32xf32>
    %778 = vector.extract_strided_slice %760 {offsets = [0, 96], sizes = [2, 32], strides = [1, 1]} : vector<2x128xf32> to vector<2x32xf32>
    %779 = arith.negf %778 : vector<2x32xf32>
    %780 = math.exp %779 : vector<2x32xf32>
    %cst_253 = arith.constant 1.000000e+00 : f32
    %781 = vector.broadcast %cst_253 : f32 to vector<2x32xf32>
    %782 = arith.addf %781, %780 : vector<2x32xf32>
    %783 = arith.divf %781, %782 : vector<2x32xf32>
    %784 = arith.mulf %775, %728 : vector<2x32xf32>
    %785 = arith.mulf %769, %777 : vector<2x32xf32>
    %786 = arith.addf %784, %785 : vector<2x32xf32>
    %787 = math.tanh %786 : vector<2x32xf32>
    %788 = arith.mulf %783, %787 : vector<2x32xf32>
    %789 = vector.extract_strided_slice %763 {offsets = [0, 0], sizes = [2, 32], strides = [1, 1]} : vector<2x128xf32> to vector<2x32xf32>
    %790 = arith.negf %789 : vector<2x32xf32>
    %791 = math.exp %790 : vector<2x32xf32>
    %cst_254 = arith.constant 1.000000e+00 : f32
    %792 = vector.broadcast %cst_254 : f32 to vector<2x32xf32>
    %793 = arith.addf %792, %791 : vector<2x32xf32>
    %794 = arith.divf %792, %793 : vector<2x32xf32>
    %795 = vector.extract_strided_slice %763 {offsets = [0, 32], sizes = [2, 32], strides = [1, 1]} : vector<2x128xf32> to vector<2x32xf32>
    %796 = arith.negf %795 : vector<2x32xf32>
    %797 = math.exp %796 : vector<2x32xf32>
    %cst_255 = arith.constant 1.000000e+00 : f32
    %798 = vector.broadcast %cst_255 : f32 to vector<2x32xf32>
    %799 = arith.addf %798, %797 : vector<2x32xf32>
    %800 = arith.divf %798, %799 : vector<2x32xf32>
    %801 = vector.extract_strided_slice %763 {offsets = [0, 64], sizes = [2, 32], strides = [1, 1]} : vector<2x128xf32> to vector<2x32xf32>
    %802 = math.tanh %801 : vector<2x32xf32>
    %803 = vector.extract_strided_slice %763 {offsets = [0, 96], sizes = [2, 32], strides = [1, 1]} : vector<2x128xf32> to vector<2x32xf32>
    %804 = arith.negf %803 : vector<2x32xf32>
    %805 = math.exp %804 : vector<2x32xf32>
    %cst_256 = arith.constant 1.000000e+00 : f32
    %806 = vector.broadcast %cst_256 : f32 to vector<2x32xf32>
    %807 = arith.addf %806, %805 : vector<2x32xf32>
    %808 = arith.divf %806, %807 : vector<2x32xf32>
    %809 = arith.mulf %800, %753 : vector<2x32xf32>
    %810 = arith.mulf %794, %802 : vector<2x32xf32>
    %811 = arith.addf %809, %810 : vector<2x32xf32>
    %812 = math.tanh %811 : vector<2x32xf32>
    %813 = arith.mulf %808, %812 : vector<2x32xf32>
    %c8_257 = arith.constant 8 : index
    %c0_258 = arith.constant 0 : index
    %814 = vector.load %arg15[%c8_257, %c0_258] : memref<16x64xf32, #tpu.memory_space<vmem>>, vector<2x32xf32>
    tpu.vector_store %arg15[%c8_257, %c0_258], %788 {strides = array<i32>} : memref<16x64xf32, #tpu.memory_space<vmem>>, vector<2x32xf32>,
    %c6_259 = arith.constant 6 : index
    %c32_260 = arith.constant 32 : index
    %815 = vector.load %arg15[%c6_259, %c32_260] : memref<16x64xf32, #tpu.memory_space<vmem>>, vector<2x32xf32>
    tpu.vector_store %arg15[%c6_259, %c32_260], %813 {strides = array<i32>} : memref<16x64xf32, #tpu.memory_space<vmem>>, vector<2x32xf32>,
    %c10_261 = arith.constant 10 : index
    %c0_262 = arith.constant 0 : index
    %816 = vector.load %arg13[%c10_261, %c0_262] : memref<16x256xf32, #tpu.memory_space<vmem>>, vector<2x128xf32>
    %cst_263 = arith.constant dense<0.000000e+00> : vector<2x128xf32>
    %817 = tpu.matmul %788, %520, %cst_263 {dimension_numbers = #tpu.dot_dimension_numbers<[1], [0], [0], [1], [0, 0, 1, 1], [], []>} : vector<2x32xf32>, vector<32x128xf32>, vector<2x128xf32> -> vector<2x128xf32>
    %818 = arith.addf %816, %817 : vector<2x128xf32>
    %c4_264 = arith.constant 4 : index
    %c128_265 = arith.constant 128 : index
    %819 = vector.load %arg13[%c4_264, %c128_265] : memref<16x256xf32, #tpu.memory_space<vmem>>, vector<2x128xf32>
    %cst_266 = arith.constant dense<0.000000e+00> : vector<2x128xf32>
    %820 = tpu.matmul %813, %521, %cst_266 {dimension_numbers = #tpu.dot_dimension_numbers<[1], [0], [0], [1], [0, 0, 1, 1], [], []>} : vector<2x32xf32>, vector<32x128xf32>, vector<2x128xf32> -> vector<2x128xf32>
    %821 = arith.addf %819, %820 : vector<2x128xf32>
    %822 = vector.extract_strided_slice %818 {offsets = [0, 0], sizes = [2, 32], strides = [1, 1]} : vector<2x128xf32> to vector<2x32xf32>
    %823 = arith.negf %822 : vector<2x32xf32>
    %824 = math.exp %823 : vector<2x32xf32>
    %cst_267 = arith.constant 1.000000e+00 : f32
    %825 = vector.broadcast %cst_267 : f32 to vector<2x32xf32>
    %826 = arith.addf %825, %824 : vector<2x32xf32>
    %827 = arith.divf %825, %826 : vector<2x32xf32>
    %828 = vector.extract_strided_slice %818 {offsets = [0, 32], sizes = [2, 32], strides = [1, 1]} : vector<2x128xf32> to vector<2x32xf32>
    %829 = arith.negf %828 : vector<2x32xf32>
    %830 = math.exp %829 : vector<2x32xf32>
    %cst_268 = arith.constant 1.000000e+00 : f32
    %831 = vector.broadcast %cst_268 : f32 to vector<2x32xf32>
    %832 = arith.addf %831, %830 : vector<2x32xf32>
    %833 = arith.divf %831, %832 : vector<2x32xf32>
    %834 = vector.extract_strided_slice %818 {offsets = [0, 64], sizes = [2, 32], strides = [1, 1]} : vector<2x128xf32> to vector<2x32xf32>
    %835 = math.tanh %834 : vector<2x32xf32>
    %836 = vector.extract_strided_slice %818 {offsets = [0, 96], sizes = [2, 32], strides = [1, 1]} : vector<2x128xf32> to vector<2x32xf32>
    %837 = arith.negf %836 : vector<2x32xf32>
    %838 = math.exp %837 : vector<2x32xf32>
    %cst_269 = arith.constant 1.000000e+00 : f32
    %839 = vector.broadcast %cst_269 : f32 to vector<2x32xf32>
    %840 = arith.addf %839, %838 : vector<2x32xf32>
    %841 = arith.divf %839, %840 : vector<2x32xf32>
    %842 = arith.mulf %833, %786 : vector<2x32xf32>
    %843 = arith.mulf %827, %835 : vector<2x32xf32>
    %844 = arith.addf %842, %843 : vector<2x32xf32>
    %845 = math.tanh %844 : vector<2x32xf32>
    %846 = arith.mulf %841, %845 : vector<2x32xf32>
    %847 = vector.extract_strided_slice %821 {offsets = [0, 0], sizes = [2, 32], strides = [1, 1]} : vector<2x128xf32> to vector<2x32xf32>
    %848 = arith.negf %847 : vector<2x32xf32>
    %849 = math.exp %848 : vector<2x32xf32>
    %cst_270 = arith.constant 1.000000e+00 : f32
    %850 = vector.broadcast %cst_270 : f32 to vector<2x32xf32>
    %851 = arith.addf %850, %849 : vector<2x32xf32>
    %852 = arith.divf %850, %851 : vector<2x32xf32>
    %853 = vector.extract_strided_slice %821 {offsets = [0, 32], sizes = [2, 32], strides = [1, 1]} : vector<2x128xf32> to vector<2x32xf32>
    %854 = arith.negf %853 : vector<2x32xf32>
    %855 = math.exp %854 : vector<2x32xf32>
    %cst_271 = arith.constant 1.000000e+00 : f32
    %856 = vector.broadcast %cst_271 : f32 to vector<2x32xf32>
    %857 = arith.addf %856, %855 : vector<2x32xf32>
    %858 = arith.divf %856, %857 : vector<2x32xf32>
    %859 = vector.extract_strided_slice %821 {offsets = [0, 64], sizes = [2, 32], strides = [1, 1]} : vector<2x128xf32> to vector<2x32xf32>
    %860 = math.tanh %859 : vector<2x32xf32>
    %861 = vector.extract_strided_slice %821 {offsets = [0, 96], sizes = [2, 32], strides = [1, 1]} : vector<2x128xf32> to vector<2x32xf32>
    %862 = arith.negf %861 : vector<2x32xf32>
    %863 = math.exp %862 : vector<2x32xf32>
    %cst_272 = arith.constant 1.000000e+00 : f32
    %864 = vector.broadcast %cst_272 : f32 to vector<2x32xf32>
    %865 = arith.addf %864, %863 : vector<2x32xf32>
    %866 = arith.divf %864, %865 : vector<2x32xf32>
    %867 = arith.mulf %858, %811 : vector<2x32xf32>
    %868 = arith.mulf %852, %860 : vector<2x32xf32>
    %869 = arith.addf %867, %868 : vector<2x32xf32>
    %870 = math.tanh %869 : vector<2x32xf32>
    %871 = arith.mulf %866, %870 : vector<2x32xf32>
    %c10_273 = arith.constant 10 : index
    %c0_274 = arith.constant 0 : index
    %872 = vector.load %arg15[%c10_273, %c0_274] : memref<16x64xf32, #tpu.memory_space<vmem>>, vector<2x32xf32>
    tpu.vector_store %arg15[%c10_273, %c0_274], %846 {strides = array<i32>} : memref<16x64xf32, #tpu.memory_space<vmem>>, vector<2x32xf32>,
    %c4_275 = arith.constant 4 : index
    %c32_276 = arith.constant 32 : index
    %873 = vector.load %arg15[%c4_275, %c32_276] : memref<16x64xf32, #tpu.memory_space<vmem>>, vector<2x32xf32>
    tpu.vector_store %arg15[%c4_275, %c32_276], %871 {strides = array<i32>} : memref<16x64xf32, #tpu.memory_space<vmem>>, vector<2x32xf32>,
    %c12_277 = arith.constant 12 : index
    %c0_278 = arith.constant 0 : index
    %874 = vector.load %arg13[%c12_277, %c0_278] : memref<16x256xf32, #tpu.memory_space<vmem>>, vector<2x128xf32>
    %cst_279 = arith.constant dense<0.000000e+00> : vector<2x128xf32>
    %875 = tpu.matmul %846, %520, %cst_279 {dimension_numbers = #tpu.dot_dimension_numbers<[1], [0], [0], [1], [0, 0, 1, 1], [], []>} : vector<2x32xf32>, vector<32x128xf32>, vector<2x128xf32> -> vector<2x128xf32>
    %876 = arith.addf %874, %875 : vector<2x128xf32>
    %c2_280 = arith.constant 2 : index
    %c128_281 = arith.constant 128 : index
    %877 = vector.load %arg13[%c2_280, %c128_281] : memref<16x256xf32, #tpu.memory_space<vmem>>, vector<2x128xf32>
    %cst_282 = arith.constant dense<0.000000e+00> : vector<2x128xf32>
    %878 = tpu.matmul %871, %521, %cst_282 {dimension_numbers = #tpu.dot_dimension_numbers<[1], [0], [0], [1], [0, 0, 1, 1], [], []>} : vector<2x32xf32>, vector<32x128xf32>, vector<2x128xf32> -> vector<2x128xf32>
    %879 = arith.addf %877, %878 : vector<2x128xf32>
    %880 = vector.extract_strided_slice %876 {offsets = [0, 0], sizes = [2, 32], strides = [1, 1]} : vector<2x128xf32> to vector<2x32xf32>
    %881 = arith.negf %880 : vector<2x32xf32>
    %882 = math.exp %881 : vector<2x32xf32>
    %cst_283 = arith.constant 1.000000e+00 : f32
    %883 = vector.broadcast %cst_283 : f32 to vector<2x32xf32>
    %884 = arith.addf %883, %882 : vector<2x32xf32>
    %885 = arith.divf %883, %884 : vector<2x32xf32>
    %886 = vector.extract_strided_slice %876 {offsets = [0, 32], sizes = [2, 32], strides = [1, 1]} : vector<2x128xf32> to vector<2x32xf32>
    %887 = arith.negf %886 : vector<2x32xf32>
    %888 = math.exp %887 : vector<2x32xf32>
    %cst_284 = arith.constant 1.000000e+00 : f32
    %889 = vector.broadcast %cst_284 : f32 to vector<2x32xf32>
    %890 = arith.addf %889, %888 : vector<2x32xf32>
    %891 = arith.divf %889, %890 : vector<2x32xf32>
    %892 = vector.extract_strided_slice %876 {offsets = [0, 64], sizes = [2, 32], strides = [1, 1]} : vector<2x128xf32> to vector<2x32xf32>
    %893 = math.tanh %892 : vector<2x32xf32>
    %894 = vector.extract_strided_slice %876 {offsets = [0, 96], sizes = [2, 32], strides = [1, 1]} : vector<2x128xf32> to vector<2x32xf32>
    %895 = arith.negf %894 : vector<2x32xf32>
    %896 = math.exp %895 : vector<2x32xf32>
    %cst_285 = arith.constant 1.000000e+00 : f32
    %897 = vector.broadcast %cst_285 : f32 to vector<2x32xf32>
    %898 = arith.addf %897, %896 : vector<2x32xf32>
    %899 = arith.divf %897, %898 : vector<2x32xf32>
    %900 = arith.mulf %891, %844 : vector<2x32xf32>
    %901 = arith.mulf %885, %893 : vector<2x32xf32>
    %902 = arith.addf %900, %901 : vector<2x32xf32>
    %903 = math.tanh %902 : vector<2x32xf32>
    %904 = arith.mulf %899, %903 : vector<2x32xf32>
    %905 = vector.extract_strided_slice %879 {offsets = [0, 0], sizes = [2, 32], strides = [1, 1]} : vector<2x128xf32> to vector<2x32xf32>
    %906 = arith.negf %905 : vector<2x32xf32>
    %907 = math.exp %906 : vector<2x32xf32>
    %cst_286 = arith.constant 1.000000e+00 : f32
    %908 = vector.broadcast %cst_286 : f32 to vector<2x32xf32>
    %909 = arith.addf %908, %907 : vector<2x32xf32>
    %910 = arith.divf %908, %909 : vector<2x32xf32>
    %911 = vector.extract_strided_slice %879 {offsets = [0, 32], sizes = [2, 32], strides = [1, 1]} : vector<2x128xf32> to vector<2x32xf32>
    %912 = arith.negf %911 : vector<2x32xf32>
    %913 = math.exp %912 : vector<2x32xf32>
    %cst_287 = arith.constant 1.000000e+00 : f32
    %914 = vector.broadcast %cst_287 : f32 to vector<2x32xf32>
    %915 = arith.addf %914, %913 : vector<2x32xf32>
    %916 = arith.divf %914, %915 : vector<2x32xf32>
    %917 = vector.extract_strided_slice %879 {offsets = [0, 64], sizes = [2, 32], strides = [1, 1]} : vector<2x128xf32> to vector<2x32xf32>
    %918 = math.tanh %917 : vector<2x32xf32>
    %919 = vector.extract_strided_slice %879 {offsets = [0, 96], sizes = [2, 32], strides = [1, 1]} : vector<2x128xf32> to vector<2x32xf32>
    %920 = arith.negf %919 : vector<2x32xf32>
    %921 = math.exp %920 : vector<2x32xf32>
    %cst_288 = arith.constant 1.000000e+00 : f32
    %922 = vector.broadcast %cst_288 : f32 to vector<2x32xf32>
    %923 = arith.addf %922, %921 : vector<2x32xf32>
    %924 = arith.divf %922, %923 : vector<2x32xf32>
    %925 = arith.mulf %916, %869 : vector<2x32xf32>
    %926 = arith.mulf %910, %918 : vector<2x32xf32>
    %927 = arith.addf %925, %926 : vector<2x32xf32>
    %928 = math.tanh %927 : vector<2x32xf32>
    %929 = arith.mulf %924, %928 : vector<2x32xf32>
    %c12_289 = arith.constant 12 : index
    %c0_290 = arith.constant 0 : index
    %930 = vector.load %arg15[%c12_289, %c0_290] : memref<16x64xf32, #tpu.memory_space<vmem>>, vector<2x32xf32>
    tpu.vector_store %arg15[%c12_289, %c0_290], %904 {strides = array<i32>} : memref<16x64xf32, #tpu.memory_space<vmem>>, vector<2x32xf32>,
    %c2_291 = arith.constant 2 : index
    %c32_292 = arith.constant 32 : index
    %931 = vector.load %arg15[%c2_291, %c32_292] : memref<16x64xf32, #tpu.memory_space<vmem>>, vector<2x32xf32>
    tpu.vector_store %arg15[%c2_291, %c32_292], %929 {strides = array<i32>} : memref<16x64xf32, #tpu.memory_space<vmem>>, vector<2x32xf32>,
    %c14_293 = arith.constant 14 : index
    %c0_294 = arith.constant 0 : index
    %932 = vector.load %arg13[%c14_293, %c0_294] : memref<16x256xf32, #tpu.memory_space<vmem>>, vector<2x128xf32>
    %cst_295 = arith.constant dense<0.000000e+00> : vector<2x128xf32>
    %933 = tpu.matmul %904, %520, %cst_295 {dimension_numbers = #tpu.dot_dimension_numbers<[1], [0], [0], [1], [0, 0, 1, 1], [], []>} : vector<2x32xf32>, vector<32x128xf32>, vector<2x128xf32> -> vector<2x128xf32>
    %934 = arith.addf %932, %933 : vector<2x128xf32>
    %c0_296 = arith.constant 0 : index
    %c128_297 = arith.constant 128 : index
    %935 = vector.load %arg13[%c0_296, %c128_297] : memref<16x256xf32, #tpu.memory_space<vmem>>, vector<2x128xf32>
    %cst_298 = arith.constant dense<0.000000e+00> : vector<2x128xf32>
    %936 = tpu.matmul %929, %521, %cst_298 {dimension_numbers = #tpu.dot_dimension_numbers<[1], [0], [0], [1], [0, 0, 1, 1], [], []>} : vector<2x32xf32>, vector<32x128xf32>, vector<2x128xf32> -> vector<2x128xf32>
    %937 = arith.addf %935, %936 : vector<2x128xf32>
    %938 = vector.extract_strided_slice %934 {offsets = [0, 0], sizes = [2, 32], strides = [1, 1]} : vector<2x128xf32> to vector<2x32xf32>
    %939 = arith.negf %938 : vector<2x32xf32>
    %940 = math.exp %939 : vector<2x32xf32>
    %cst_299 = arith.constant 1.000000e+00 : f32
    %941 = vector.broadcast %cst_299 : f32 to vector<2x32xf32>
    %942 = arith.addf %941, %940 : vector<2x32xf32>
    %943 = arith.divf %941, %942 : vector<2x32xf32>
    %944 = vector.extract_strided_slice %934 {offsets = [0, 32], sizes = [2, 32], strides = [1, 1]} : vector<2x128xf32> to vector<2x32xf32>
    %945 = arith.negf %944 : vector<2x32xf32>
    %946 = math.exp %945 : vector<2x32xf32>
    %cst_300 = arith.constant 1.000000e+00 : f32
    %947 = vector.broadcast %cst_300 : f32 to vector<2x32xf32>
    %948 = arith.addf %947, %946 : vector<2x32xf32>
    %949 = arith.divf %947, %948 : vector<2x32xf32>
    %950 = vector.extract_strided_slice %934 {offsets = [0, 64], sizes = [2, 32], strides = [1, 1]} : vector<2x128xf32> to vector<2x32xf32>
    %951 = math.tanh %950 : vector<2x32xf32>
    %952 = vector.extract_strided_slice %934 {offsets = [0, 96], sizes = [2, 32], strides = [1, 1]} : vector<2x128xf32> to vector<2x32xf32>
    %953 = arith.negf %952 : vector<2x32xf32>
    %954 = math.exp %953 : vector<2x32xf32>
    %cst_301 = arith.constant 1.000000e+00 : f32
    %955 = vector.broadcast %cst_301 : f32 to vector<2x32xf32>
    %956 = arith.addf %955, %954 : vector<2x32xf32>
    %957 = arith.divf %955, %956 : vector<2x32xf32>
    %958 = arith.mulf %949, %902 : vector<2x32xf32>
    %959 = arith.mulf %943, %951 : vector<2x32xf32>
    %960 = arith.addf %958, %959 : vector<2x32xf32>
    %961 = math.tanh %960 : vector<2x32xf32>
    %962 = arith.mulf %957, %961 : vector<2x32xf32>
    %963 = vector.extract_strided_slice %937 {offsets = [0, 0], sizes = [2, 32], strides = [1, 1]} : vector<2x128xf32> to vector<2x32xf32>
    %964 = arith.negf %963 : vector<2x32xf32>
    %965 = math.exp %964 : vector<2x32xf32>
    %cst_302 = arith.constant 1.000000e+00 : f32
    %966 = vector.broadcast %cst_302 : f32 to vector<2x32xf32>
    %967 = arith.addf %966, %965 : vector<2x32xf32>
    %968 = arith.divf %966, %967 : vector<2x32xf32>
    %969 = vector.extract_strided_slice %937 {offsets = [0, 32], sizes = [2, 32], strides = [1, 1]} : vector<2x128xf32> to vector<2x32xf32>
    %970 = arith.negf %969 : vector<2x32xf32>
    %971 = math.exp %970 : vector<2x32xf32>
    %cst_303 = arith.constant 1.000000e+00 : f32
    %972 = vector.broadcast %cst_303 : f32 to vector<2x32xf32>
    %973 = arith.addf %972, %971 : vector<2x32xf32>
    %974 = arith.divf %972, %973 : vector<2x32xf32>
    %975 = vector.extract_strided_slice %937 {offsets = [0, 64], sizes = [2, 32], strides = [1, 1]} : vector<2x128xf32> to vector<2x32xf32>
    %976 = math.tanh %975 : vector<2x32xf32>
    %977 = vector.extract_strided_slice %937 {offsets = [0, 96], sizes = [2, 32], strides = [1, 1]} : vector<2x128xf32> to vector<2x32xf32>
    %978 = arith.negf %977 : vector<2x32xf32>
    %979 = math.exp %978 : vector<2x32xf32>
    %cst_304 = arith.constant 1.000000e+00 : f32
    %980 = vector.broadcast %cst_304 : f32 to vector<2x32xf32>
    %981 = arith.addf %980, %979 : vector<2x32xf32>
    %982 = arith.divf %980, %981 : vector<2x32xf32>
    %983 = arith.mulf %974, %927 : vector<2x32xf32>
    %984 = arith.mulf %968, %976 : vector<2x32xf32>
    %985 = arith.addf %983, %984 : vector<2x32xf32>
    %986 = math.tanh %985 : vector<2x32xf32>
    %987 = arith.mulf %982, %986 : vector<2x32xf32>
    %c14_305 = arith.constant 14 : index
    %c0_306 = arith.constant 0 : index
    %988 = vector.load %arg15[%c14_305, %c0_306] : memref<16x64xf32, #tpu.memory_space<vmem>>, vector<2x32xf32>
    tpu.vector_store %arg15[%c14_305, %c0_306], %962 {strides = array<i32>} : memref<16x64xf32, #tpu.memory_space<vmem>>, vector<2x32xf32>,
    %c0_307 = arith.constant 0 : index
    %c32_308 = arith.constant 32 : index
    %989 = vector.load %arg15[%c0_307, %c32_308] : memref<16x64xf32, #tpu.memory_space<vmem>>, vector<2x32xf32>
    tpu.vector_store %arg15[%c0_307, %c32_308], %987 {strides = array<i32>} : memref<16x64xf32, #tpu.memory_space<vmem>>, vector<2x32xf32>,
    %c14_309 = arith.constant 14 : index
    %c0_310 = arith.constant 0 : index
    %990 = vector.load %arg15[%c14_309, %c0_310] : memref<16x64xf32, #tpu.memory_space<vmem>>, vector<2x64xf32>
    %c0_311 = arith.constant 0 : index
    %c0_312 = arith.constant 0 : index
    %991 = vector.load %arg9[%c0_311, %c0_312] : memref<64x2xf32, #tpu.memory_space<vmem>>, vector<64x2xf32>
    %cst_313 = arith.constant dense<0.000000e+00> : vector<2x2xf32>
    %992 = tpu.matmul %990, %991, %cst_313 {dimension_numbers = #tpu.dot_dimension_numbers<[1], [0], [0], [1], [0, 0, 1, 1], [], []>} : vector<2x64xf32>, vector<64x2xf32>, vector<2x2xf32> -> vector<2x2xf32>
    %c0_314 = arith.constant 0 : index
    %c0_315 = arith.constant 0 : index
    %993 = vector.load %arg10[%c0_314, %c0_315] : memref<1x2xf32, #tpu.memory_space<vmem>>, vector<1x2xf32>
    %994 = vector.broadcast %993 : vector<1x2xf32> to vector<2x2xf32>
    %995 = arith.addf %992, %994 : vector<2x2xf32>
    %cst_316 = arith.constant dense<0xFF800000> : vector<2xf32>
    %996 = vector.multi_reduction <maximumf>, %995, %cst_316 [1] : vector<2x2xf32> to vector<2xf32>
    %997 = vector.shape_cast %996 : vector<2xf32> to vector<2x1xf32>
    %998 = vector.broadcast %997 : vector<2x1xf32> to vector<2x2xf32>
    %999 = arith.subf %995, %998 : vector<2x2xf32>
    %1000 = math.exp %999 : vector<2x2xf32>
    %cst_317 = arith.constant dense<0.000000e+00> : vector<2xf32>
    %1001 = vector.multi_reduction <add>, %1000, %cst_317 [1] : vector<2x2xf32> to vector<2xf32>
    %1002 = vector.shape_cast %1001 : vector<2xf32> to vector<2x1xf32>
    %1003 = tpu.reciprocal %1002 {approx = true} : vector<2x1xf32> -> vector<2x1xf32>
    %1004 = vector.broadcast %1003 : vector<2x1xf32> to vector<2x2xf32>
    %1005 = arith.mulf %1000, %1004 : vector<2x2xf32>
    %c0_318 = arith.constant 0 : index
    %c0_319 = arith.constant 0 : index
    %1006 = vector.load %arg11[%c0_318, %c0_319] : memref<2x2xf32, #tpu.memory_space<vmem>>, vector<2x2xf32>
    tpu.vector_store %arg11[%c0_318, %c0_319], %1005 {strides = array<i32>} : memref<2x2xf32, #tpu.memory_space<vmem>>, vector<2x2xf32>,
    return
  }
}

</mosaic_0001>

<bundles_post_ra>
// kernel: protein_lstm_forward.1
= control target key start
LH: loop header
LB: loop body
LE: loop exit
PB: predicated region body
PF: predicated region fallthrough
CT: control target
= control target key end

     0   :  { %16 = vsyncpa [#allocation7], 0  ;;  %s6065_s0 = inlined_call_operand.hbm [shape: f32[2,8,32], index: 0, kind: input, shape index: {}]   ;;  %s6066_s1 = inlined_call_operand.vmem [shape: f32[32,256], index: 1, kind: input, shape index: {}]   ;;  %s6067_s2 = inlined_call_operand.hbm [shape: f32[32,128], index: 2, kind: input, shape index: {}]   ;;  %s6068_s3 = inlined_call_operand.hbm [shape: f32[32,128], index: 3, kind: input, shape index: {}]   ;;  %s6069_s4 = inlined_call_operand.vmem [shape: f32[1,256], index: 4, kind: input, shape index: {}]   ;;  %s6070_s5 = inlined_call_operand.hbm [shape: f32[64,256], index: 5, kind: input, shape index: {}]   ;;  %s6071_s6 = inlined_call_operand.hbm [shape: f32[32,128], index: 6, kind: input, shape index: {}]   ;;  %s6072_s7 = inlined_call_operand.hbm [shape: f32[32,128], index: 7, kind: input, shape index: {}]   ;;  %s6073_s8 = inlined_call_operand.vmem [shape: f32[1,256], index: 8, kind: input, shape index: {}]   ;;  %s6074_s9 = inlined_call_operand.vmem [shape: f32[64,2], index: 9, kind: input, shape index: {}]   ;;  %s6075_s10 = inlined_call_operand.vmem [shape: f32[1,2], index: 10, kind: input, shape index: {}]   ;;  %s6076_s11 = inlined_call_operand.hbm [shape: f32[2,2], index: 11, kind: output, shape index: {}]  }
   0x1   :  { %17 = vsyncpa [#allocation10], 0 }
   0x2   :  { %18 = vsyncpa [#allocation13], 0 }
   0x3   :  { %19 = vsyncpa [#allocation16], 0 }
   0x4   :  { %20 = vsyncpa [#allocation8], 0  ;;  %s5076_s17 = smov [#allocation9]   ;;  %s5077_s19 = smov [#allocation12]  }
   0x5   :  { %s40_s18 = sshll.u32 %s5076_s17, 4  ;;  %s66_s20 = sshll.u32 %s5077_s19, 4  ;;  %s41_s18 = int_to_ptr.vmem [resolvable:$true] %s40_s18  ;;  %s67_s20 = int_to_ptr.vmem [resolvable:$true] %s66_s20 }
   0x6   :  { %s4934_s21 = scalar_lea.vmem %s41_s18, 512  ;;  %p4939_p1 = scmp.lt.s32.totalorder %s41_s18, %s41_s18 }
   0x7   :  { %p4935_p0 = scmp.ne.s32.totalorder %s41_s18, %s4934_s21  ;;  %p4940_p2 = scmp.lt.s32.totalorder %s4934_s21, %s4934_s21 }
   0x9   :  { %p4941_p3 = por %p4940_p2, %p4939_p1 }
   0xb   :  { %p4942_p4 = pnand %p4941_p3, %p4935_p0 }
   0xd   :  { %4945 = shalt.err (!%p4942_p4)
}
   0xe   :  { %s5078_s22 = smov 128   ;;  %s5079_s23 = smov 8  }
   0xf   :  { %46 = dma.hbm_to_vmem [thread:$0]  %s6067_s2, 512, %s41_s18, [#allocation10], %s5078_s22, %s5078_s22, %s5079_s23  }
  0x10   :  { %s4954_s26 = scalar_lea.vmem %s67_s20, 2048  ;;  %p4959_p6 = scmp.lt.s32.totalorder %s67_s20, %s67_s20 }
  0x11   :  { %p4955_p5 = scmp.ne.s32.totalorder %s67_s20, %s4954_s26  ;;  %p4960_p7 = scmp.lt.s32.totalorder %s4954_s26, %s4954_s26 }
  0x13   :  { %p4961_p8 = por %p4960_p7, %p4959_p6 }
  0x15   :  { %p4962_p9 = pnand %p4961_p8, %p4955_p5 }
  0x17   :  { %4965 = shalt.err (!%p4962_p9)
}
  0x18   :  { %s5080_s27 = smov 256   ;;  %s5081_s28 = smov 16  }
  0x19   :  { %72 = dma.hbm_to_vmem [thread:$0]  %s6070_s5, 2048, %s67_s20, [#allocation13], %s5080_s27, %s5080_s27, %s5081_s28  }
  0x1a   :  { %s5082_s12 = smov [#allocation6]   ;;  %s5083_s14 = smov [#allocation11]  }
  0x1b   :  { %s26_s13 = sshll.u32 %s5082_s12, 4  ;;  %s52_s15 = sshll.u32 %s5083_s14, 4  ;;  %s27_s13 = int_to_ptr.vmem [resolvable:$true] %s26_s13  ;;  %s53_s15 = int_to_ptr.vmem [resolvable:$true] %s52_s15 }
  0x1c   :  { %s4974_s2 = scalar_lea.vmem %s27_s13, 256  ;;  %p4979_p11 = scmp.lt.s32.totalorder %s27_s13, %s27_s13 }
  0x1d   :  { %p4975_p10 = scmp.ne.s32.totalorder %s27_s13, %s4974_s2  ;;  %p4980_p12 = scmp.lt.s32.totalorder %s4974_s2, %s4974_s2 }
  0x1f   :  { %p4981_p13 = por %p4980_p12, %p4979_p11 }
  0x21   :  { %p4982_p0 = pnand %p4981_p13, %p4975_p10 }
  0x23   :  { %4985 = shalt.err (!%p4982_p0)
}
  0x24   :  { %32 = dma.hbm_to_vmem [thread:$0]  %s6065_s0, 256, %s27_s13, [#allocation7], %s5078_s22, %s5078_s22, %s5079_s23  }
  0x25   :  { %s4994_s5 = scalar_lea.vmem %s53_s15, 512  ;;  %p4999_p2 = scmp.lt.s32.totalorder %s53_s15, %s53_s15 }
  0x26   :  { %p4995_p1 = scmp.ne.s32.totalorder %s53_s15, %s4994_s5  ;;  %p5000_p3 = scmp.lt.s32.totalorder %s4994_s5, %s4994_s5 }
  0x28   :  { %p5001_p4 = por %p5000_p3, %p4999_p2 }
  0x2a   :  { %p5002_p5 = pnand %p5001_p4, %p4995_p1 }
  0x2c   :  { %5005 = shalt.err (!%p5002_p5)
}
  0x2d   :  { %58 = dma.hbm_to_vmem [thread:$0]  %s6068_s3, 512, %s53_s15, [#allocation10], %s5078_s22, %s5078_s22, %s5079_s23  }
  0x2e   :  { %s5084_s20 = smov [#allocation14]   ;;  %s5085_s24 = smov [#allocation15]  }
  0x2f   :  { %s78_s21 = sshll.u32 %s5084_s20, 4  ;;  %s90_s25 = sshll.u32 %s5085_s24, 4  ;;  %s79_s21 = int_to_ptr.vmem [resolvable:$true] %s78_s21  ;;  %s91_s25 = int_to_ptr.vmem [resolvable:$true] %s90_s25 }
  0x30   :  { %s5014_s0 = scalar_lea.vmem %s79_s21, 512  ;;  %p5019_p7 = scmp.lt.s32.totalorder %s79_s21, %s79_s21 }
  0x31   :  { %p5015_p6 = scmp.ne.s32.totalorder %s79_s21, %s5014_s0  ;;  %p5020_p8 = scmp.lt.s32.totalorder %s5014_s0, %s5014_s0 }
  0x33   :  { %p5021_p9 = por %p5020_p8, %p5019_p7 }
  0x35   :  { %p5022_p10 = pnand %p5021_p9, %p5015_p6 }
  0x37   :  { %5025 = shalt.err (!%p5022_p10)
}
  0x38   :  { %84 = dma.hbm_to_vmem [thread:$0]  %s6071_s6, 512, %s79_s21, [#allocation13], %s5078_s22, %s5078_s22, %s5079_s23  }
  0x39   :  { %s5034_s3 = scalar_lea.vmem %s91_s25, 512  ;;  %p5039_p12 = scmp.lt.s32.totalorder %s91_s25, %s91_s25 }
  0x3a   :  { %p5035_p11 = scmp.ne.s32.totalorder %s91_s25, %s5034_s3  ;;  %p5040_p13 = scmp.lt.s32.totalorder %s5034_s3, %s5034_s3 }
  0x3c   :  { %p5041_p0 = por %p5040_p13, %p5039_p12 }
  0x3e   :  { %p5042_p1 = pnand %p5041_p0, %p5035_p11 }
  0x40   :  { %5045 = shalt.err (!%p5042_p1)
}
  0x41   :  { %96 = dma.hbm_to_vmem [thread:$0]  %s6072_s7, 512, %s91_s25, [#allocation16], %s5078_s22, %s5078_s22, %s5079_s23  }
  0x42   :  { %5066 = dma.done.wait [#allocation7], 256  }
  0x43   :  { %5067 = vsyncadd [#allocation7], 4294967040 }
  0x44   :  { %5068 = dma.done.wait [#allocation10], 1024  }
  0x45   :  { %5069 = vsyncadd [#allocation10], 4294966272 }
  0x46   :  { %5070 = dma.done.wait [#allocation13], 2560  }
  0x47   :  { %5071 = vsyncadd [#allocation13], 4294964736 }
  0x48   :  { %5072 = dma.done.wait [#allocation16], 512  }
  0x49   :  { %5073 = vsyncadd [#allocation16], 4294966784  ;;  %v5086_v0 = vmov 0.0   ;;  %vm5087_vm0 = vmmov 0   ;;  %vm122_vm1 = vcmask 253952   ;;  %vm124_vm2 = vcmask 254977  }
  0x4a   :  { %241 = vmatprep.mubr.f32.mxu0 %v5086_v0  ;;  %4272 = vmatprep.subr.mxu1 %v5086_v0  ;;  %vm126_vm3 = vcmask 256002   ;;  %vm128_vm4 = vcmask 257027   ;;  %vm130_vm5 = vcmask 258052   ;;  %v157_v1 = vld [vmem:[%s6066_s1 + $0x38] sm:$0xff]  ;;  %v156_v2 = vld [vmem:[%s6066_s1 + $0x30] sm:$0xff]  ;;  %v155_v3 = vld [vmem:[%s6066_s1 + $0x28] sm:$0xff]  ;;  %v160_v21 = vlaneseq }
  0x4b   :  { %4280 = vmatprep.mubr.msk.f32.mxu1 %vm5087_vm0, %v5086_v0  ;;  %vm132_vm6 = vcmask 259077   ;;  %vm134_vm7 = vcmask 260102   ;;  %vm136_vm8 = vcmask 261127   ;;  %201 = vmatprep.subr.mxu0 %v157_v1  ;;  %v154_v4 = vld [vmem:[%s6066_s1 + $0x20] sm:$0xff]  ;;  %v153_v5 = vld [vmem:[%s6066_s1 + $0x18] sm:$0xff]  ;;  %v152_v6 = vld [vmem:[%s6066_s1 + $0x10] sm:$0xff] }
  0x4c   :  { %202 = vmatpush1.msra.mxu0 %v156_v2  ;;  %v121_v7 = vld [vmem:[#allocation6] sm:$0xff]  ;;  %v139_v8 = vld [vmem:[#allocation6 + $0x8] sm:$0xff]  ;;  %v151_v11 = vld [vmem:[%s6066_s1 + $0x8] sm:$0xff]  ;;  %vm170_vm9 = vcmask 261120   ;;  %v5288_v22 = vshrl.u32 %v160_v21, 7  ;;  %s5089_s24 = smov 32  }
  0x4d   :  { %203 = vmatprep.subr.mxu0 %v155_v3  ;;  %123 = vst.msk [vmem:[#allocation2] sm:$0x1] %vm122_vm1, %v121_v7  ;;  %v5210_v9 = vld [vmem:[#allocation9 + $0x18] sm:$0xff]  ;;  %v5216_v10 = vld [vmem:[#allocation9 + $0x10] sm:$0xff]  ;;  %140 = vst.msk [vmem:[#allocation2 + $0x1] sm:$0x1] %vm122_vm1, %v139_v8 }
  0x4e   :  { %125 = vst.msk [vmem:[#allocation2 + $0x1] sm:$0x2] %vm124_vm2, %v121_v7  ;;  %204 = vmatpush1.msra.mxu0 %v154_v4  ;;  %141 = vst.msk [vmem:[#allocation2 + $0x2] sm:$0x2] %vm124_vm2, %v139_v8  ;;  %4273 = vmatpush3.msra.mxu1 %v5210_v9  ;;  %v150_v12 = vld [vmem:[%s6066_s1] sm:$0xff]  ;;  %v5234_v13 = vld [vmem:[#allocation9 + $0x8] sm:$0xff] }
  0x4f   :  { %127 = vst.msk [vmem:[#allocation2 + $0x2] sm:$0x4] %vm126_vm3, %v121_v7  ;;  %142 = vst.msk [vmem:[#allocation2 + $0x3] sm:$0x4] %vm126_vm3, %v139_v8  ;;  %205 = vmatprep.subr.mxu0 %v153_v5  ;;  %4274 = vmatprep.subr.mxu1 %v5086_v0  ;;  %v5238_v14 = vld [vmem:[#allocation9] sm:$0xff]  ;;  %v5243_v15 = vld [vmem:[#allocation11 + $0x18] sm:$0xff] }
  0x50   :  { %129 = vst.msk [vmem:[#allocation2 + $0x3] sm:$0x8] %vm128_vm4, %v121_v7  ;;  %143 = vst.msk [vmem:[#allocation2 + $0x4] sm:$0x8] %vm128_vm4, %v139_v8  ;;  %206 = vmatpush1.msra.mxu0 %v152_v6  ;;  %4275 = vmatpush3.msra.mxu1 %v5216_v10  ;;  %v5249_v17 = vld [vmem:[#allocation11 + $0x10] sm:$0xff]  ;;  %v5255_v19 = vld [vmem:[#allocation11 + $0x8] sm:$0xff] }
  0x51   :  { %131 = vst.msk [vmem:[#allocation2 + $0x4] sm:$0x10] %vm130_vm5, %v121_v7  ;;  %144 = vst.msk [vmem:[#allocation2 + $0x5] sm:$0x10] %vm130_vm5, %v139_v8  ;;  %207 = vmatprep.subr.mxu0 %v151_v11  ;;  %4276 = vmatprep.subr.mxu1 %v5086_v0  ;;  %v5262_v20 = vld [vmem:[#allocation11] sm:$0xff]  ;;  %v162_v23 = vsub.s32 0, %v5288_v22 }
  0x52   :  { %133 = vst.msk [vmem:[#allocation2 + $0x5] sm:$0x20] %vm132_vm6, %v121_v7  ;;  %145 = vst.msk [vmem:[#allocation2 + $0x6] sm:$0x20] %vm132_vm6, %v139_v8  ;;  %208 = vmatpush1.msra.mxu0 %v150_v12  ;;  %4277 = vmatpush3.msra.mxu1 %v5234_v13  ;;  %v158_v24 = vld [vmem:[%s6069_s4] sm:$0x3] }
  0x53   :  { %135 = vst.msk [vmem:[#allocation2 + $0x6] sm:$0x40] %vm134_vm7, %v121_v7  ;;  %146 = vst.msk [vmem:[#allocation2 + $0x7] sm:$0x40] %vm134_vm7, %v139_v8  ;;  %4283 = vmatprep.subr.mxu0 %v5086_v0  ;;  %4278 = vmatprep.subr.mxu1 %v5086_v0  ;;  %v166_v25 = vsub.s32 1, %v5288_v22  ;;  %v163_v26 = vrot.slane %v158_v24, %v162_v23  ;;  %s5088_s4 = smov 64  }
  0x54   :  { %137 = vst.msk [vmem:[#allocation2 + $0x7] sm:$0x80] %vm136_vm8, %v121_v7  ;;  %147 = vst.msk [vmem:[#allocation2 + $0x8] sm:$0x80] %vm136_vm8, %v139_v8  ;;  %4279 = vmatpush3.msra.mxu1 %v5238_v14  ;;  %vm468_vm10 = vcmask 254976   ;;  %vm691_vm11 = vcmask 257026  }
  0x55   :  { %4281 = vmatmul.mubr.f32.vlgmr.msra.gmra.mxu1 %v5086_v0  ;;  %4294 = vmatprep.subr.mxu1 %v5086_v0  ;;  %v167_v27 = vrot.slane %v158_v24, %v166_v25  ;;  %vm1140_vm12 = vcmask 261126   ;;  %vm917_vm13 = vcmask 259076   ;;  %vm697_vm14 = vcmask 521476  }
  0x56   :  { %4295 = vmatpush3.msra.mxu1 %v5210_v9  ;;  %4302 = vmatprep.mubr.msk.f32.mxu1 %vm5087_vm0, %v5086_v0  ;;  %vm474_vm15 = vcmask 523526   ;;  %vm923_vm1 = vcmask 519426   ;;  %vm1146_vm2 = vcmask 517376   ;;  %vm2064_vm3 = vcmask 523264  }
  0x57   :  { %v148_v16 = vld [vmem:[#allocation2] sm:$0xff]  ;;  %4296 = vmatprep.subr.mxu1 %v5086_v0 }
  0x58   :  { %4037 = vmatmul.mubr.msk.f32.vlgmr.msra.gmra.mxu0 %vm170_vm9, %v148_v16  ;;  %4297 = vmatpush3.msra.mxu1 %v5216_v10 }
  0x59   :  { %247 = vmatprep.mubr.f32.mxu0 %v5086_v0  ;;  %4284 = vmatpush3.msra.mxu0 %v5243_v15 }
  0x5a   :  { %4285 = vmatprep.subr.mxu0 %v5086_v0  ;;  %4298 = vmatprep.subr.mxu1 %v5086_v0 }
  0x5b   :  { %v149_v18 = vld [vmem:[#allocation2 + $0x8] sm:$0xff]  ;;  %4286 = vmatpush3.msra.mxu0 %v5249_v17  ;;  %4299 = vmatpush3.msra.mxu1 %v5234_v13 }
  0x5c   :  { %4038 = vmatmul.mubr.msk.f32.gmra.mxu0 %vm170_vm9, %v149_v18  ;;  %4287 = vmatprep.subr.mxu0 %v5086_v0 }
  0x5d   :  { %4288 = vmatpush3.msra.mxu0 %v5255_v19  ;;  %4291 = vmatprep.mubr.msk.f32.mxu0 %vm5087_vm0, %v5086_v0 }
  0x5e   :  { %4289 = vmatprep.subr.mxu0 %v5086_v0  ;;  %4300 = vmatprep.subr.mxu1 %v5086_v0 }
  0x5f   :  { %4290 = vmatpush3.msra.mxu0 %v5262_v20  ;;  %4301 = vmatpush3.msra.mxu1 %v5238_v14 }
  0x60   :  { %4292 = vmatmul.mubr.f32.vlgmr.msra.gmra.mxu0 %v5086_v0  ;;  %4305 = vmatprep.subr.mxu0 %v5086_v0 }
  0x61   :  { %4306 = vmatpush3.msra.mxu0 %v5243_v15  ;;  %4313 = vmatprep.mubr.msk.f32.mxu0 %vm5087_vm0, %v5086_v0 }
  0x62   :  { %4307 = vmatprep.subr.mxu0 %v5086_v0  ;;  %4316 = vmatprep.subr.mxu1 %v5086_v0 }
  0x63   :  { %4308 = vmatpush3.msra.mxu0 %v5249_v17 }
  0x64   :  { %4309 = vmatprep.subr.mxu0 %v5086_v0 }
  0x65   :  { %4310 = vmatpush3.msra.mxu0 %v5255_v19 }
  0x66   :  { %4311 = vmatprep.subr.mxu0 %v5086_v0 }
  0x67   :  { %4312 = vmatpush3.msra.mxu0 %v5262_v20 }
  0x68   :  { %4327 = vmatprep.subr.mxu0 %v5086_v0 }
 0x115   :  { %v336_v28 = vpop.f32.mrf.mxu1 }
 0x117   :  { %v4282_v31 = vpop.f32.mrf.mxu1 }
 0x118   :  { %v243_v29 = vpop.f32.mrf.mxu0 }
 0x119   :  { %v244_v30 = vadd.f32 %v243_v29, %v163_v26 }
 0x11a   :  { %v245_v32 = vpop.f32.mrf.mxu0 }
 0x11b   :  { %254 = vst [vmem:[#allocation3 + $0x10] sm:$0xff] %v244_v30  ;;  %v246_v33 = vadd.f32 %v245_v32, %v167_v27 }
 0x11c   :  { %v249_v34 = vpop.f32.mrf.mxu0 }
 0x11d   :  { %255 = vst [vmem:[#allocation3] sm:$0xff] %v246_v33  ;;  %v250_v35 = vadd.f32 %v249_v34, %v163_v26 }
 0x11e   :  { %v251_v36 = vpop.f32.mrf.mxu0 }
 0x11f   :  { %256 = vst [vmem:[#allocation3 + $0x18] sm:$0xff] %v250_v35  ;;  %v252_v37 = vadd.f32 %v251_v36, %v167_v27 }
 0x120   :  { %v408_v38 = vpop.f32.mrf.mxu0 }
 0x121   :  { %257 = vst [vmem:[#allocation3 + $0x8] sm:$0xff] %v252_v37  ;;  %v413_v40 = vrot.slane %v408_v38, 2 }
 0x122   :  { %v4293_v39 = vpop.f32.mrf.mxu0  ;;  %v266_v47 = vld [vmem:[#allocation3 + $0x10] sm:$0x3] }
 0x123   :  { %v340_v48 = vadd.f32 %v336_v28, %v266_v47 }
 0x125   :  { %v4039_v57 = vmul.f32 -1.442695, %v340_v48 }
 0x128   :  { %v341_v41 = vld [vmem:[#allocation3 + $0x8] sm:$0xc0]  ;;  %v553_v18 = vld [vmem:[#allocation3 + $0x8] sm:$0x30] }
 0x129   :  { %v415_v42 = vadd.f32 %v413_v40, %v341_v41  ;;  %v476_v40 = vld [vmem:[#allocation3 + $0x10] sm:$0xc] }
 0x12b   :  { %4658 = vtanh.f32 %v415_v42  ;;  %v4040_v44 = vmul.f32 -1.442695, %v415_v42 }
 0x12d   :  { %4660 = vpow2.f32 %v4040_v44 }
 0x138   :  { %v4659_v43 = vpop.eup %4658 }
 0x139   :  { %449 = vrot.lane.b32.xlu0 %v4659_v43, %s5088_s4 }
 0x13a   :  { %v4661_v45 = vpop.eup %4660 }
 0x13b   :  { %v443_v46 = vadd.f32 1.0, %v4661_v45 }
 0x13d   :  { %4662 = vrcp.f32 %v443_v46 }
 0x13e   :  { %4664 = vtanh.f32 %v340_v48 }
 0x14a   :  { %v4663_v49 = vpop.eup %4662 }
 0x14b   :  { %v4665_v52 = vpop.eup %4664  ;;  %v447_v53 = vmul.f32 0.0, %v4663_v49 }
 0x1ab   :  { %v450_v50 = vpop.permute.xlu0 %449 }
 0x1ac   :  { %v452_v51 = vmul.f32 %v4663_v49, %v450_v50 }
 0x1ae   :  { %454 = vrot.lane.b32.xlu0 %v452_v51, %s5089_s24 }
 0x1b2   :  { %425 = vrot.lane.b32.xlu0 %v4665_v52, %s5088_s4 }
 0x220   :  { %v455_v54 = vpop.permute.xlu0 %454 }
 0x221   :  { %v5302_v55 = vadd.f32 %v455_v54, %v447_v53 }
 0x223   :  { %4666 = vtanh.f32 %v5302_v55  ;;  %v668_v34 = vrot.slane %v5302_v55, 2 }
 0x224   :  { %4668 = vpow2.f32 %v4039_v57  ;;  %v426_v63 = vpop.permute.xlu0 %425 }
 0x230   :  { %v4667_v56 = vpop.eup %4666 }
 0x231   :  { %460 = vrot.lane.b32.xlu1 %v4667_v56, %s5088_s4  ;;  %v4669_v58 = vpop.eup %4668 }
 0x232   :  { %v419_v59 = vadd.f32 1.0, %v4669_v58 }
 0x234   :  { %4670 = vrcp.f32 %v419_v59 }
 0x241   :  { %v4671_v1 = vpop.eup %4670 }
 0x242   :  { %v428_v2 = vmul.f32 %v4671_v1, %v426_v63  ;;  %v423_v4 = vmul.f32 0.0, %v4671_v1 }
 0x2a3   :  { %v461_v60 = vpop.permute.xlu1 %460 }
 0x2a4   :  { %v5306_v61 = vmul.f32 %v4663_v49, %v461_v60 }
 0x2a6   :  { %v554_v62 = vrot.slane %v5306_v61, 6 }
 0x2a8   :  { %555 = vrot.lane.b32.xlu1 %v554_v62, %s5089_s24 }
 0x2ac   :  { %430 = vrot.lane.b32.xlu1 %v428_v2, %s5089_s24 }
 0x31a   :  { %v556_v3 = vpop.permute.xlu1 %555 }
 0x31b   :  { %4314 = vmatmul.mubr.msk.f32.vlgmr.msra.gmra.mxu0 %vm170_vm9, %v556_v3  ;;  %v779_v3 = vld [vmem:[#allocation3 + $0x8] sm:$0xc] }
 0x31c   :  { %4328 = vmatpush3.msra.mxu0 %v5243_v15  ;;  %4335 = vmatprep.mubr.msk.f32.mxu0 %vm5087_vm0, %v5086_v0 }
 0x31d   :  { %4329 = vmatprep.subr.mxu0 %v5086_v0 }
 0x31e   :  { %v431_v5 = vpop.permute.xlu1 %430  ;;  %4330 = vmatpush3.msra.mxu0 %v5249_v17 }
 0x31f   :  { %v5317_v6 = vadd.f32 %v431_v5, %v423_v4  ;;  %4331 = vmatprep.subr.mxu0 %v5086_v0 }
 0x320   :  { %4332 = vmatpush3.msra.mxu0 %v5255_v19 }
 0x321   :  { %4672 = vtanh.f32 %v5317_v6  ;;  %4333 = vmatprep.subr.mxu0 %v5086_v0  ;;  %v641_v55 = vrot.slane %v5317_v6, 6 }
 0x322   :  { %4334 = vmatpush3.msra.mxu0 %v5262_v20 }
 0x323   :  { %4349 = vmatprep.subr.mxu0 %v5086_v0 }
 0x32e   :  { %v4673_v7 = vpop.eup %4672 }
 0x32f   :  { %436 = vrot.lane.b32.xlu1 %v4673_v7, %s5088_s4 }
 0x3a1   :  { %v437_v8 = vpop.permute.xlu1 %436 }
 0x3a2   :  { %v439_v11 = vmul.f32 %v4671_v1, %v437_v8 }
 0x3a4   :  { %465 = vrot.lane.b32.xlu1 %v439_v11, %s5089_s24 }
 0x3db   :  { %v625_v12 = vpop.f32.mrf.mxu0 }
 0x3dc   :  { %v630_v16 = vrot.slane %v625_v12, 4 }
 0x3dd   :  { %v4315_v21 = vpop.f32.mrf.mxu0 }
 0x3de   :  { %v632_v24 = vadd.f32 %v630_v16, %v553_v18 }
 0x3e0   :  { %4674 = vtanh.f32 %v632_v24  ;;  %v4044_v28 = vmul.f32 -1.442695, %v632_v24 }
 0x3e2   :  { %4676 = vpow2.f32 %v4044_v28 }
 0x3ed   :  { %v4675_v26 = vpop.eup %4674 }
 0x3ee   :  { %672 = vrot.lane.b32.xlu0 %v4675_v26, %s5088_s4 }
 0x3ef   :  { %v4677_v29 = vpop.eup %4676 }
 0x3f0   :  { %v663_v30 = vadd.f32 1.0, %v4677_v29 }
 0x3f2   :  { %4678 = vrcp.f32 %v663_v30 }
 0x3ff   :  { %v4679_v31 = vpop.eup %4678 }
 0x400   :  { %v670_v35 = vmul.f32 %v4679_v31, %v668_v34 }
 0x416   :  { %v466_v27 = vpop.permute.xlu1 %465 }
 0x417   :  { %469 = vst.msk [vmem:[#allocation4] sm:$0x3] %vm468_vm10, %v466_v27  ;;  %4303 = vmatmul.mubr.msk.f32.vlgmr.msra.gmra.mxu1 %vm170_vm9, %v466_v27 }
 0x418   :  { %4317 = vmatpush3.msra.mxu1 %v5210_v9  ;;  %4324 = vmatprep.mubr.msk.f32.mxu1 %vm5087_vm0, %v5086_v0 }
 0x419   :  { %4318 = vmatprep.subr.mxu1 %v5086_v0 }
 0x41a   :  { %4319 = vmatpush3.msra.mxu1 %v5216_v10 }
 0x41b   :  { %4320 = vmatprep.subr.mxu1 %v5086_v0 }
 0x41c   :  { %4321 = vmatpush3.msra.mxu1 %v5234_v13 }
 0x41d   :  { %4322 = vmatprep.subr.mxu1 %v5086_v0 }
 0x41e   :  { %4323 = vmatpush3.msra.mxu1 %v5238_v14 }
 0x41f   :  { %4338 = vmatprep.subr.mxu1 %v5086_v0 }
 0x460   :  { %v673_v32 = vpop.permute.xlu0 %672 }
 0x461   :  { %v675_v33 = vmul.f32 %v4679_v31, %v673_v32 }
 0x463   :  { %677 = vrot.lane.b32.xlu0 %v675_v33, %s5089_s24 }
 0x4d5   :  { %v678_v36 = vpop.permute.xlu0 %677 }
 0x4d6   :  { %v5342_v37 = vadd.f32 %v678_v36, %v670_v35 }
 0x4d7   :  { %v545_v38 = vpop.f32.mrf.mxu1 }
 0x4d8   :  { %4680 = vtanh.f32 %v5342_v37  ;;  %v550_v39 = vrot.slane %v545_v38, 6  ;;  %v894_v24 = vrot.slane %v5342_v37, 2 }
 0x4d9   :  { %v4304_v41 = vpop.f32.mrf.mxu1 }
 0x4da   :  { %v552_v42 = vadd.f32 %v550_v39, %v476_v40 }
 0x4dc   :  { %4682 = vtanh.f32 %v552_v42  ;;  %v4043_v45 = vmul.f32 -1.442695, %v552_v42 }
 0x4de   :  { %4684 = vpow2.f32 %v4043_v45 }
 0x4e5   :  { %v4681_v43 = vpop.eup %4680 }
 0x4e6   :  { %683 = vrot.lane.b32.xlu0 %v4681_v43, %s5088_s4 }
 0x4e9   :  { %v4683_v44 = vpop.eup %4682 }
 0x4ea   :  { %645 = vrot.lane.b32.xlu0 %v4683_v44, %s5088_s4 }
 0x4eb   :  { %v4685_v46 = vpop.eup %4684 }
 0x4ec   :  { %v636_v47 = vadd.f32 1.0, %v4685_v46 }
 0x4ee   :  { %4686 = vrcp.f32 %v636_v47 }
 0x4fb   :  { %v4687_v52 = vpop.eup %4686 }
 0x4fc   :  { %v643_v56 = vmul.f32 %v4687_v52, %v641_v55  ;;  %v1005_v55 = vld [vmem:[#allocation3 + $0x8] sm:$0x3] }
 0x558   :  { %v684_v48 = vpop.permute.xlu0 %683 }
 0x559   :  { %v5347_v49 = vmul.f32 %v4679_v31, %v684_v48  ;;  %v699_v31 = vld [vmem:[#allocation3 + $0x10] sm:$0x30] }
 0x55b   :  { %v780_v50 = vrot.slane %v5347_v49, 4 }
 0x55c   :  { %v646_v51 = vpop.permute.xlu0 %645 }
 0x55d   :  { %781 = vrot.lane.b32.xlu1 %v780_v50, %s5089_s24  ;;  %v648_v53 = vmul.f32 %v4687_v52, %v646_v51 }
 0x561   :  { %650 = vrot.lane.b32.xlu1 %v648_v53, %s5089_s24 }
 0x5cf   :  { %v782_v54 = vpop.permute.xlu1 %781 }
 0x5d0   :  { %4336 = vmatmul.mubr.msk.f32.vlgmr.msra.gmra.mxu0 %vm170_vm9, %v782_v54 }
 0x5d1   :  { %4350 = vmatpush3.msra.mxu0 %v5243_v15  ;;  %4357 = vmatprep.mubr.msk.f32.mxu0 %vm5087_vm0, %v5086_v0 }
 0x5d2   :  { %4351 = vmatprep.subr.mxu0 %v5086_v0 }
 0x5d3   :  { %v651_v57 = vpop.permute.xlu1 %650  ;;  %4352 = vmatpush3.msra.mxu0 %v5249_v17 }
 0x5d4   :  { %v5359_v58 = vadd.f32 %v651_v57, %v643_v56  ;;  %4353 = vmatprep.subr.mxu0 %v5086_v0 }
 0x5d5   :  { %4354 = vmatpush3.msra.mxu0 %v5255_v19 }
 0x5d6   :  { %4688 = vtanh.f32 %v5359_v58  ;;  %4355 = vmatprep.subr.mxu0 %v5086_v0  ;;  %v867_v46 = vrot.slane %v5359_v58, 6 }
 0x5d7   :  { %4356 = vmatpush3.msra.mxu0 %v5262_v20 }
 0x5d8   :  { %4371 = vmatprep.subr.mxu0 %v5086_v0 }
 0x5e3   :  { %v4689_v59 = vpop.eup %4688 }
 0x5e4   :  { %656 = vrot.lane.b32.xlu1 %v4689_v59, %s5088_s4 }
 0x656   :  { %v657_v60 = vpop.permute.xlu1 %656 }
 0x657   :  { %v5368_v62 = vmul.f32 %v4687_v52, %v657_v60 }
 0x659   :  { %v700_v63 = vrot.slane %v5368_v62, 2 }
 0x65b   :  { %701 = vrot.lane.b32.xlu1 %v700_v63, %s5089_s24 }
 0x690   :  { %v851_v1 = vpop.f32.mrf.mxu0 }
 0x691   :  { %v856_v2 = vrot.slane %v851_v1, 6 }
 0x692   :  { %v4337_v4 = vpop.f32.mrf.mxu0 }
 0x693   :  { %v858_v5 = vadd.f32 %v856_v2, %v779_v3 }
 0x695   :  { %4690 = vtanh.f32 %v858_v5  ;;  %v4048_v8 = vmul.f32 -1.442695, %v858_v5 }
 0x697   :  { %4692 = vpow2.f32 %v4048_v8 }
 0x6a2   :  { %v4691_v6 = vpop.eup %4690 }
 0x6a3   :  { %898 = vrot.lane.b32.xlu0 %v4691_v6, %s5088_s4 }
 0x6a4   :  { %v4693_v11 = vpop.eup %4692 }
 0x6a5   :  { %v889_v12 = vadd.f32 1.0, %v4693_v11 }
 0x6a7   :  { %4694 = vrcp.f32 %v889_v12 }
 0x6b4   :  { %v4695_v16 = vpop.eup %4694 }
 0x6b5   :  { %v896_v26 = vmul.f32 %v4695_v16, %v894_v24 }
 0x6cd   :  { %v702_v7 = vpop.permute.xlu1 %701 }
 0x6ce   :  { %4325 = vmatmul.mubr.msk.f32.vlgmr.msra.gmra.mxu1 %vm170_vm9, %v702_v7 }
 0x6cf   :  { %4339 = vmatpush3.msra.mxu1 %v5210_v9  ;;  %4346 = vmatprep.mubr.msk.f32.mxu1 %vm5087_vm0, %v5086_v0 }
 0x6d0   :  { %4340 = vmatprep.subr.mxu1 %v5086_v0 }
 0x6d1   :  { %4341 = vmatpush3.msra.mxu1 %v5216_v10 }
 0x6d2   :  { %4342 = vmatprep.subr.mxu1 %v5086_v0 }
 0x6d3   :  { %4343 = vmatpush3.msra.mxu1 %v5234_v13 }
 0x6d4   :  { %4344 = vmatprep.subr.mxu1 %v5086_v0 }
 0x6d5   :  { %4345 = vmatpush3.msra.mxu1 %v5238_v14 }
 0x6d6   :  { %4360 = vmatprep.subr.mxu1 %v5086_v0 }
 0x715   :  { %v899_v18 = vpop.permute.xlu0 %898 }
 0x716   :  { %v901_v21 = vmul.f32 %v4695_v16, %v899_v18  ;;  %v925_v18 = vld [vmem:[#allocation3 + $0x10] sm:$0xc0] }
 0x718   :  { %903 = vrot.lane.b32.xlu0 %v901_v21, %s5089_s24 }
 0x78a   :  { %v904_v27 = vpop.permute.xlu0 %903 }
 0x78b   :  { %v5386_v28 = vadd.f32 %v904_v27, %v896_v26 }
 0x78d   :  { %4696 = vtanh.f32 %v5386_v28  ;;  %v1117_v6 = vrot.slane %v5386_v28, 2 }
 0x78e   :  { %v771_v29 = vpop.f32.mrf.mxu1 }
 0x78f   :  { %v776_v30 = vrot.slane %v771_v29, 4 }
 0x790   :  { %v4326_v32 = vpop.f32.mrf.mxu1 }
 0x791   :  { %v778_v33 = vadd.f32 %v776_v30, %v699_v31 }
 0x793   :  { %4698 = vtanh.f32 %v778_v33  ;;  %v4047_v36 = vmul.f32 -1.442695, %v778_v33 }
 0x795   :  { %4700 = vpow2.f32 %v4047_v36 }
 0x79a   :  { %v4697_v34 = vpop.eup %4696 }
 0x79b   :  { %909 = vrot.lane.b32.xlu0 %v4697_v34, %s5088_s4 }
 0x7a0   :  { %v4699_v35 = vpop.eup %4698 }
 0x7a1   :  { %871 = vrot.lane.b32.xlu0 %v4699_v35, %s5088_s4 }
 0x7a2   :  { %v4701_v37 = vpop.eup %4700 }
 0x7a3   :  { %v862_v38 = vadd.f32 1.0, %v4701_v37 }
 0x7a5   :  { %4702 = vrcp.f32 %v862_v38 }
 0x7b2   :  { %v4703_v42 = vpop.eup %4702 }
 0x7b3   :  { %v869_v47 = vmul.f32 %v4703_v42, %v867_v46 }
 0x80d   :  { %v910_v39 = vpop.permute.xlu0 %909 }
 0x80e   :  { %v5391_v40 = vmul.f32 %v4695_v16, %v910_v39 }
 0x810   :  { %v1006_v41 = vrot.slane %v5391_v40, 2 }
 0x812   :  { %1007 = vrot.lane.b32.xlu1 %v1006_v41, %s5089_s24 }
 0x813   :  { %v872_v43 = vpop.permute.xlu0 %871 }
 0x814   :  { %v874_v44 = vmul.f32 %v4703_v42, %v872_v43 }
 0x816   :  { %876 = vrot.lane.b32.xlu1 %v874_v44, %s5089_s24 }
 0x884   :  { %v1008_v45 = vpop.permute.xlu1 %1007 }
 0x885   :  { %4358 = vmatmul.mubr.msk.f32.vlgmr.msra.gmra.mxu0 %vm170_vm9, %v1008_v45 }
 0x886   :  { %4372 = vmatpush3.msra.mxu0 %v5243_v15  ;;  %4379 = vmatprep.mubr.msk.f32.mxu0 %vm5087_vm0, %v5086_v0 }
 0x887   :  { %4373 = vmatprep.subr.mxu0 %v5086_v0 }
 0x888   :  { %v877_v48 = vpop.permute.xlu1 %876  ;;  %4374 = vmatpush3.msra.mxu0 %v5249_v17 }
 0x889   :  { %v5403_v50 = vadd.f32 %v877_v48, %v869_v47  ;;  %4375 = vmatprep.subr.mxu0 %v5086_v0  ;;  %v1225_v48 = vld [vmem:[#allocation3] sm:$0xc0] }
 0x88a   :  { %4376 = vmatpush3.msra.mxu0 %v5255_v19 }
 0x88b   :  { %4704 = vtanh.f32 %v5403_v50  ;;  %4377 = vmatprep.subr.mxu0 %v5086_v0  ;;  %v1090_v37 = vrot.slane %v5403_v50, 6 }
 0x88c   :  { %4378 = vmatpush3.msra.mxu0 %v5262_v20 }
 0x88d   :  { %4393 = vmatprep.subr.mxu0 %v5086_v0 }
 0x898   :  { %v4705_v51 = vpop.eup %4704 }
 0x899   :  { %882 = vrot.lane.b32.xlu1 %v4705_v51, %s5088_s4 }
 0x90b   :  { %v883_v52 = vpop.permute.xlu1 %882 }
 0x90c   :  { %v5412_v53 = vmul.f32 %v4703_v42, %v883_v52 }
 0x90e   :  { %v926_v54 = vrot.slane %v5412_v53, 4 }
 0x910   :  { %927 = vrot.lane.b32.xlu1 %v926_v54, %s5089_s24 }
 0x945   :  { %v1077_v56 = vpop.f32.mrf.mxu0 }
 0x946   :  { %v1081_v57 = vadd.f32 %v1077_v56, %v1005_v55 }
 0x947   :  { %v4359_v58 = vpop.f32.mrf.mxu0 }
 0x948   :  { %4706 = vtanh.f32 %v1081_v57  ;;  %v4052_v63 = vmul.f32 -1.442695, %v1081_v57 }
 0x94a   :  { %4708 = vpow2.f32 %v4052_v63 }
 0x955   :  { %v4707_v59 = vpop.eup %4706 }
 0x956   :  { %1121 = vrot.lane.b32.xlu0 %v4707_v59, %s5088_s4 }
 0x957   :  { %v4709_v1 = vpop.eup %4708 }
 0x958   :  { %v1112_v2 = vadd.f32 1.0, %v4709_v1 }
 0x95a   :  { %4710 = vrcp.f32 %v1112_v2 }
 0x967   :  { %v4711_v3 = vpop.eup %4710 }
 0x968   :  { %v1119_v7 = vmul.f32 %v4711_v3, %v1117_v6 }
 0x982   :  { %v928_v60 = vpop.permute.xlu1 %927 }
 0x983   :  { %4347 = vmatmul.mubr.msk.f32.vlgmr.msra.gmra.mxu1 %vm170_vm9, %v928_v60 }
 0x984   :  { %4361 = vmatpush3.msra.mxu1 %v5210_v9  ;;  %4368 = vmatprep.mubr.msk.f32.mxu1 %vm5087_vm0, %v5086_v0 }
 0x985   :  { %4362 = vmatprep.subr.mxu1 %v5086_v0 }
 0x986   :  { %4363 = vmatpush3.msra.mxu1 %v5216_v10 }
 0x987   :  { %4364 = vmatprep.subr.mxu1 %v5086_v0 }
 0x988   :  { %4365 = vmatpush3.msra.mxu1 %v5234_v13 }
 0x989   :  { %4366 = vmatprep.subr.mxu1 %v5086_v0 }
 0x98a   :  { %4367 = vmatpush3.msra.mxu1 %v5238_v14 }
 0x98b   :  { %4382 = vmatprep.subr.mxu1 %v5086_v0 }
 0x9c8   :  { %v1122_v4 = vpop.permute.xlu0 %1121 }
 0x9c9   :  { %v1124_v5 = vmul.f32 %v4711_v3, %v1122_v4  ;;  %v1148_v4 = vld [vmem:[#allocation3 + $0x18] sm:$0x3] }
 0x9cb   :  { %1126 = vrot.lane.b32.xlu0 %v1124_v5, %s5089_s24 }
 0xa3d   :  { %v1127_v8 = vpop.permute.xlu0 %1126 }
 0xa3e   :  { %v5430_v11 = vadd.f32 %v1127_v8, %v1119_v7 }
 0xa40   :  { %4712 = vtanh.f32 %v5430_v11  ;;  %v1339_v63 = vrot.slane %v5430_v11, 2 }
 0xa43   :  { %v997_v12 = vpop.f32.mrf.mxu1 }
 0xa44   :  { %v1002_v16 = vrot.slane %v997_v12, 2 }
 0xa45   :  { %v4348_v21 = vpop.f32.mrf.mxu1 }
 0xa46   :  { %v1004_v24 = vadd.f32 %v1002_v16, %v925_v18 }
 0xa48   :  { %4714 = vtanh.f32 %v1004_v24  ;;  %v4051_v29 = vmul.f32 -1.442695, %v1004_v24 }
 0xa4a   :  { %4716 = vpow2.f32 %v4051_v29 }
 0xa4d   :  { %v4713_v26 = vpop.eup %4712 }
 0xa4e   :  { %1132 = vrot.lane.b32.xlu0 %v4713_v26, %s5088_s4 }
 0xa55   :  { %v4715_v27 = vpop.eup %4714 }
 0xa56   :  { %1094 = vrot.lane.b32.xlu0 %v4715_v27, %s5088_s4 }
 0xa57   :  { %v4717_v28 = vpop.eup %4716 }
 0xa58   :  { %v1085_v30 = vadd.f32 1.0, %v4717_v28 }
 0xa5a   :  { %4718 = vrcp.f32 %v1085_v30 }
 0xa67   :  { %v4719_v33 = vpop.eup %4718 }
 0xa68   :  { %v1092_v38 = vmul.f32 %v4719_v33, %v1090_v37 }
 0xac0   :  { %v1133_v31 = vpop.permute.xlu0 %1132 }
 0xac1   :  { %v5435_v32 = vmul.f32 %v4711_v3, %v1133_v31 }
 0xac3   :  { %1226 = vrot.lane.b32.xlu1 %v5435_v32, %s5089_s24 }
 0xac8   :  { %v1095_v34 = vpop.permute.xlu0 %1094 }
 0xac9   :  { %v1097_v35 = vmul.f32 %v4719_v33, %v1095_v34 }
 0xacb   :  { %1099 = vrot.lane.b32.xlu1 %v1097_v35, %s5089_s24 }
 0xb35   :  { %v1227_v36 = vpop.permute.xlu1 %1226 }
 0xb36   :  { %4380 = vmatmul.mubr.msk.f32.vlgmr.msra.gmra.mxu0 %vm170_vm9, %v1227_v36 }
 0xb37   :  { %4394 = vmatpush3.msra.mxu0 %v5243_v15  ;;  %4401 = vmatprep.mubr.msk.f32.mxu0 %vm5087_vm0, %v5086_v0 }
 0xb38   :  { %4395 = vmatprep.subr.mxu0 %v5086_v0 }
 0xb39   :  { %4396 = vmatpush3.msra.mxu0 %v5249_v17 }
 0xb3a   :  { %4397 = vmatprep.subr.mxu0 %v5086_v0 }
 0xb3b   :  { %4398 = vmatpush3.msra.mxu0 %v5255_v19 }
 0xb3c   :  { %4399 = vmatprep.subr.mxu0 %v5086_v0 }
 0xb3d   :  { %v1100_v39 = vpop.permute.xlu1 %1099  ;;  %4400 = vmatpush3.msra.mxu0 %v5262_v20 }
 0xb3e   :  { %v5451_v41 = vadd.f32 %v1100_v39, %v1092_v38  ;;  %4415 = vmatprep.subr.mxu0 %v5086_v0 }
 0xb40   :  { %4720 = vtanh.f32 %v5451_v41  ;;  %v1312_v31 = vrot.slane %v5451_v41, 6 }
 0xb4d   :  { %v4721_v42 = vpop.eup %4720 }
 0xb4e   :  { %1105 = vrot.lane.b32.xlu1 %v4721_v42, %s5088_s4  ;;  %v1445_v42 = vld [vmem:[#allocation3] sm:$0x30] }
 0xbc0   :  { %v1106_v43 = vpop.permute.xlu1 %1105 }
 0xbc1   :  { %v5456_v44 = vmul.f32 %v4719_v33, %v1106_v43 }
 0xbc3   :  { %v1149_v45 = vrot.slane %v5456_v44, 6 }
 0xbc5   :  { %1150 = vrot.lane.b32.xlu1 %v1149_v45, %s5089_s24 }
 0xbf6   :  { %v1296_v46 = vpop.f32.mrf.mxu0 }
 0xbf7   :  { %v1301_v47 = vrot.slane %v1296_v46, 2 }
 0xbf8   :  { %v4381_v50 = vpop.f32.mrf.mxu0 }
 0xbf9   :  { %v1303_v51 = vadd.f32 %v1301_v47, %v1225_v48 }
 0xbfb   :  { %4722 = vtanh.f32 %v1303_v51  ;;  %v4056_v55 = vmul.f32 -1.442695, %v1303_v51 }
 0xbfd   :  { %4724 = vpow2.f32 %v4056_v55 }
 0xc08   :  { %v4723_v52 = vpop.eup %4722 }
 0xc09   :  { %1343 = vrot.lane.b32.xlu0 %v4723_v52, %s5088_s4 }
 0xc0a   :  { %v4725_v56 = vpop.eup %4724 }
 0xc0b   :  { %v1334_v57 = vadd.f32 1.0, %v4725_v56 }
 0xc0d   :  { %4726 = vrcp.f32 %v1334_v57 }
 0xc1a   :  { %v4727_v58 = vpop.eup %4726 }
 0xc1b   :  { %v1341_v1 = vmul.f32 %v4727_v58, %v1339_v63 }
 0xc37   :  { %v1151_v54 = vpop.permute.xlu1 %1150 }
 0xc38   :  { %4369 = vmatmul.mubr.msk.f32.vlgmr.msra.gmra.mxu1 %vm170_vm9, %v1151_v54 }
 0xc39   :  { %4383 = vmatpush3.msra.mxu1 %v5210_v9  ;;  %4390 = vmatprep.mubr.msk.f32.mxu1 %vm5087_vm0, %v5086_v0 }
 0xc3a   :  { %4384 = vmatprep.subr.mxu1 %v5086_v0 }
 0xc3b   :  { %4385 = vmatpush3.msra.mxu1 %v5216_v10 }
 0xc3c   :  { %4386 = vmatprep.subr.mxu1 %v5086_v0 }
 0xc3d   :  { %4387 = vmatpush3.msra.mxu1 %v5234_v13 }
 0xc3e   :  { %4388 = vmatprep.subr.mxu1 %v5086_v0 }
 0xc3f   :  { %4389 = vmatpush3.msra.mxu1 %v5238_v14 }
 0xc40   :  { %4404 = vmatprep.subr.mxu1 %v5086_v0 }
 0xc7b   :  { %v1344_v59 = vpop.permute.xlu0 %1343 }
 0xc7c   :  { %v1346_v60 = vmul.f32 %v4727_v58, %v1344_v59 }
 0xc7e   :  { %1348 = vrot.lane.b32.xlu0 %v1346_v60, %s5089_s24 }
 0xcf0   :  { %v1349_v2 = vpop.permute.xlu0 %1348 }
 0xcf1   :  { %v5474_v3 = vadd.f32 %v1349_v2, %v1341_v1 }
 0xcf3   :  { %4728 = vtanh.f32 %v5474_v3 }
 0xcf8   :  { %v1220_v5 = vpop.f32.mrf.mxu1 }
 0xcf9   :  { %v1224_v6 = vadd.f32 %v1220_v5, %v1148_v4 }
 0xcfa   :  { %v4370_v7 = vpop.f32.mrf.mxu1 }
 0xcfb   :  { %4730 = vtanh.f32 %v1224_v6  ;;  %v4055_v16 = vmul.f32 -1.442695, %v1224_v6 }
 0xcfd   :  { %4732 = vpow2.f32 %v4055_v16 }
 0xd00   :  { %v4729_v8 = vpop.eup %4728 }
 0xd01   :  { %1354 = vrot.lane.b32.xlu0 %v4729_v8, %s5088_s4 }
 0xd08   :  { %v4731_v12 = vpop.eup %4730 }
 0xd09   :  { %1316 = vrot.lane.b32.xlu0 %v4731_v12, %s5088_s4 }
 0xd0a   :  { %v4733_v11 = vpop.eup %4732 }
 0xd0b   :  { %v1307_v18 = vadd.f32 1.0, %v4733_v11 }
 0xd0d   :  { %4734 = vrcp.f32 %v1307_v18 }
 0xd1a   :  { %v4735_v27 = vpop.eup %4734 }
 0xd1b   :  { %v1314_v33 = vmul.f32 %v4735_v27, %v1312_v31  ;;  %v1669_v31 = vld [vmem:[#allocation3] sm:$0xc] }
 0xd73   :  { %v1355_v21 = vpop.permute.xlu0 %1354 }
 0xd74   :  { %v5479_v24 = vmul.f32 %v4727_v58, %v1355_v21  ;;  %v1368_v58 = vld [vmem:[#allocation3 + $0x18] sm:$0xc] }
 0xd76   :  { %v1446_v26 = vrot.slane %v5479_v24, 6 }
 0xd78   :  { %1447 = vrot.lane.b32.xlu1 %v1446_v26, %s5089_s24 }
 0xd7b   :  { %v1317_v29 = vpop.permute.xlu0 %1316 }
 0xd7c   :  { %v1319_v28 = vmul.f32 %v4735_v27, %v1317_v29 }
 0xd7e   :  { %1321 = vrot.lane.b32.xlu1 %v1319_v28, %s5089_s24 }
 0xdea   :  { %v1448_v30 = vpop.permute.xlu1 %1447 }
 0xdeb   :  { %4402 = vmatmul.mubr.msk.f32.vlgmr.msra.gmra.mxu0 %vm170_vm9, %v1448_v30 }
 0xdec   :  { %4416 = vmatpush3.msra.mxu0 %v5243_v15  ;;  %4423 = vmatprep.mubr.msk.f32.mxu0 %vm5087_vm0, %v5086_v0 }
 0xded   :  { %4417 = vmatprep.subr.mxu0 %v5086_v0 }
 0xdee   :  { %4418 = vmatpush3.msra.mxu0 %v5249_v17 }
 0xdef   :  { %4419 = vmatprep.subr.mxu0 %v5086_v0 }
 0xdf0   :  { %v1322_v34 = vpop.permute.xlu1 %1321  ;;  %4420 = vmatpush3.msra.mxu0 %v5255_v19 }
 0xdf1   :  { %v5493_v35 = vadd.f32 %v1322_v34, %v1314_v33  ;;  %4421 = vmatprep.subr.mxu0 %v5086_v0 }
 0xdf2   :  { %4422 = vmatpush3.msra.mxu0 %v5262_v20 }
 0xdf3   :  { %4736 = vtanh.f32 %v5493_v35  ;;  %4437 = vmatprep.subr.mxu0 %v5086_v0  ;;  %v1533_v18 = vrot.slane %v5493_v35, 6 }
 0xe00   :  { %v4737_v36 = vpop.eup %4736 }
 0xe01   :  { %1327 = vrot.lane.b32.xlu1 %v4737_v36, %s5088_s4  ;;  %v4918_v36 = vld [vmem:[#allocation9 + $0x18] sm:$0xff] }
 0xe73   :  { %v1328_v37 = vpop.permute.xlu1 %1327 }
 0xe74   :  { %v1330_v38 = vmul.f32 %v4735_v27, %v1328_v37  ;;  %v4919_v37 = vld [vmem:[#allocation9 + $0x10] sm:$0xff] }
 0xe76   :  { %1359 = vrot.lane.b32.xlu1 %v1330_v38, %s5089_s24  ;;  %v4920_v38 = vld [vmem:[#allocation9 + $0x8] sm:$0xff] }
 0xeab   :  { %v1517_v39 = vpop.f32.mrf.mxu0 }
 0xeac   :  { %v1522_v41 = vrot.slane %v1517_v39, 4  ;;  %v4921_v39 = vld [vmem:[#allocation9] sm:$0xff] }
 0xead   :  { %v4403_v43 = vpop.f32.mrf.mxu0 }
 0xeae   :  { %v1524_v45 = vadd.f32 %v1522_v41, %v1445_v42 }
 0xeb0   :  { %4738 = vtanh.f32 %v1524_v45  ;;  %v4060_v48 = vmul.f32 -1.442695, %v1524_v45 }
 0xeb2   :  { %4740 = vpow2.f32 %v4060_v48 }
 0xebd   :  { %v4739_v46 = vpop.eup %4738 }
 0xebe   :  { %1564 = vrot.lane.b32.xlu0 %v4739_v46, %s5088_s4 }
 0xee8   :  { %v5502_v47 = vpop.permute.xlu1 %1359 }
 0xee9   :  { %4391 = vmatmul.mubr.msk.f32.vlgmr.msra.gmra.mxu1 %vm170_vm9, %v5502_v47 }
 0xeea   :  { %4405 = vmatpush3.msra.mxu1 %v5210_v9  ;;  %4412 = vmatprep.mubr.msk.f32.mxu1 %vm5087_vm0, %v5086_v0  ;;  %v4741_v9 = vpop.eup %4740 }
 0xeeb   :  { %4406 = vmatprep.subr.mxu1 %v5086_v0  ;;  %v1555_v50 = vadd.f32 1.0, %v4741_v9 }
 0xeec   :  { %4407 = vmatpush3.msra.mxu1 %v5216_v10  ;;  %v1560_v10 = vrot.slane %v5474_v3, 2 }
 0xeed   :  { %4408 = vmatprep.subr.mxu1 %v5086_v0  ;;  %4742 = vrcp.f32 %v1555_v50 }
 0xeee   :  { %4409 = vmatpush3.msra.mxu1 %v5234_v13 }
 0xeef   :  { %4410 = vmatprep.subr.mxu1 %v5086_v0 }
 0xef0   :  { %4411 = vmatpush3.msra.mxu1 %v5238_v14 }
 0xef1   :  { %4426 = vmatprep.subr.mxu1 %v5086_v0 }
 0xefa   :  { %v4743_v51 = vpop.eup %4742 }
 0xefb   :  { %v1562_v55 = vmul.f32 %v4743_v51, %v1560_v10 }
 0xf30   :  { %v1565_v52 = vpop.permute.xlu0 %1564 }
 0xf31   :  { %v1567_v54 = vmul.f32 %v4743_v51, %v1565_v52 }
 0xf33   :  { %1569 = vrot.lane.b32.xlu0 %v1567_v54, %s5089_s24 }
 0xfa5   :  { %v1570_v13 = vpop.permute.xlu0 %1569 }
 0xfa6   :  { %v5518_v56 = vadd.f32 %v1570_v13, %v1562_v55  ;;  %v1589_v55 = vld [vmem:[#allocation3 + $0x18] sm:$0x30] }
 0xfa8   :  { %4744 = vtanh.f32 %v5518_v56  ;;  %v1784_v9 = vrot.slane %v5518_v56, 2 }
 0xfa9   :  { %v1437_v14 = vpop.f32.mrf.mxu1 }
 0xfaa   :  { %v1442_v57 = vrot.slane %v1437_v14, 6 }
 0xfab   :  { %v4392_v59 = vpop.f32.mrf.mxu1 }
 0xfac   :  { %v1444_v60 = vadd.f32 %v1442_v57, %v1368_v58 }
 0xfae   :  { %4746 = vtanh.f32 %v1444_v60  ;;  %v4059_v2 = vmul.f32 -1.442695, %v1444_v60 }
 0xfb0   :  { %4748 = vpow2.f32 %v4059_v2 }
 0xfb5   :  { %v4745_v63 = vpop.eup %4744 }
 0xfb6   :  { %1575 = vrot.lane.b32.xlu0 %v4745_v63, %s5088_s4 }
 0xfbb   :  { %v4747_v1 = vpop.eup %4746 }
 0xfbc   :  { %1537 = vrot.lane.b32.xlu0 %v4747_v1, %s5088_s4 }
 0xfbd   :  { %v4749_v3 = vpop.eup %4748 }
 0xfbe   :  { %v1528_v4 = vadd.f32 1.0, %v4749_v3 }
 0xfc0   :  { %4750 = vrcp.f32 %v1528_v4 }
 0xfcd   :  { %v4751_v8 = vpop.eup %4750 }
 0xfce   :  { %v1535_v21 = vmul.f32 %v4751_v8, %v1533_v18 }
0x1028   :  { %v1576_v5 = vpop.permute.xlu0 %1575 }
0x1029   :  { %v5523_v6 = vmul.f32 %v4743_v51, %v1576_v5 }
0x102b   :  { %v1670_v7 = vrot.slane %v5523_v6, 4 }
0x102d   :  { %1671 = vrot.lane.b32.xlu1 %v1670_v7, %s5089_s24 }
0x102e   :  { %v1538_v12 = vpop.permute.xlu0 %1537 }
0x102f   :  { %v1540_v16 = vmul.f32 %v4751_v8, %v1538_v12 }
0x1031   :  { %1542 = vrot.lane.b32.xlu1 %v1540_v16, %s5089_s24 }
0x109f   :  { %v1672_v11 = vpop.permute.xlu1 %1671 }
0x10a0   :  { %4424 = vmatmul.mubr.msk.f32.vlgmr.msra.gmra.mxu0 %vm170_vm9, %v1672_v11 }
0x10a1   :  { %4438 = vmatpush3.msra.mxu0 %v5243_v15  ;;  %4445 = vmatprep.mubr.msk.f32.mxu0 %vm5087_vm0, %v5086_v0 }
0x10a2   :  { %4439 = vmatprep.subr.mxu0 %v5086_v0 }
0x10a3   :  { %v1543_v26 = vpop.permute.xlu1 %1542  ;;  %4440 = vmatpush3.msra.mxu0 %v5249_v17 }
0x10a4   :  { %v5535_v27 = vadd.f32 %v1543_v26, %v1535_v21  ;;  %4441 = vmatprep.subr.mxu0 %v5086_v0 }
0x10a5   :  { %4442 = vmatpush3.msra.mxu0 %v5255_v19 }
0x10a6   :  { %4752 = vtanh.f32 %v5535_v27  ;;  %4443 = vmatprep.subr.mxu0 %v5086_v0 }
0x10a7   :  { %4444 = vmatpush3.msra.mxu0 %v5262_v20 }
0x10a8   :  { %4448 = vmatprep.subr.mxu0 %v5086_v0 }
0x10b3   :  { %v4753_v15 = vpop.eup %4752 }
0x10b4   :  { %1548 = vrot.lane.b32.xlu1 %v4753_v15, %s5088_s4 }
0x1126   :  { %v1549_v29 = vpop.permute.xlu1 %1548 }
0x1127   :  { %v5544_v28 = vmul.f32 %v4751_v8, %v1549_v29  ;;  %v1757_v8 = vrot.slane %v5535_v27, 6  ;;  %v1893_v27 = vld [vmem:[#allocation3] sm:$0x3] }
0x1129   :  { %v1590_v17 = vrot.slane %v5544_v28, 2 }
0x112b   :  { %1591 = vrot.lane.b32.xlu1 %v1590_v17, %s5089_s24 }
0x1160   :  { %v1741_v30 = vpop.f32.mrf.mxu0 }
0x1161   :  { %v1746_v19 = vrot.slane %v1741_v30, 6 }
0x1162   :  { %v4425_v33 = vpop.f32.mrf.mxu0 }
0x1163   :  { %v1748_v34 = vadd.f32 %v1746_v19, %v1669_v31 }
0x1165   :  { %4754 = vtanh.f32 %v1748_v34  ;;  %v4064_v41 = vmul.f32 -1.442695, %v1748_v34 }
0x1167   :  { %4756 = vpow2.f32 %v4064_v41 }
0x1172   :  { %v4755_v35 = vpop.eup %4754 }
0x1173   :  { %1788 = vrot.lane.b32.xlu0 %v4755_v35, %s5088_s4 }
0x1174   :  { %v4757_v42 = vpop.eup %4756 }
0x1175   :  { %v1779_v43 = vadd.f32 1.0, %v4757_v42 }
0x1177   :  { %4758 = vrcp.f32 %v1779_v43 }
0x1184   :  { %v4759_v45 = vpop.eup %4758 }
0x1185   :  { %v1786_v50 = vmul.f32 %v4759_v45, %v1784_v9 }
0x119d   :  { %v1592_v20 = vpop.permute.xlu1 %1591 }
0x119e   :  { %4413 = vmatmul.mubr.msk.f32.vlgmr.msra.gmra.mxu1 %vm170_vm9, %v1592_v20 }
0x119f   :  { %4427 = vmatpush3.msra.mxu1 %v4918_v36  ;;  %4434 = vmatprep.mubr.msk.f32.mxu1 %vm5087_vm0, %v5086_v0 }
0x11a0   :  { %4428 = vmatprep.subr.mxu1 %v5086_v0 }
0x11a1   :  { %4429 = vmatpush3.msra.mxu1 %v4919_v37 }
0x11a2   :  { %4430 = vmatprep.subr.mxu1 %v5086_v0 }
0x11a3   :  { %4431 = vmatpush3.msra.mxu1 %v4920_v38 }
0x11a4   :  { %4432 = vmatprep.subr.mxu1 %v5086_v0 }
0x11a5   :  { %4433 = vmatpush3.msra.mxu1 %v4921_v39 }
0x11e5   :  { %v1789_v46 = vpop.permute.xlu0 %1788 }
0x11e6   :  { %v1791_v48 = vmul.f32 %v4759_v45, %v1789_v46  ;;  %v1813_v46 = vld [vmem:[#allocation3 + $0x18] sm:$0xc0] }
0x11e8   :  { %1793 = vrot.lane.b32.xlu0 %v1791_v48, %s5089_s24 }
0x125a   :  { %v1794_v51 = vpop.permute.xlu0 %1793 }
0x125b   :  { %v5557_v52 = vadd.f32 %v1794_v51, %v1786_v50  ;;  %v2051_v50 = vld [vmem:[#allocation12 + $0x78] sm:$0xff]  ;;  %v2050_v51 = vld [vmem:[#allocation12 + $0x70] sm:$0xff] }
0x125c   :  { %2087 = vmatprep.subr.mxu1 %v2051_v50 }
0x125d   :  { %4760 = vtanh.f32 %v5557_v52  ;;  %v2005_v37 = vrot.slane %v5557_v52, 2  ;;  %v2049_v52 = vld [vmem:[#allocation12 + $0x68] sm:$0xff] }
0x125e   :  { %v1661_v54 = vpop.f32.mrf.mxu1 }
0x125f   :  { %v1666_v10 = vrot.slane %v1661_v54, 4  ;;  %v2048_v54 = vld [vmem:[#allocation12 + $0x60] sm:$0xff] }
0x1260   :  { %v4414_v13 = vpop.f32.mrf.mxu1 }
0x1261   :  { %v1668_v14 = vadd.f32 %v1666_v10, %v1589_v55  ;;  %v2047_v10 = vld [vmem:[#allocation12 + $0x58] sm:$0xff]  ;;  %v2046_v55 = vld [vmem:[#allocation12 + $0x50] sm:$0xff]  ;;  %v2045_v13 = vld [vmem:[#allocation12 + $0x48] sm:$0xff] }
0x1263   :  { %4762 = vtanh.f32 %v1668_v14  ;;  %v4063_v59 = vmul.f32 -1.442695, %v1668_v14  ;;  %v2044_v14 = vld [vmem:[#allocation12 + $0x40] sm:$0xff] }
0x1265   :  { %4764 = vpow2.f32 %v4063_v59  ;;  %v2042_v59 = vld [vmem:[#allocation12 + $0x30] sm:$0xff] }
0x126a   :  { %v4761_v57 = vpop.eup %4760 }
0x126b   :  { %1799 = vrot.lane.b32.xlu0 %v4761_v57, %s5088_s4 }
0x1270   :  { %v4763_v58 = vpop.eup %4762 }
0x1271   :  { %1761 = vrot.lane.b32.xlu0 %v4763_v58, %s5088_s4  ;;  %v2043_v58 = vld [vmem:[#allocation12 + $0x38] sm:$0xff] }
0x1272   :  { %v4765_v56 = vpop.eup %4764 }
0x1273   :  { %v1752_v60 = vadd.f32 1.0, %v4765_v56  ;;  %v2040_v56 = vld [vmem:[#allocation12 + $0x20] sm:$0xff] }
0x1275   :  { %4766 = vrcp.f32 %v1752_v60  ;;  %v2039_v60 = vld [vmem:[#allocation12 + $0x18] sm:$0xff] }
0x1282   :  { %v4767_v3 = vpop.eup %4766 }
0x1283   :  { %v1759_v12 = vmul.f32 %v4767_v3, %v1757_v8 }
0x12dd   :  { %v1800_v63 = vpop.permute.xlu0 %1799 }
0x12de   :  { %v5562_v1 = vmul.f32 %v4759_v45, %v1800_v63  ;;  %v2038_v63 = vld [vmem:[#allocation12 + $0x10] sm:$0xff] }
0x12e0   :  { %v1894_v2 = vrot.slane %v5562_v1, 2 }
0x12e2   :  { %1895 = vrot.lane.b32.xlu1 %v1894_v2, %s5089_s24  ;;  %v2037_v2 = vld [vmem:[#allocation12 + $0x8] sm:$0xff] }
0x12e3   :  { %v1762_v4 = vpop.permute.xlu0 %1761 }
0x12e4   :  { %v1764_v5 = vmul.f32 %v4767_v3, %v1762_v4  ;;  %v5604_v4 = vld [vmem:[#allocation14 + $0x18] sm:$0xff] }
0x12e6   :  { %1766 = vrot.lane.b32.xlu1 %v1764_v5, %s5089_s24  ;;  %v5606_v5 = vld [vmem:[#allocation14 + $0x10] sm:$0xff] }
0x1354   :  { %v1896_v7 = vpop.permute.xlu1 %1895 }
0x1355   :  { %4446 = vmatmul.mubr.msk.f32.vlgmr.msra.gmra.mxu0 %vm170_vm9, %v1896_v7 }
0x1356   :  { %4456 = vmatprep.mubr.msk.f32.mxu0 %vm5087_vm0, %v5086_v0  ;;  %4449 = vmatpush3.msra.mxu0 %v5604_v4 }
0x1357   :  { %4450 = vmatprep.subr.mxu0 %v5086_v0 }
0x1358   :  { %v1767_v16 = vpop.permute.xlu1 %1766  ;;  %4451 = vmatpush3.msra.mxu0 %v5606_v5 }
0x1359   :  { %v5571_v11 = vadd.f32 %v1767_v16, %v1759_v12  ;;  %v5611_v12 = vld [vmem:[#allocation14 + $0x8] sm:$0xff]  ;;  %4452 = vmatprep.subr.mxu0 %v5086_v0 }
0x135a   :  { %4453 = vmatpush3.msra.mxu0 %v5611_v12 }
0x135b   :  { %4768 = vtanh.f32 %v5571_v11  ;;  %4454 = vmatprep.subr.mxu0 %v5086_v0 }
0x1368   :  { %v4769_v18 = vpop.eup %4768 }
0x1369   :  { %1772 = vrot.lane.b32.xlu1 %v4769_v18, %s5088_s4  ;;  %v5616_v18 = vld [vmem:[#allocation14] sm:$0xff] }
0x136a   :  { %4455 = vmatpush3.msra.mxu0 %v5616_v18 }
0x136b   :  { %4457 = vmatmul.mubr.f32.vlgmr.msra.gmra.mxu0 %v5086_v0  ;;  %4459 = vmatprep.subr.mxu0 %v5086_v0 }
0x136c   :  { %4467 = vmatprep.mubr.msk.f32.mxu0 %vm5087_vm0, %v5086_v0 }
0x13db   :  { %v1773_v21 = vpop.permute.xlu1 %1772 }
0x13dc   :  { %v5575_v26 = vmul.f32 %v4767_v3, %v1773_v21 }
0x13de   :  { %v1814_v15 = vrot.slane %v5575_v26, 4 }
0x13e0   :  { %1815 = vrot.lane.b32.xlu1 %v1814_v15, %s5089_s24 }
0x13e4   :  { %688 = vrot.lane.b32.xlu1 %v5368_v62, %s5089_s24 }
0x13e8   :  { %1137 = vrot.lane.b32.xlu1 %v5456_v44, %s5089_s24 }
0x13ec   :  { %1585 = vrot.lane.b32.xlu1 %v5523_v6, %s5088_s4 }
0x1415   :  { %v1965_v29 = vpop.f32.mrf.mxu0 }
0x1416   :  { %v1969_v17 = vadd.f32 %v1965_v29, %v1893_v27 }
0x1417   :  { %v4447_v30 = vpop.f32.mrf.mxu0 }
0x1418   :  { %4770 = vtanh.f32 %v1969_v17  ;;  %v4068_v6 = vmul.f32 -1.442695, %v1969_v17 }
0x141a   :  { %4772 = vpow2.f32 %v4068_v6 }
0x1425   :  { %v4771_v19 = vpop.eup %4770 }
0x1426   :  { %2009 = vrot.lane.b32.xlu0 %v4771_v19, %s5088_s4 }
0x1427   :  { %v4773_v33 = vpop.eup %4772 }
0x1428   :  { %v2000_v34 = vadd.f32 1.0, %v4773_v33 }
0x142a   :  { %4774 = vrcp.f32 %v2000_v34 }
0x1437   :  { %v5590_v35 = vpop.eup %4774 }
0x1438   :  { %v2007_v38 = vmul.f32 %v5590_v35, %v2005_v37 }
0x1452   :  { %v1816_v31 = vpop.permute.xlu1 %1815 }
0x1453   :  { %4435 = vmatmul.mubr.msk.f32.vlgmr.msra.gmra.mxu1 %vm170_vm9, %v1816_v31 }
0x1454   :  { %2135 = vmatprep.mubr.f32.mxu1 %v5086_v0  ;;  %2088 = vmatpush1.msra.mxu1 %v2050_v51 }
0x1455   :  { %2089 = vmatprep.subr.mxu1 %v2049_v52 }
0x1456   :  { %v689_v62 = vpop.permute.xlu1 %688  ;;  %2090 = vmatpush1.msra.mxu1 %v2048_v54 }
0x1457   :  { %692 = vst.msk [vmem:[#allocation4] sm:$0xc] %vm691_vm11, %v689_v62  ;;  %2091 = vmatprep.subr.mxu1 %v2047_v10 }
0x1458   :  { %2092 = vmatpush1.msra.mxu1 %v2046_v55  ;;  %v5672_v55 = vld [vmem:[#allocation15 + $0x18] sm:$0xff] }
0x1459   :  { %2093 = vmatprep.subr.mxu1 %v2045_v13  ;;  %v5674_v13 = vld [vmem:[#allocation15 + $0x10] sm:$0xff]  ;;  %4460 = vmatpush3.msra.mxu0 %v5672_v55 }
0x145a   :  { %v1138_v44 = vpop.permute.xlu1 %1137  ;;  %2094 = vmatpush1.msra.mxu1 %v2044_v14  ;;  %4461 = vmatprep.subr.mxu0 %v5086_v0  ;;  %v5680_v14 = vld [vmem:[#allocation15 + $0x8] sm:$0xff] }
0x145b   :  { %1141 = vst.msk [vmem:[#allocation4] sm:$0xc0] %vm1140_vm12, %v1138_v44  ;;  %2095 = vmatprep.subr.mxu1 %v2043_v58  ;;  %v1978_v44 = vrot.slane %v5571_v11, 6  ;;  %v2227_v11 = vpop.f32.mrf.mxu0  ;;  %4462 = vmatpush3.msra.mxu0 %v5674_v13 }
0x145c   :  { %2096 = vmatpush1.msra.mxu1 %v2042_v59  ;;  %4463 = vmatprep.subr.mxu0 %v5086_v0 }
0x145d   :  { %4464 = vmatpush3.msra.mxu0 %v5680_v14 }
0x145e   :  { %v1586_v15 = vpop.permute.xlu1 %1585  ;;  %4465 = vmatprep.subr.mxu0 %v5086_v0 }
0x1498   :  { %v2010_v20 = vpop.permute.xlu0 %2009 }
0x1499   :  { %v2012_v36 = vmul.f32 %v5590_v35, %v2010_v20  ;;  %v4458_v20 = vpop.f32.mrf.mxu0 }
0x149b   :  { %2014 = vrot.lane.b32.xlu0 %v2012_v36, %s5089_s24 }
0x150d   :  { %v2015_v39 = vpop.permute.xlu0 %2014 }
0x150e   :  { %v2017_v41 = vadd.f32 %v2015_v39, %v2007_v38 }
0x1510   :  { %4776 = vtanh.f32 %v2017_v41 }
0x1513   :  { %v1885_v42 = vpop.f32.mrf.mxu1 }
0x1514   :  { %v1890_v45 = vrot.slane %v1885_v42, 2 }
0x1515   :  { %v4436_v43 = vpop.f32.mrf.mxu1 }
0x1516   :  { %v1892_v48 = vadd.f32 %v1890_v45, %v1813_v46 }
0x1518   :  { %4778 = vtanh.f32 %v1892_v48  ;;  %v4067_v57 = vmul.f32 -1.442695, %v1892_v48 }
0x151a   :  { %4780 = vpow2.f32 %v4067_v57 }
0x151d   :  { %v4777_v9 = vpop.eup %4776 }
0x151e   :  { %2020 = vrot.lane.b32.xlu0 %v4777_v9, %s5088_s4 }
0x1522   :  { %914 = vrot.lane.b32.xlu0 %v5412_v53, %s5089_s24 }
0x1525   :  { %v4779_v53 = vpop.eup %4778 }
0x1526   :  { %1364 = vrot.lane.b32.xlu0 %v5479_v24, %s5088_s4  ;;  %v2041_v24 = vld [vmem:[#allocation12 + $0x28] sm:$0xff] }
0x1527   :  { %2097 = vmatprep.subr.mxu1 %v2041_v24  ;;  %v4781_v3 = vpop.eup %4780 }
0x1528   :  { %2098 = vmatpush1.msra.mxu1 %v2040_v56  ;;  %v1973_v7 = vadd.f32 1.0, %v4781_v3 }
0x1529   :  { %2099 = vmatprep.subr.mxu1 %v2039_v60 }
0x152a   :  { %1809 = vrot.lane.b32.xlu0 %v5562_v1, %s5088_s4  ;;  %v2036_v1 = vld [vmem:[#allocation12] sm:$0xff]  ;;  %2100 = vmatpush1.msra.mxu1 %v2038_v63  ;;  %4782 = vrcp.f32 %v1973_v7 }
0x152b   :  { %2101 = vmatprep.subr.mxu1 %v2037_v2 }
0x152c   :  { %2102 = vmatpush1.msra.mxu1 %v2036_v1 }
0x152d   :  { %4470 = vmatprep.subr.mxu1 %v5086_v0 }
0x152e   :  { %1982 = vrot.lane.b32.xlu0 %v4779_v53, %s5088_s4  ;;  %v5684_v53 = vld [vmem:[#allocation15] sm:$0xff] }
0x152f   :  { %4466 = vmatpush3.msra.mxu0 %v5684_v53 }
0x1530   :  { %4468 = vmatmul.mubr.f32.vlgmr.msra.gmra.mxu0 %v5086_v0  ;;  %4481 = vmatprep.subr.mxu0 %v5086_v0 }
0x1531   :  { %4482 = vmatpush3.msra.mxu0 %v5672_v55  ;;  %4489 = vmatprep.mubr.msk.f32.mxu0 %vm5087_vm0, %v5086_v0 }
0x1532   :  { %4483 = vmatprep.subr.mxu0 %v5086_v0 }
0x1533   :  { %4484 = vmatpush3.msra.mxu0 %v5674_v13 }
0x1534   :  { %4485 = vmatprep.subr.mxu0 %v5086_v0 }
0x1535   :  { %4486 = vmatpush3.msra.mxu0 %v5680_v14 }
0x1536   :  { %4487 = vmatprep.subr.mxu0 %v5086_v0 }
0x1537   :  { %v4783_v17 = vpop.eup %4782  ;;  %4488 = vmatpush3.msra.mxu0 %v5684_v53 }
0x1538   :  { %v1980_v6 = vmul.f32 %v4783_v17, %v1978_v44  ;;  %4503 = vmatprep.subr.mxu0 %v5086_v0 }
0x1590   :  { %v2021_v8 = vpop.permute.xlu0 %2020 }
0x1591   :  { %v2023_v16 = vmul.f32 %v5590_v35, %v2021_v8 }
0x1593   :  { %2030 = vrot.lane.b32.xlu1 %v2023_v16, %s5088_s4 }
0x1594   :  { %v915_v21 = vpop.permute.xlu0 %914 }
0x1595   :  { %918 = vst.msk [vmem:[#allocation4] sm:$0x30] %vm917_vm13, %v915_v21 }
0x1596   :  { %1588 = vst.msk [vmem:[#allocation4] sm:$0x30] %vm697_vm14, %v1586_v15 }
0x1598   :  { %v1365_v27 = vpop.permute.xlu0 %1364 }
0x1599   :  { %1367 = vst.msk [vmem:[#allocation4] sm:$0xc0] %vm474_vm15, %v1365_v27 }
0x159c   :  { %v1810_v29 = vpop.permute.xlu0 %1809 }
0x159d   :  { %1812 = vst.msk [vmem:[#allocation4] sm:$0xc] %vm923_vm1, %v1810_v29 }
0x15a0   :  { %v1983_v30 = vpop.permute.xlu0 %1982 }
0x15a1   :  { %v1985_v19 = vmul.f32 %v4783_v17, %v1983_v30 }
0x15a3   :  { %1987 = vrot.lane.b32.xlu1 %v1985_v19, %s5089_s24 }
0x15f0   :  { %v2299_v60 = vpop.f32.mrf.mxu0 }
0x15f1   :  { %v2304_v16 = vrot.slane %v2299_v60, 2 }
0x15f2   :  { %v4469_v63 = vpop.f32.mrf.mxu0 }
0x1605   :  { %v2031_v31 = vpop.permute.xlu1 %2030 }
0x1606   :  { %2033 = vst.msk [vmem:[#allocation4] sm:$0x3] %vm1146_vm2, %v2031_v31 }
0x160d   :  { %v2034_v62 = vld [vmem:[#allocation4] sm:$0xff] }
0x160e   :  { %4069 = vmatmul.mubr.msk.f32.vlgmr.msra.gmra.mxu1 %vm2064_vm3, %v2034_v62 }
0x160f   :  { %2141 = vmatprep.mubr.f32.mxu1 %v5086_v0  ;;  %4471 = vmatpush3.msra.mxu1 %v5604_v4 }
0x1610   :  { %4472 = vmatprep.subr.mxu1 %v5086_v0 }
0x1611   :  { %4473 = vmatpush3.msra.mxu1 %v5606_v5 }
0x1612   :  { %4474 = vmatprep.subr.mxu1 %v5086_v0 }
0x1613   :  { %4475 = vmatpush3.msra.mxu1 %v5611_v12 }
0x1614   :  { %4476 = vmatprep.subr.mxu1 %v5086_v0 }
0x1615   :  { %v1988_v33 = vpop.permute.xlu1 %1987  ;;  %4477 = vmatpush3.msra.mxu1 %v5616_v18 }
0x1616   :  { %v1990_v34 = vadd.f32 %v1988_v33, %v1980_v6  ;;  %4492 = vmatprep.subr.mxu1 %v5086_v0 }
0x1618   :  { %4784 = vtanh.f32 %v1990_v34 }
0x1625   :  { %v4785_v35 = vpop.eup %4784 }
0x1626   :  { %1993 = vrot.lane.b32.xlu1 %v4785_v35, %s5088_s4 }
0x162a   :  { %471 = vrot.lane.b32.xlu1 %v5306_v61, %s5088_s4  ;;  %v2052_v61 = vld [vmem:[%s6073_s8] sm:$0x3] }
0x162e   :  { %920 = vrot.lane.b32.xlu1 %v5391_v40, %s5088_s4  ;;  %v5659_v40 = vrot.slane %v2052_v61, %v162_v23 }
0x1632   :  { %1580 = vrot.lane.b32.xlu1 %v5544_v28, %s5089_s24  ;;  %v5663_v28 = vrot.slane %v2052_v61, %v166_v25 }
0x1698   :  { %v1994_v36 = vpop.permute.xlu1 %1993 }
0x1699   :  { %v1996_v37 = vmul.f32 %v4783_v17, %v1994_v36 }
0x169b   :  { %2025 = vrot.lane.b32.xlu1 %v1996_v37, %s5089_s24 }
0x169c   :  { %v472_v38 = vpop.permute.xlu1 %471 }
0x169d   :  { %475 = vst.msk [vmem:[#allocation4 + $0x8] sm:$0xc0] %vm474_vm15, %v472_v38 }
0x16a0   :  { %v921_v39 = vpop.permute.xlu1 %920 }
0x16a1   :  { %924 = vst.msk [vmem:[#allocation4 + $0x8] sm:$0xc] %vm923_vm1, %v921_v39 }
0x16a4   :  { %v1581_v41 = vpop.permute.xlu1 %1580 }
0x16a5   :  { %1583 = vst.msk [vmem:[#allocation4 + $0x8] sm:$0xc] %vm691_vm11, %v1581_v41 }
0x16ce   :  { %v2137_v42 = vpop.f32.mrf.mxu1 }
0x16cf   :  { %v2138_v43 = vadd.f32 %v2137_v42, %v5659_v40 }
0x16d0   :  { %v2139_v45 = vpop.f32.mrf.mxu1 }
0x16d1   :  { %2148 = vst [vmem:[#allocation3 + $0x10] sm:$0xff] %v2138_v43  ;;  %v2140_v46 = vadd.f32 %v2139_v45, %v5663_v28 }
0x16d3   :  { %2149 = vst [vmem:[#allocation3] sm:$0xff] %v2140_v46 }
0x16d8   :  { %v2160_v48 = vld [vmem:[#allocation3 + $0x10] sm:$0x3]  ;;  %v2365_v34 = vld [vmem:[#allocation3 + $0x10] sm:$0xc] }
0x16d9   :  { %v2231_v9 = vadd.f32 %v2227_v11, %v2160_v48 }
0x16db   :  { %4786 = vtanh.f32 %v2231_v9  ;;  %v4071_v22 = vmul.f32 -1.442695, %v2231_v9 }
0x16dd   :  { %4788 = vpow2.f32 %v4071_v22 }
0x16e8   :  { %v4787_v50 = vpop.eup %4786 }
0x16e9   :  { %2316 = vrot.lane.b32.xlu0 %v4787_v50, %s5088_s4 }
0x16ea   :  { %v4789_v25 = vpop.eup %4788 }
0x16eb   :  { %v2310_v51 = vadd.f32 1.0, %v4789_v25 }
0x16ed   :  { %4790 = vrcp.f32 %v2310_v51 }
0x16fa   :  { %v4791_v52 = vpop.eup %4790 }
0x170d   :  { %v2026_v23 = vpop.permute.xlu1 %2025 }
0x170e   :  { %2028 = vst.msk [vmem:[#allocation4 + $0x8] sm:$0xc0] %vm1140_vm12, %v2026_v23 }
0x175b   :  { %v2317_v54 = vpop.permute.xlu0 %2316 }
0x175c   :  { %v2319_v10 = vmul.f32 %v4791_v52, %v2317_v54 }
0x175e   :  { %2321 = vrot.lane.b32.xlu0 %v2319_v10, %s5089_s24 }
0x1762   :  { %694 = vrot.lane.b32.xlu0 %v5347_v49, %s5088_s4  ;;  %v2314_v49 = vmul.f32 0.0, %v4791_v52 }
0x1766   :  { %1143 = vrot.lane.b32.xlu0 %v5435_v32, %s5088_s4 }
0x176a   :  { %1804 = vrot.lane.b32.xlu0 %v5575_v26, %s5089_s24 }
0x17d0   :  { %v2322_v32 = vpop.permute.xlu0 %2321 }
0x17d1   :  { %v5703_v26 = vadd.f32 %v2322_v32, %v2314_v49 }
0x17d3   :  { %4792 = vtanh.f32 %v5703_v26  ;;  %v2530_v9 = vrot.slane %v5703_v26, 6 }
0x17d4   :  { %v695_v57 = vpop.permute.xlu0 %694 }
0x17d5   :  { %698 = vst.msk [vmem:[#allocation4 + $0x8] sm:$0x30] %vm697_vm14, %v695_v57 }
0x17d8   :  { %v1144_v58 = vpop.permute.xlu0 %1143 }
0x17d9   :  { %1147 = vst.msk [vmem:[#allocation4 + $0x8] sm:$0x3] %vm1146_vm2, %v1144_v58 }
0x17da   :  { %1362 = vst.msk [vmem:[#allocation4 + $0x8] sm:$0x3] %vm468_vm10, %v5502_v47 }
0x17dc   :  { %v1805_v59 = vpop.permute.xlu0 %1804 }
0x17dd   :  { %1807 = vst.msk [vmem:[#allocation4 + $0x8] sm:$0x30] %vm917_vm13, %v1805_v59 }
0x17e0   :  { %v4793_v24 = vpop.eup %4792 }
0x17e1   :  { %2327 = vrot.lane.b32.xlu0 %v4793_v24, %s5088_s4 }
0x17e4   :  { %v2035_v56 = vld [vmem:[#allocation4 + $0x8] sm:$0xff] }
0x17e5   :  { %4070 = vmatmul.mubr.msk.f32.gmra.mxu1 %vm2064_vm3, %v2035_v56 }
0x17e6   :  { %4478 = vmatprep.mubr.msk.f32.mxu1 %vm5087_vm0, %v5086_v0 }
0x1853   :  { %v2328_v2 = vpop.permute.xlu0 %2327 }
0x1854   :  { %v2330_v1 = vmul.f32 %v4791_v52, %v2328_v2 }
0x1856   :  { %2356 = vrot.lane.b32.xlu1 %v2330_v1, %s5089_s24 }
0x18a5   :  { %v2143_v3 = vpop.f32.mrf.mxu1 }
0x18a6   :  { %v2144_v47 = vadd.f32 %v2143_v3, %v5659_v40 }
0x18a7   :  { %v2145_v7 = vpop.f32.mrf.mxu1 }
0x18a8   :  { %2150 = vst [vmem:[#allocation3 + $0x18] sm:$0xff] %v2144_v47  ;;  %v2146_v8 = vadd.f32 %v2145_v7, %v5663_v28 }
0x18aa   :  { %2151 = vst [vmem:[#allocation3 + $0x8] sm:$0xff] %v2146_v8  ;;  %v2586_v8 = vld [vmem:[#allocation3 + $0x10] sm:$0x30] }
0x18b1   :  { %v2232_v21 = vld [vmem:[#allocation3 + $0x8] sm:$0xc0]  ;;  %v2442_v26 = vld [vmem:[#allocation3 + $0x8] sm:$0x30] }
0x18b2   :  { %v2306_v15 = vadd.f32 %v2304_v16, %v2232_v21 }
0x18b4   :  { %4794 = vtanh.f32 %v2306_v15  ;;  %v4072_v17 = vmul.f32 -1.442695, %v2306_v15 }
0x18b6   :  { %4796 = vpow2.f32 %v4072_v17 }
0x18c1   :  { %v4795_v27 = vpop.eup %4794 }
0x18c2   :  { %2340 = vrot.lane.b32.xlu0 %v4795_v27, %s5088_s4 }
0x18c3   :  { %v4797_v30 = vpop.eup %4796 }
0x18c4   :  { %v2334_v19 = vadd.f32 1.0, %v4797_v30 }
0x18c6   :  { %4798 = vrcp.f32 %v2334_v19 }
0x18c8   :  { %v2357_v29 = vpop.permute.xlu1 %2356 }
0x18c9   :  { %4479 = vmatmul.mubr.msk.f32.vlgmr.msra.gmra.mxu1 %vm170_vm9, %v2357_v29 }
0x18ca   :  { %4493 = vmatpush3.msra.mxu1 %v5604_v4  ;;  %4500 = vmatprep.mubr.msk.f32.mxu1 %vm5087_vm0, %v5086_v0 }
0x18cb   :  { %4494 = vmatprep.subr.mxu1 %v5086_v0 }
0x18cc   :  { %4495 = vmatpush3.msra.mxu1 %v5606_v5 }
0x18cd   :  { %4496 = vmatprep.subr.mxu1 %v5086_v0 }
0x18ce   :  { %4497 = vmatpush3.msra.mxu1 %v5611_v12 }
0x18cf   :  { %4498 = vmatprep.subr.mxu1 %v5086_v0 }
0x18d0   :  { %4499 = vmatpush3.msra.mxu1 %v5616_v18 }
0x18d1   :  { %4514 = vmatprep.subr.mxu1 %v5086_v0 }
0x18d3   :  { %v4799_v31 = vpop.eup %4798 }
0x18d4   :  { %v2338_v36 = vmul.f32 0.0, %v4799_v31 }
0x1934   :  { %v2341_v62 = vpop.permute.xlu0 %2340 }
0x1935   :  { %v2343_v44 = vmul.f32 %v4799_v31, %v2341_v62 }
0x1937   :  { %2345 = vrot.lane.b32.xlu1 %v2343_v44, %s5089_s24 }
0x1989   :  { %v2434_v6 = vpop.f32.mrf.mxu1 }
0x198a   :  { %v2439_v33 = vrot.slane %v2434_v6, 6 }
0x198b   :  { %v4480_v35 = vpop.f32.mrf.mxu1 }
0x198c   :  { %v2441_v11 = vadd.f32 %v2439_v33, %v2365_v34 }
0x198e   :  { %4800 = vtanh.f32 %v2441_v11  ;;  %v4075_v41 = vmul.f32 -1.442695, %v2441_v11 }
0x199b   :  { %v4801_v20 = vpop.eup %4800 }
0x199c   :  { %2534 = vrot.lane.b32.xlu0 %v4801_v20, %s5088_s4 }
0x19a9   :  { %v2346_v37 = vpop.permute.xlu1 %2345 }
0x19aa   :  { %v5732_v38 = vadd.f32 %v2346_v37, %v2338_v36 }
0x19ac   :  { %4802 = vtanh.f32 %v5732_v38  ;;  %v2557_v27 = vrot.slane %v5732_v38, 2 }
0x19ad   :  { %4804 = vpow2.f32 %v4075_v41 }
0x19b9   :  { %v4803_v39 = vpop.eup %4802 }
0x19ba   :  { %2351 = vrot.lane.b32.xlu1 %v4803_v39, %s5088_s4  ;;  %v4805_v61 = vpop.eup %4804 }
0x19bb   :  { %v2525_v40 = vadd.f32 1.0, %v4805_v61 }
0x19bd   :  { %4806 = vrcp.f32 %v2525_v40 }
0x19ca   :  { %v4807_v28 = vpop.eup %4806 }
0x19cb   :  { %v2532_v50 = vmul.f32 %v4807_v28, %v2530_v9 }
0x1a0e   :  { %v2535_v42 = vpop.permute.xlu0 %2534 }
0x1a0f   :  { %v2537_v43 = vmul.f32 %v4807_v28, %v2535_v42 }
0x1a11   :  { %2539 = vrot.lane.b32.xlu0 %v2537_v43, %s5089_s24 }
0x1a2c   :  { %v2352_v45 = vpop.permute.xlu1 %2351 }
0x1a2d   :  { %v5737_v46 = vmul.f32 %v4799_v31, %v2352_v45 }
0x1a2f   :  { %v2443_v48 = vrot.slane %v5737_v46, 6 }
0x1a31   :  { %2444 = vrot.lane.b32.xlu1 %v2443_v48, %s5089_s24  ;;  %v2666_v48 = vld [vmem:[#allocation3 + $0x8] sm:$0xc] }
0x1a83   :  { %v2540_v23 = vpop.permute.xlu0 %2539 }
0x1a84   :  { %v5742_v22 = vadd.f32 %v2540_v23, %v2532_v50 }
0x1a86   :  { %4808 = vtanh.f32 %v5742_v22  ;;  %v2754_v36 = vrot.slane %v5742_v22, 6 }
0x1a93   :  { %v4809_v25 = vpop.eup %4808 }
0x1a94   :  { %2545 = vrot.lane.b32.xlu0 %v4809_v25, %s5088_s4 }
0x1aa3   :  { %v2445_v51 = vpop.permute.xlu1 %2444 }
0x1aa4   :  { %4490 = vmatmul.mubr.msk.f32.vlgmr.msra.gmra.mxu0 %vm170_vm9, %v2445_v51 }
0x1aa5   :  { %4504 = vmatpush3.msra.mxu0 %v5672_v55  ;;  %4511 = vmatprep.mubr.msk.f32.mxu0 %vm5087_vm0, %v5086_v0 }
0x1aa6   :  { %4505 = vmatprep.subr.mxu0 %v5086_v0 }
0x1aa7   :  { %4506 = vmatpush3.msra.mxu0 %v5674_v13 }
0x1aa8   :  { %4507 = vmatprep.subr.mxu0 %v5086_v0 }
0x1aa9   :  { %4508 = vmatpush3.msra.mxu0 %v5680_v14 }
0x1aaa   :  { %4509 = vmatprep.subr.mxu0 %v5086_v0 }
0x1aab   :  { %4510 = vmatpush3.msra.mxu0 %v5684_v53 }
0x1aac   :  { %4525 = vmatprep.subr.mxu0 %v5086_v0 }
0x1b06   :  { %v2546_v52 = vpop.permute.xlu0 %2545 }
0x1b07   :  { %v5757_v54 = vmul.f32 %v4807_v28, %v2546_v52 }
0x1b09   :  { %v2587_v10 = vrot.slane %v5757_v54, 2 }
0x1b0b   :  { %2588 = vrot.lane.b32.xlu1 %v2587_v10, %s5089_s24 }
0x1b64   :  { %v2514_v49 = vpop.f32.mrf.mxu0 }
0x1b65   :  { %v2519_v32 = vrot.slane %v2514_v49, 4 }
0x1b66   :  { %v4491_v57 = vpop.f32.mrf.mxu0 }
0x1b67   :  { %v2521_v58 = vadd.f32 %v2519_v32, %v2442_v26 }
0x1b69   :  { %4810 = vtanh.f32 %v2521_v58  ;;  %v4076_v56 = vmul.f32 -1.442695, %v2521_v58  ;;  %v2810_v58 = vld [vmem:[#allocation3 + $0x10] sm:$0xc0] }
0x1b6b   :  { %4812 = vpow2.f32 %v4076_v56 }
0x1b76   :  { %v4811_v59 = vpop.eup %4810 }
0x1b77   :  { %2561 = vrot.lane.b32.xlu0 %v4811_v59, %s5088_s4 }
0x1b78   :  { %v4813_v60 = vpop.eup %4812 }
0x1b79   :  { %v2552_v63 = vadd.f32 1.0, %v4813_v60 }
0x1b7b   :  { %4814 = vrcp.f32 %v2552_v63 }
0x1b7d   :  { %v2589_v24 = vpop.permute.xlu1 %2588 }
0x1b7e   :  { %4501 = vmatmul.mubr.msk.f32.vlgmr.msra.gmra.mxu1 %vm170_vm9, %v2589_v24 }
0x1b7f   :  { %4515 = vmatpush3.msra.mxu1 %v5604_v4  ;;  %4522 = vmatprep.mubr.msk.f32.mxu1 %vm5087_vm0, %v5086_v0 }
0x1b80   :  { %4516 = vmatprep.subr.mxu1 %v5086_v0 }
0x1b81   :  { %4517 = vmatpush3.msra.mxu1 %v5606_v5 }
0x1b82   :  { %4518 = vmatprep.subr.mxu1 %v5086_v0 }
0x1b83   :  { %4519 = vmatpush3.msra.mxu1 %v5611_v12 }
0x1b84   :  { %4520 = vmatprep.subr.mxu1 %v5086_v0 }
0x1b85   :  { %4521 = vmatpush3.msra.mxu1 %v5616_v18 }
0x1b86   :  { %4536 = vmatprep.subr.mxu1 %v5086_v0 }
0x1b88   :  { %v4815_v2 = vpop.eup %4814 }
0x1b89   :  { %v2559_v29 = vmul.f32 %v4815_v2, %v2557_v27 }
0x1be9   :  { %v2562_v1 = vpop.permute.xlu0 %2561 }
0x1bea   :  { %v2564_v3 = vmul.f32 %v4815_v2, %v2562_v1 }
0x1bec   :  { %2566 = vrot.lane.b32.xlu1 %v2564_v3, %s5089_s24 }
0x1c3e   :  { %v2658_v47 = vpop.f32.mrf.mxu1 }
0x1c3f   :  { %v2663_v7 = vrot.slane %v2658_v47, 4 }
0x1c40   :  { %v4502_v16 = vpop.f32.mrf.mxu1 }
0x1c41   :  { %v2665_v21 = vadd.f32 %v2663_v7, %v2586_v8 }
0x1c43   :  { %4816 = vtanh.f32 %v2665_v21  ;;  %v4079_v31 = vmul.f32 -1.442695, %v2665_v21 }
0x1c50   :  { %v4817_v15 = vpop.eup %4816 }
0x1c51   :  { %2758 = vrot.lane.b32.xlu0 %v4817_v15, %s5088_s4 }
0x1c5e   :  { %v2567_v17 = vpop.permute.xlu1 %2566 }
0x1c5f   :  { %v5776_v30 = vadd.f32 %v2567_v17, %v2559_v29 }
0x1c61   :  { %4818 = vtanh.f32 %v5776_v30  ;;  %v2781_v60 = vrot.slane %v5776_v30, 2 }
0x1c62   :  { %4820 = vpow2.f32 %v4079_v31 }
0x1c6e   :  { %v4819_v19 = vpop.eup %4818 }
0x1c6f   :  { %2572 = vrot.lane.b32.xlu1 %v4819_v19, %s5088_s4  ;;  %v4821_v62 = vpop.eup %4820 }
0x1c70   :  { %v2749_v44 = vadd.f32 1.0, %v4821_v62 }
0x1c72   :  { %4822 = vrcp.f32 %v2749_v44 }
0x1c7f   :  { %v4823_v6 = vpop.eup %4822 }
0x1c80   :  { %v2756_v37 = vmul.f32 %v4823_v6, %v2754_v36 }
0x1cc3   :  { %v2759_v33 = vpop.permute.xlu0 %2758 }
0x1cc4   :  { %v2761_v34 = vmul.f32 %v4823_v6, %v2759_v33 }
0x1cc6   :  { %2763 = vrot.lane.b32.xlu0 %v2761_v34, %s5089_s24 }
0x1ce1   :  { %v2573_v35 = vpop.permute.xlu1 %2572 }
0x1ce2   :  { %v5781_v11 = vmul.f32 %v4815_v2, %v2573_v35 }
0x1ce4   :  { %v2667_v20 = vrot.slane %v5781_v11, 4 }
0x1ce6   :  { %2668 = vrot.lane.b32.xlu1 %v2667_v20, %s5089_s24  ;;  %v2890_v20 = vld [vmem:[#allocation3 + $0x8] sm:$0x3] }
0x1d38   :  { %v2764_v38 = vpop.permute.xlu0 %2763 }
0x1d39   :  { %v5786_v39 = vadd.f32 %v2764_v38, %v2756_v37 }
0x1d3b   :  { %4824 = vtanh.f32 %v5786_v39  ;;  %v2975_v30 = vrot.slane %v5786_v39, 6 }
0x1d48   :  { %v4825_v41 = vpop.eup %4824 }
0x1d49   :  { %2769 = vrot.lane.b32.xlu0 %v4825_v41, %s5088_s4 }
0x1d58   :  { %v2669_v61 = vpop.permute.xlu1 %2668 }
0x1d59   :  { %4512 = vmatmul.mubr.msk.f32.vlgmr.msra.gmra.mxu0 %vm170_vm9, %v2669_v61 }
0x1d5a   :  { %4526 = vmatpush3.msra.mxu0 %v5672_v55  ;;  %4533 = vmatprep.mubr.msk.f32.mxu0 %vm5087_vm0, %v5086_v0 }
0x1d5b   :  { %4527 = vmatprep.subr.mxu0 %v5086_v0 }
0x1d5c   :  { %4528 = vmatpush3.msra.mxu0 %v5674_v13 }
0x1d5d   :  { %4529 = vmatprep.subr.mxu0 %v5086_v0 }
0x1d5e   :  { %4530 = vmatpush3.msra.mxu0 %v5680_v14 }
0x1d5f   :  { %4531 = vmatprep.subr.mxu0 %v5086_v0 }
0x1d60   :  { %4532 = vmatpush3.msra.mxu0 %v5684_v53 }
0x1d61   :  { %4547 = vmatprep.subr.mxu0 %v5086_v0 }
0x1dbb   :  { %v2770_v40 = vpop.permute.xlu0 %2769 }
0x1dbc   :  { %v5801_v28 = vmul.f32 %v4823_v6, %v2770_v40 }
0x1dbe   :  { %v2811_v42 = vrot.slane %v5801_v28, 4 }
0x1dc0   :  { %2812 = vrot.lane.b32.xlu1 %v2811_v42, %s5089_s24 }
0x1e19   :  { %v2738_v43 = vpop.f32.mrf.mxu0 }
0x1e1a   :  { %v2743_v45 = vrot.slane %v2738_v43, 6 }
0x1e1b   :  { %v4513_v9 = vpop.f32.mrf.mxu0 }
0x1e1c   :  { %v2745_v50 = vadd.f32 %v2743_v45, %v2666_v48  ;;  %v3031_v9 = vld [vmem:[#allocation3 + $0x18] sm:$0x3] }
0x1e1e   :  { %4826 = vtanh.f32 %v2745_v50  ;;  %v4080_v25 = vmul.f32 -1.442695, %v2745_v50 }
0x1e20   :  { %4828 = vpow2.f32 %v4080_v25 }
0x1e2b   :  { %v4827_v23 = vpop.eup %4826 }
0x1e2c   :  { %2785 = vrot.lane.b32.xlu0 %v4827_v23, %s5088_s4 }
0x1e2d   :  { %v4829_v51 = vpop.eup %4828 }
0x1e2e   :  { %v2776_v52 = vadd.f32 1.0, %v4829_v51 }
0x1e30   :  { %4830 = vrcp.f32 %v2776_v52 }
0x1e32   :  { %v2813_v22 = vpop.permute.xlu1 %2812 }
0x1e33   :  { %4523 = vmatmul.mubr.msk.f32.vlgmr.msra.gmra.mxu1 %vm170_vm9, %v2813_v22 }
0x1e34   :  { %4537 = vmatpush3.msra.mxu1 %v5604_v4  ;;  %4544 = vmatprep.mubr.msk.f32.mxu1 %vm5087_vm0, %v5086_v0 }
0x1e35   :  { %4538 = vmatprep.subr.mxu1 %v5086_v0 }
0x1e36   :  { %4539 = vmatpush3.msra.mxu1 %v5606_v5 }
0x1e37   :  { %4540 = vmatprep.subr.mxu1 %v5086_v0 }
0x1e38   :  { %4541 = vmatpush3.msra.mxu1 %v5611_v12 }
0x1e39   :  { %4542 = vmatprep.subr.mxu1 %v5086_v0 }
0x1e3a   :  { %4543 = vmatpush3.msra.mxu1 %v5616_v18 }
0x1e3b   :  { %4558 = vmatprep.subr.mxu1 %v5086_v0 }
0x1e3d   :  { %v4831_v10 = vpop.eup %4830 }
0x1e3e   :  { %v2783_v63 = vmul.f32 %v4831_v10, %v2781_v60 }
0x1e9e   :  { %v2786_v49 = vpop.permute.xlu0 %2785 }
0x1e9f   :  { %v2788_v32 = vmul.f32 %v4831_v10, %v2786_v49 }
0x1ea1   :  { %2790 = vrot.lane.b32.xlu1 %v2788_v32, %s5089_s24 }
0x1ef3   :  { %v2882_v26 = vpop.f32.mrf.mxu1 }
0x1ef4   :  { %v2887_v57 = vrot.slane %v2882_v26, 2 }
0x1ef5   :  { %v4524_v59 = vpop.f32.mrf.mxu1 }
0x1ef6   :  { %v2889_v24 = vadd.f32 %v2887_v57, %v2810_v58 }
0x1ef8   :  { %4832 = vtanh.f32 %v2889_v24  ;;  %v4083_v47 = vmul.f32 -1.442695, %v2889_v24 }
0x1f05   :  { %v4833_v56 = vpop.eup %4832 }
0x1f06   :  { %2979 = vrot.lane.b32.xlu0 %v4833_v56, %s5088_s4 }
0x1f13   :  { %v2791_v2 = vpop.permute.xlu1 %2790 }
0x1f14   :  { %v5820_v1 = vadd.f32 %v2791_v2, %v2783_v63 }
0x1f16   :  { %4834 = vtanh.f32 %v5820_v1  ;;  %v3002_v51 = vrot.slane %v5820_v1, 2 }
0x1f17   :  { %4836 = vpow2.f32 %v4083_v47 }
0x1f23   :  { %v4835_v3 = vpop.eup %4834 }
0x1f24   :  { %2796 = vrot.lane.b32.xlu1 %v4835_v3, %s5088_s4  ;;  %v4837_v7 = vpop.eup %4836 }
0x1f25   :  { %v2970_v8 = vadd.f32 1.0, %v4837_v7 }
0x1f27   :  { %4838 = vrcp.f32 %v2970_v8 }
0x1f34   :  { %v4839_v16 = vpop.eup %4838 }
0x1f35   :  { %v2977_v19 = vmul.f32 %v4839_v16, %v2975_v30 }
0x1f78   :  { %v2980_v21 = vpop.permute.xlu0 %2979 }
0x1f79   :  { %v2982_v15 = vmul.f32 %v4839_v16, %v2980_v21 }
0x1f7b   :  { %2984 = vrot.lane.b32.xlu0 %v2982_v15, %s5089_s24 }
0x1f96   :  { %v2797_v27 = vpop.permute.xlu1 %2796 }
0x1f97   :  { %v5825_v29 = vmul.f32 %v4831_v10, %v2797_v27 }
0x1f99   :  { %v2891_v17 = vrot.slane %v5825_v29, 2 }
0x1f9b   :  { %2892 = vrot.lane.b32.xlu1 %v2891_v17, %s5089_s24  ;;  %v3108_v17 = vld [vmem:[#allocation3] sm:$0xc0] }
0x1fed   :  { %v2985_v31 = vpop.permute.xlu0 %2984 }
0x1fee   :  { %v5830_v62 = vadd.f32 %v2985_v31, %v2977_v19 }
0x1ff0   :  { %4840 = vtanh.f32 %v5830_v62  ;;  %v3195_v2 = vrot.slane %v5830_v62, 6 }
0x1ffd   :  { %v4841_v44 = vpop.eup %4840 }
0x1ffe   :  { %2990 = vrot.lane.b32.xlu0 %v4841_v44, %s5088_s4 }
0x200d   :  { %v2893_v6 = vpop.permute.xlu1 %2892 }
0x200e   :  { %4534 = vmatmul.mubr.msk.f32.vlgmr.msra.gmra.mxu0 %vm170_vm9, %v2893_v6 }
0x200f   :  { %4548 = vmatpush3.msra.mxu0 %v5672_v55  ;;  %4555 = vmatprep.mubr.msk.f32.mxu0 %vm5087_vm0, %v5086_v0 }
0x2010   :  { %4549 = vmatprep.subr.mxu0 %v5086_v0 }
0x2011   :  { %4550 = vmatpush3.msra.mxu0 %v5674_v13 }
0x2012   :  { %4551 = vmatprep.subr.mxu0 %v5086_v0 }
0x2013   :  { %4552 = vmatpush3.msra.mxu0 %v5680_v14 }
0x2014   :  { %4553 = vmatprep.subr.mxu0 %v5086_v0 }
0x2015   :  { %4554 = vmatpush3.msra.mxu0 %v5684_v53 }
0x2016   :  { %4569 = vmatprep.subr.mxu0 %v5086_v0 }
0x2070   :  { %v2991_v33 = vpop.permute.xlu0 %2990 }
0x2071   :  { %v5845_v34 = vmul.f32 %v4839_v16, %v2991_v33 }
0x2073   :  { %v3032_v35 = vrot.slane %v5845_v34, 6 }
0x2075   :  { %3033 = vrot.lane.b32.xlu1 %v3032_v35, %s5089_s24 }
0x20ce   :  { %v2962_v36 = vpop.f32.mrf.mxu0 }
0x20cf   :  { %v2966_v37 = vadd.f32 %v2962_v36, %v2890_v20 }
0x20d0   :  { %v4535_v38 = vpop.f32.mrf.mxu0 }
0x20d1   :  { %4842 = vtanh.f32 %v2966_v37  ;;  %v4084_v61 = vmul.f32 -1.442695, %v2966_v37  ;;  %v3251_v37 = vld [vmem:[#allocation3 + $0x18] sm:$0xc] }
0x20d3   :  { %4844 = vpow2.f32 %v4084_v61 }
0x20de   :  { %v4843_v39 = vpop.eup %4842 }
0x20df   :  { %3006 = vrot.lane.b32.xlu0 %v4843_v39, %s5088_s4 }
0x20e0   :  { %v4845_v40 = vpop.eup %4844 }
0x20e1   :  { %v2997_v42 = vadd.f32 1.0, %v4845_v40 }
0x20e3   :  { %4846 = vrcp.f32 %v2997_v42 }
0x20e7   :  { %v3034_v41 = vpop.permute.xlu1 %3033 }
0x20e8   :  { %4545 = vmatmul.mubr.msk.f32.vlgmr.msra.gmra.mxu1 %vm170_vm9, %v3034_v41 }
0x20e9   :  { %4559 = vmatpush3.msra.mxu1 %v5604_v4  ;;  %4566 = vmatprep.mubr.msk.f32.mxu1 %vm5087_vm0, %v5086_v0 }
0x20ea   :  { %4560 = vmatprep.subr.mxu1 %v5086_v0 }
0x20eb   :  { %4561 = vmatpush3.msra.mxu1 %v5606_v5 }
0x20ec   :  { %4562 = vmatprep.subr.mxu1 %v5086_v0 }
0x20ed   :  { %4563 = vmatpush3.msra.mxu1 %v5611_v12 }
0x20ee   :  { %4564 = vmatprep.subr.mxu1 %v5086_v0 }
0x20ef   :  { %4565 = vmatpush3.msra.mxu1 %v5616_v18 }
0x20f0   :  { %4580 = vmatprep.subr.mxu1 %v5086_v0  ;;  %v4847_v43 = vpop.eup %4846 }
0x20f1   :  { %v3004_v52 = vmul.f32 %v4847_v43, %v3002_v51 }
0x2151   :  { %v3007_v45 = vpop.permute.xlu0 %3006 }
0x2152   :  { %v3009_v48 = vmul.f32 %v4847_v43, %v3007_v45 }
0x2154   :  { %3011 = vrot.lane.b32.xlu1 %v3009_v48, %s5089_s24 }
0x21a8   :  { %v3103_v50 = vpop.f32.mrf.mxu1 }
0x21a9   :  { %v3107_v23 = vadd.f32 %v3103_v50, %v3031_v9 }
0x21aa   :  { %v4546_v22 = vpop.f32.mrf.mxu1 }
0x21ab   :  { %4848 = vtanh.f32 %v3107_v23  ;;  %v4087_v26 = vmul.f32 -1.442695, %v3107_v23 }
0x21b8   :  { %v4849_v25 = vpop.eup %4848 }
0x21b9   :  { %3199 = vrot.lane.b32.xlu0 %v4849_v25, %s5088_s4 }
0x21c6   :  { %v3012_v10 = vpop.permute.xlu1 %3011 }
0x21c7   :  { %v5864_v49 = vadd.f32 %v3012_v10, %v3004_v52 }
0x21c9   :  { %4850 = vtanh.f32 %v5864_v49 }
0x21ca   :  { %4852 = vpow2.f32 %v4087_v26 }
0x21d6   :  { %v4851_v32 = vpop.eup %4850 }
0x21d7   :  { %3017 = vrot.lane.b32.xlu1 %v4851_v32, %s5088_s4  ;;  %v4853_v57 = vpop.eup %4852 }
0x21d8   :  { %v3190_v58 = vadd.f32 1.0, %v4853_v57 }
0x21da   :  { %4854 = vrcp.f32 %v3190_v58 }
0x21e7   :  { %v4855_v59 = vpop.eup %4854 }
0x21e8   :  { %v3197_v1 = vmul.f32 %v4855_v59, %v3195_v2  ;;  %v3328_v2 = vld [vmem:[#allocation3] sm:$0x30] }
0x222b   :  { %v3200_v24 = vpop.permute.xlu0 %3199 }
0x222c   :  { %v3202_v56 = vmul.f32 %v4855_v59, %v3200_v24 }
0x222e   :  { %3204 = vrot.lane.b32.xlu0 %v3202_v56, %s5089_s24 }
0x2249   :  { %v3018_v60 = vpop.permute.xlu1 %3017 }
0x224a   :  { %v5869_v63 = vmul.f32 %v4847_v43, %v3018_v60 }
0x224c   :  { %3109 = vrot.lane.b32.xlu1 %v5869_v63, %s5089_s24 }
0x22a0   :  { %v3205_v3 = vpop.permute.xlu0 %3204 }
0x22a1   :  { %v5874_v47 = vadd.f32 %v3205_v3, %v3197_v1 }
0x22a3   :  { %4856 = vtanh.f32 %v5874_v47  ;;  %v3416_v52 = vrot.slane %v5874_v47, 6 }
0x22b0   :  { %v4857_v7 = vpop.eup %4856 }
0x22b1   :  { %3210 = vrot.lane.b32.xlu0 %v4857_v7, %s5088_s4 }
0x22be   :  { %v3110_v8 = vpop.permute.xlu1 %3109 }
0x22bf   :  { %4556 = vmatmul.mubr.msk.f32.vlgmr.msra.gmra.mxu0 %vm170_vm9, %v3110_v8  ;;  %v4922_v8 = vld [vmem:[#allocation14 + $0x18] sm:$0xff] }
0x22c0   :  { %4570 = vmatpush3.msra.mxu0 %v5672_v55  ;;  %4577 = vmatprep.mubr.msk.f32.mxu0 %vm5087_vm0, %v5086_v0 }
0x22c1   :  { %4571 = vmatprep.subr.mxu0 %v5086_v0 }
0x22c2   :  { %4572 = vmatpush3.msra.mxu0 %v5674_v13 }
0x22c3   :  { %4573 = vmatprep.subr.mxu0 %v5086_v0 }
0x22c4   :  { %4574 = vmatpush3.msra.mxu0 %v5680_v14 }
0x22c5   :  { %4575 = vmatprep.subr.mxu0 %v5086_v0 }
0x22c6   :  { %4576 = vmatpush3.msra.mxu0 %v5684_v53 }
0x22c7   :  { %4591 = vmatprep.subr.mxu0 %v5086_v0 }
0x2323   :  { %v3211_v16 = vpop.permute.xlu0 %3210 }
0x2324   :  { %v3213_v21 = vmul.f32 %v4855_v59, %v3211_v16  ;;  %v4923_v16 = vld [vmem:[#allocation14 + $0x10] sm:$0xff] }
0x2326   :  { %3242 = vrot.lane.b32.xlu1 %v3213_v21, %s5089_s24  ;;  %v4924_v21 = vld [vmem:[#allocation14 + $0x8] sm:$0xff] }
0x237f   :  { %v3179_v15 = vpop.f32.mrf.mxu0 }
0x2380   :  { %v3184_v27 = vrot.slane %v3179_v15, 2  ;;  %v4925_v15 = vld [vmem:[#allocation14] sm:$0xff] }
0x2381   :  { %v4557_v30 = vpop.f32.mrf.mxu0 }
0x2382   :  { %v3186_v19 = vadd.f32 %v3184_v27, %v3108_v17 }
0x2384   :  { %4858 = vtanh.f32 %v3186_v19  ;;  %v4088_v44 = vmul.f32 -1.442695, %v3186_v19 }
0x2386   :  { %4860 = vpow2.f32 %v4088_v44 }
0x2391   :  { %v4859_v31 = vpop.eup %4858 }
0x2392   :  { %3226 = vrot.lane.b32.xlu0 %v4859_v31, %s5088_s4 }
0x2398   :  { %v3243_v62 = vpop.permute.xlu1 %3242 }
0x2399   :  { %4567 = vmatmul.mubr.msk.f32.vlgmr.msra.gmra.mxu1 %vm170_vm9, %v3243_v62 }
0x239a   :  { %4581 = vmatpush3.msra.mxu1 %v5604_v4  ;;  %4588 = vmatprep.mubr.msk.f32.mxu1 %vm5087_vm0, %v5086_v0  ;;  %v4861_v4 = vpop.eup %4860 }
0x239b   :  { %4582 = vmatprep.subr.mxu1 %v5086_v0  ;;  %v3217_v6 = vadd.f32 1.0, %v4861_v4 }
0x239c   :  { %4583 = vmatpush3.msra.mxu1 %v5606_v5 }
0x239d   :  { %4584 = vmatprep.subr.mxu1 %v5086_v0  ;;  %4862 = vrcp.f32 %v3217_v6  ;;  %v3472_v6 = vld [vmem:[#allocation3 + $0x18] sm:$0x30] }
0x239e   :  { %4585 = vmatpush3.msra.mxu1 %v5611_v12 }
0x239f   :  { %4586 = vmatprep.subr.mxu1 %v5086_v0 }
0x23a0   :  { %4587 = vmatpush3.msra.mxu1 %v5616_v18  ;;  %v3222_v18 = vrot.slane %v5864_v49, 2 }
0x23a1   :  { %4602 = vmatprep.subr.mxu1 %v5086_v0 }
0x23aa   :  { %v4863_v33 = vpop.eup %4862 }
0x23ab   :  { %v3224_v41 = vmul.f32 %v4863_v33, %v3222_v18 }
0x2404   :  { %v3227_v35 = vpop.permute.xlu0 %3226 }
0x2405   :  { %v3229_v20 = vmul.f32 %v4863_v33, %v3227_v35 }
0x2407   :  { %3231 = vrot.lane.b32.xlu1 %v3229_v20, %s5089_s24 }
0x2459   :  { %v3320_v5 = vpop.f32.mrf.mxu1 }
0x245a   :  { %v3325_v36 = vrot.slane %v3320_v5, 6 }
0x245b   :  { %v4568_v12 = vpop.f32.mrf.mxu1 }
0x245c   :  { %v3327_v38 = vadd.f32 %v3325_v36, %v3251_v37 }
0x245e   :  { %4864 = vtanh.f32 %v3327_v38  ;;  %v4091_v43 = vmul.f32 -1.442695, %v3327_v38 }
0x246b   :  { %v4865_v39 = vpop.eup %4864 }
0x246c   :  { %3420 = vrot.lane.b32.xlu0 %v4865_v39, %s5088_s4 }
0x2479   :  { %v3232_v61 = vpop.permute.xlu1 %3231 }
0x247a   :  { %v5905_v40 = vadd.f32 %v3232_v61, %v3224_v41 }
0x247c   :  { %4866 = vtanh.f32 %v5905_v40  ;;  %v3443_v5 = vrot.slane %v5905_v40, 2 }
0x247d   :  { %4868 = vpow2.f32 %v4091_v43 }
0x2489   :  { %v4867_v42 = vpop.eup %4866 }
0x248a   :  { %3237 = vrot.lane.b32.xlu1 %v4867_v42, %s5088_s4  ;;  %v4869_v45 = vpop.eup %4868 }
0x248b   :  { %v3411_v48 = vadd.f32 1.0, %v4869_v45 }
0x248d   :  { %4870 = vrcp.f32 %v3411_v48 }
0x249a   :  { %v4871_v9 = vpop.eup %4870 }
0x249b   :  { %v3418_v10 = vmul.f32 %v4871_v9, %v3416_v52 }
0x24de   :  { %v3421_v50 = vpop.permute.xlu0 %3420 }
0x24df   :  { %v3423_v23 = vmul.f32 %v4871_v9, %v3421_v50 }
0x24e1   :  { %3425 = vrot.lane.b32.xlu0 %v3423_v23, %s5089_s24 }
0x24fc   :  { %v3238_v22 = vpop.permute.xlu1 %3237 }
0x24fd   :  { %v5910_v25 = vmul.f32 %v4863_v33, %v3238_v22 }
0x24ff   :  { %v3329_v51 = vrot.slane %v5910_v25, 6 }
0x2501   :  { %3330 = vrot.lane.b32.xlu1 %v3329_v51, %s5089_s24 }
0x2553   :  { %v3426_v49 = vpop.permute.xlu0 %3425 }
0x2554   :  { %v5915_v32 = vadd.f32 %v3426_v49, %v3418_v10 }
0x2556   :  { %4872 = vtanh.f32 %v5915_v32 }
0x2563   :  { %v4873_v26 = vpop.eup %4872 }
0x2564   :  { %3431 = vrot.lane.b32.xlu0 %v4873_v26, %s5088_s4 }
0x2573   :  { %v3331_v57 = vpop.permute.xlu1 %3330 }
0x2574   :  { %4578 = vmatmul.mubr.msk.f32.vlgmr.msra.gmra.mxu0 %vm170_vm9, %v3331_v57  ;;  %v3552_v57 = vld [vmem:[#allocation3] sm:$0xc] }
0x2575   :  { %4592 = vmatpush3.msra.mxu0 %v5672_v55  ;;  %4599 = vmatprep.mubr.msk.f32.mxu0 %vm5087_vm0, %v5086_v0 }
0x2576   :  { %4593 = vmatprep.subr.mxu0 %v5086_v0 }
0x2577   :  { %4594 = vmatpush3.msra.mxu0 %v5674_v13 }
0x2578   :  { %4595 = vmatprep.subr.mxu0 %v5086_v0 }
0x2579   :  { %4596 = vmatpush3.msra.mxu0 %v5680_v14 }
0x257a   :  { %4597 = vmatprep.subr.mxu0 %v5086_v0 }
0x257b   :  { %4598 = vmatpush3.msra.mxu0 %v5684_v53 }
0x257c   :  { %4613 = vmatprep.subr.mxu0 %v5086_v0 }
0x25d6   :  { %v3432_v58 = vpop.permute.xlu0 %3431 }
0x25d7   :  { %v5930_v59 = vmul.f32 %v4871_v9, %v3432_v58  ;;  %v3640_v9 = vrot.slane %v5915_v32, 6 }
0x25d9   :  { %v3473_v24 = vrot.slane %v5930_v59, 2 }
0x25db   :  { %3474 = vrot.lane.b32.xlu1 %v3473_v24, %s5089_s24 }
0x2634   :  { %v3400_v56 = vpop.f32.mrf.mxu0 }
0x2635   :  { %v3405_v60 = vrot.slane %v3400_v56, 4 }
0x2636   :  { %v4579_v1 = vpop.f32.mrf.mxu0 }
0x2637   :  { %v3407_v3 = vadd.f32 %v3405_v60, %v3328_v2 }
0x2639   :  { %4874 = vtanh.f32 %v3407_v3  ;;  %v4092_v27 = vmul.f32 -1.442695, %v3407_v3 }
0x263b   :  { %4876 = vpow2.f32 %v4092_v27 }
0x2646   :  { %v4875_v47 = vpop.eup %4874 }
0x2647   :  { %3447 = vrot.lane.b32.xlu0 %v4875_v47, %s5088_s4 }
0x2648   :  { %v4877_v17 = vpop.eup %4876 }
0x2649   :  { %v3438_v30 = vadd.f32 1.0, %v4877_v17 }
0x264b   :  { %4878 = vrcp.f32 %v3438_v30 }
0x264d   :  { %v3475_v7 = vpop.permute.xlu1 %3474 }
0x264e   :  { %4589 = vmatmul.mubr.msk.f32.vlgmr.msra.gmra.mxu1 %vm170_vm9, %v3475_v7 }
0x264f   :  { %4603 = vmatpush3.msra.mxu1 %v4922_v8  ;;  %4610 = vmatprep.mubr.msk.f32.mxu1 %vm5087_vm0, %v5086_v0  ;;  %v3696_v8 = vld [vmem:[#allocation3 + $0x18] sm:$0xc0] }
0x2650   :  { %4604 = vmatprep.subr.mxu1 %v5086_v0 }
0x2651   :  { %4605 = vmatpush3.msra.mxu1 %v4923_v16 }
0x2652   :  { %4606 = vmatprep.subr.mxu1 %v5086_v0 }
0x2653   :  { %4607 = vmatpush3.msra.mxu1 %v4924_v21 }
0x2654   :  { %4608 = vmatprep.subr.mxu1 %v5086_v0 }
0x2655   :  { %4609 = vmatpush3.msra.mxu1 %v4925_v15 }
0x2656   :  { %4624 = vmatprep.subr.mxu1 %v5086_v0 }
0x2658   :  { %v4879_v19 = vpop.eup %4878 }
0x2659   :  { %v3445_v36 = vmul.f32 %v4879_v19, %v3443_v5 }
0x26b9   :  { %v3448_v31 = vpop.permute.xlu0 %3447 }
0x26ba   :  { %v3450_v62 = vmul.f32 %v4879_v19, %v3448_v31 }
0x26bc   :  { %3452 = vrot.lane.b32.xlu1 %v3450_v62, %s5089_s24 }
0x270e   :  { %v3544_v44 = vpop.f32.mrf.mxu1 }
0x270f   :  { %v3549_v4 = vrot.slane %v3544_v44, 4 }
0x2710   :  { %v4590_v33 = vpop.f32.mrf.mxu1 }
0x2711   :  { %v3551_v35 = vadd.f32 %v3549_v4, %v3472_v6 }
0x2713   :  { %4880 = vtanh.f32 %v3551_v35  ;;  %v4095_v39 = vmul.f32 -1.442695, %v3551_v35 }
0x2720   :  { %v4881_v20 = vpop.eup %4880 }
0x2721   :  { %3644 = vrot.lane.b32.xlu0 %v4881_v20, %s5088_s4 }
0x272e   :  { %v3453_v37 = vpop.permute.xlu1 %3452 }
0x272f   :  { %v5945_v12 = vadd.f32 %v3453_v37, %v3445_v36 }
0x2731   :  { %4882 = vtanh.f32 %v5945_v12  ;;  %v3667_v27 = vrot.slane %v5945_v12, 2 }
0x2732   :  { %4884 = vpow2.f32 %v4095_v39 }
0x273e   :  { %v4883_v38 = vpop.eup %4882 }
0x273f   :  { %3458 = vrot.lane.b32.xlu1 %v4883_v38, %s5088_s4  ;;  %v4885_v18 = vpop.eup %4884 }
0x2740   :  { %v3635_v41 = vadd.f32 1.0, %v4885_v18 }
0x2742   :  { %4886 = vrcp.f32 %v3635_v41 }
0x274f   :  { %v4887_v61 = vpop.eup %4886 }
0x2750   :  { %v3642_v50 = vmul.f32 %v4887_v61, %v3640_v9  ;;  %v3920_v9 = vld [vmem:[%s6074_s9 + $0x10] sm:$0xff] }
0x2793   :  { %v3645_v42 = vpop.permute.xlu0 %3644 }
0x2794   :  { %v3647_v43 = vmul.f32 %v4887_v61, %v3645_v42  ;;  %v3925_v42 = vld [vmem:[%s6074_s9 + $0x38] sm:$0xff] }
0x2796   :  { %3649 = vrot.lane.b32.xlu0 %v3647_v43, %s5089_s24  ;;  %v3923_v43 = vld [vmem:[%s6074_s9 + $0x28] sm:$0xff] }
0x27b1   :  { %v3459_v40 = vpop.permute.xlu1 %3458 }
0x27b2   :  { %v5950_v45 = vmul.f32 %v4879_v19, %v3459_v40  ;;  %v3922_v40 = vld [vmem:[%s6074_s9 + $0x20] sm:$0xff] }
0x27b4   :  { %v3553_v48 = vrot.slane %v5950_v45, 4 }
0x27b6   :  { %3554 = vrot.lane.b32.xlu1 %v3553_v48, %s5089_s24  ;;  %v3921_v48 = vld [vmem:[%s6074_s9 + $0x18] sm:$0xff] }
0x2808   :  { %v3650_v23 = vpop.permute.xlu0 %3649 }
0x2809   :  { %v5955_v22 = vadd.f32 %v3650_v23, %v3642_v50  ;;  %v3919_v50 = vld [vmem:[%s6074_s9 + $0x8] sm:$0xff]  ;;  %v3918_v23 = vld [vmem:[%s6074_s9] sm:$0xff] }
0x280b   :  { %4888 = vtanh.f32 %v5955_v22  ;;  %v3861_v37 = vrot.slane %v5955_v22, 6 }
0x2818   :  { %v4889_v51 = vpop.eup %4888 }
0x2819   :  { %3655 = vrot.lane.b32.xlu0 %v4889_v51, %s5088_s4 }
0x2828   :  { %v3555_v52 = vpop.permute.xlu1 %3554 }
0x2829   :  { %4600 = vmatmul.mubr.msk.f32.vlgmr.msra.gmra.mxu0 %vm170_vm9, %v3555_v52  ;;  %v3776_v52 = vld [vmem:[#allocation3] sm:$0x3] }
0x282a   :  { %4614 = vmatpush3.msra.mxu0 %v5672_v55  ;;  %4621 = vmatprep.mubr.msk.f32.mxu0 %vm5087_vm0, %v5086_v0 }
0x282b   :  { %4615 = vmatprep.subr.mxu0 %v5086_v0 }
0x282c   :  { %4616 = vmatpush3.msra.mxu0 %v5674_v13 }
0x282d   :  { %4617 = vmatprep.subr.mxu0 %v5086_v0 }
0x282e   :  { %4618 = vmatpush3.msra.mxu0 %v5680_v14 }
0x282f   :  { %4619 = vmatprep.subr.mxu0 %v5086_v0 }
0x2830   :  { %4620 = vmatpush3.msra.mxu0 %v5684_v53 }
0x288b   :  { %v3656_v10 = vpop.permute.xlu0 %3655 }
0x288c   :  { %v5969_v49 = vmul.f32 %v4887_v61, %v3656_v10 }
0x288e   :  { %v3697_v55 = vrot.slane %v5969_v49, 4 }
0x2890   :  { %3698 = vrot.lane.b32.xlu1 %v3697_v55, %s5089_s24 }
0x28e9   :  { %v3624_v32 = vpop.f32.mrf.mxu0 }
0x28ea   :  { %v3629_v26 = vrot.slane %v3624_v32, 6 }
0x28eb   :  { %v4601_v58 = vpop.f32.mrf.mxu0 }
0x28ec   :  { %v3631_v13 = vadd.f32 %v3629_v26, %v3552_v57 }
0x28ee   :  { %4890 = vtanh.f32 %v3631_v13  ;;  %v4096_v53 = vmul.f32 -1.442695, %v3631_v13 }
0x28f0   :  { %4892 = vpow2.f32 %v4096_v53 }
0x28fb   :  { %v4891_v24 = vpop.eup %4890 }
0x28fc   :  { %3671 = vrot.lane.b32.xlu0 %v4891_v24, %s5088_s4 }
0x28fd   :  { %v4893_v56 = vpop.eup %4892 }
0x28fe   :  { %v3662_v60 = vadd.f32 1.0, %v4893_v56 }
0x2900   :  { %4894 = vrcp.f32 %v3662_v60  ;;  %v4101_v60 = vld [vmem:[%s6075_s10] ss:$0 sm:$0xff]  ;;  %s5090_s10 = smov [#allocation17]  }
0x2901   :  { %s4025_s17 = sshll.u32 %s5090_s10, 4  ;;  %s4026_s17 = int_to_ptr.vmem [resolvable:$true] %s4025_s17 }
0x2902   :  { %v3699_v14 = vpop.permute.xlu1 %3698  ;;  %s5046_s5 = scalar_lea.vmem %s4026_s17, 32  ;;  %p5051_p3 = scmp.lt.s32.totalorder %s4026_s17, %s4026_s17 }
0x2903   :  { %4611 = vmatmul.mubr.msk.f32.vlgmr.msra.gmra.mxu1 %vm170_vm9, %v3699_v14  ;;  %p5047_p2 = scmp.ne.s32.totalorder %s4026_s17, %s5046_s5  ;;  %p5052_p4 = scmp.lt.s32.totalorder %s5046_s5, %s5046_s5 }
0x2904   :  { %4640 = vmatprep.mubr.msk.f32.mxu1 %vm5087_vm0, %v5086_v0  ;;  %4625 = vmatpush3.msra.mxu1 %v3925_v42  ;;  %vm4006_vm0 = vcmask 9216  }
0x2905   :  { %4626 = vmatprep.subr.mxu1 %v5086_v0  ;;  %p5053_p5 = por %p5052_p4, %p5051_p3 }
0x2907   :  { %p5054_p6 = pnand %p5053_p5, %p5047_p2 }
0x290d   :  { %v4895_v2 = vpop.eup %4894 }
0x290e   :  { %v3669_v17 = vmul.f32 %v4895_v2, %v3667_v27 }
0x296e   :  { %v3672_v1 = vpop.permute.xlu0 %3671 }
0x296f   :  { %v3674_v3 = vmul.f32 %v4895_v2, %v3672_v1 }
0x2971   :  { %3676 = vrot.lane.b32.xlu1 %v3674_v3, %s5089_s24 }
0x29c3   :  { %v3768_v47 = vpop.f32.mrf.mxu1 }
0x29c4   :  { %v3773_v7 = vrot.slane %v3768_v47, 2 }
0x29c5   :  { %v4612_v16 = vpop.f32.mrf.mxu1 }
0x29c6   :  { %v3775_v21 = vadd.f32 %v3773_v7, %v3696_v8 }
0x29c8   :  { %4896 = vtanh.f32 %v3775_v21  ;;  %v4099_v62 = vmul.f32 -1.442695, %v3775_v21 }
0x29d5   :  { %v4897_v15 = vpop.eup %4896 }
0x29d6   :  { %3865 = vrot.lane.b32.xlu0 %v4897_v15, %s5088_s4 }
0x29e3   :  { %v3677_v30 = vpop.permute.xlu1 %3676 }
0x29e4   :  { %v5980_v19 = vadd.f32 %v3677_v30, %v3669_v17 }
0x29e6   :  { %4898 = vtanh.f32 %v5980_v19  ;;  %v3888_v7 = vrot.slane %v5980_v19, 2 }
0x29e7   :  { %4900 = vpow2.f32 %v4099_v62 }
0x29f3   :  { %v4899_v31 = vpop.eup %4898 }
0x29f4   :  { %3682 = vrot.lane.b32.xlu1 %v4899_v31, %s5088_s4  ;;  %v4901_v44 = vpop.eup %4900 }
0x29f5   :  { %v3856_v4 = vadd.f32 1.0, %v4901_v44 }
0x29f7   :  { %4902 = vrcp.f32 %v3856_v4 }
0x2a04   :  { %v4903_v6 = vpop.eup %4902 }
0x2a05   :  { %v3863_v12 = vmul.f32 %v4903_v6, %v3861_v37 }
0x2a48   :  { %v3866_v33 = vpop.permute.xlu0 %3865 }
0x2a49   :  { %v3868_v35 = vmul.f32 %v4903_v6, %v3866_v33 }
0x2a4b   :  { %3870 = vrot.lane.b32.xlu0 %v3868_v35, %s5089_s24 }
0x2a66   :  { %v3683_v20 = vpop.permute.xlu1 %3682 }
0x2a67   :  { %v5985_v5 = vmul.f32 %v4895_v2, %v3683_v20 }
0x2a69   :  { %v3777_v36 = vrot.slane %v5985_v5, 2 }
0x2a6b   :  { %3778 = vrot.lane.b32.xlu1 %v3777_v36, %s5089_s24 }
0x2a6f   :  { %2361 = vrot.lane.b32.xlu1 %v5737_v46, %s5088_s4  ;;  %v3924_v46 = vld [vmem:[%s6074_s9 + $0x30] sm:$0xff] }
0x2a70   :  { %4627 = vmatpush3.msra.mxu1 %v3924_v46 }
0x2a71   :  { %4628 = vmatprep.subr.mxu1 %v5086_v0 }
0x2a72   :  { %4629 = vmatpush3.msra.mxu1 %v3923_v43 }
0x2a73   :  { %4630 = vmatprep.subr.mxu1 %v5086_v0 }
0x2a74   :  { %4631 = vmatpush3.msra.mxu1 %v3922_v40 }
0x2a75   :  { %4632 = vmatprep.subr.mxu1 %v5086_v0 }
0x2a76   :  { %4633 = vmatpush3.msra.mxu1 %v3921_v48 }
0x2a77   :  { %4634 = vmatprep.subr.mxu1 %v5086_v0 }
0x2a78   :  { %4635 = vmatpush3.msra.mxu1 %v3920_v9 }
0x2a79   :  { %4636 = vmatprep.subr.mxu1 %v5086_v0 }
0x2a7a   :  { %4637 = vmatpush3.msra.mxu1 %v3919_v50 }
0x2a7b   :  { %4638 = vmatprep.subr.mxu1 %v5086_v0 }
0x2a7c   :  { %4639 = vmatpush3.msra.mxu1 %v3918_v23 }
0x2abd   :  { %v3871_v38 = vpop.permute.xlu0 %3870 }
0x2abe   :  { %v3873_v39 = vadd.f32 %v3871_v38, %v3863_v12 }
0x2ac0   :  { %4904 = vtanh.f32 %v3873_v39 }
0x2acd   :  { %v4905_v18 = vpop.eup %4904 }
0x2ace   :  { %3876 = vrot.lane.b32.xlu0 %v4905_v18, %s5088_s4 }
0x2add   :  { %v3779_v41 = vpop.permute.xlu1 %3778 }
0x2ade   :  { %4622 = vmatmul.mubr.msk.f32.vlgmr.msra.gmra.mxu0 %vm170_vm9, %v3779_v41 }
0x2ae1   :  { %v2362_v61 = vpop.permute.xlu1 %2361 }
0x2ae2   :  { %2364 = vst.msk [vmem:[#allocation5 + $0x8] sm:$0xc0] %vm474_vm15, %v2362_v61 }
0x2b40   :  { %v3877_v22 = vpop.permute.xlu0 %3876 }
0x2b41   :  { %v3879_v51 = vmul.f32 %v4903_v6, %v3877_v22 }
0x2b43   :  { %3908 = vrot.lane.b32.xlu0 %v3879_v51, %s5089_s24 }
0x2b9e   :  { %v3848_v10 = vpop.f32.mrf.mxu0 }
0x2b9f   :  { %v3852_v55 = vadd.f32 %v3848_v10, %v3776_v52 }
0x2ba0   :  { %v4623_v32 = vpop.f32.mrf.mxu0 }
0x2ba1   :  { %4906 = vtanh.f32 %v3852_v55  ;;  %v4100_v0 = vmul.f32 -1.442695, %v3852_v55 }
0x2ba3   :  { %4908 = vpow2.f32 %v4100_v0 }
0x2bae   :  { %v4907_v26 = vpop.eup %4906 }
0x2baf   :  { %3892 = vrot.lane.b32.xlu1 %v4907_v26, %s5088_s4 }
0x2bb0   :  { %v4909_v13 = vpop.eup %4908 }
0x2bb1   :  { %v3883_v24 = vadd.f32 1.0, %v4909_v13 }
0x2bb3   :  { %4910 = vrcp.f32 %v3883_v24 }
0x2bb5   :  { %v3909_v57 = vpop.permute.xlu0 %3908 }
0x2bb6   :  { %3911 = vst.msk [vmem:[#allocation5 + $0x8] sm:$0xc0] %vm1140_vm12, %v3909_v57 }
0x2bbd   :  { %v3917_v58 = vld [vmem:[#allocation5 + $0xe] sm:$0x3] }
0x2bbe   :  { %4641 = vmatmul.mubr.msk.f32.vlgmr.msra.gmra.mxu1 %vm2064_vm3, %v3917_v58 }
0x2bc0   :  { %v4911_v14 = vpop.eup %4910 }
0x2bc1   :  { %v3890_v8 = vmul.f32 %v4911_v14, %v3888_v7 }
0x2c21   :  { %v3893_v53 = vpop.permute.xlu1 %3892 }
0x2c22   :  { %v3895_v56 = vmul.f32 %v4911_v14, %v3893_v53 }
0x2c24   :  { %3897 = vrot.lane.b32.xlu0 %v3895_v56, %s5089_s24 }
0x2c7e   :  { %v4002_v2 = vpop.f32.mrf.mxu1 }
0x2c7f   :  { %v4003_v1 = vadd.f32 %v4101_v60, %v4002_v2 }
0x2c80   :  { %v4642_v3 = vpop.f32.mrf.mxu1 }
0x2c81   :  { %v4007_v47 = vsel %vm4006_vm0, %v4003_v1, -inf }
0x2c82   :  { %4008 = vmax.xlane.f32.xlu1 %v4007_v47 }
0x2c93   :  { %2577 = vrot.lane.b32.xlu1 %v5757_v54, %s5089_s24 }
0x2c96   :  { %v3898_v16 = vpop.permute.xlu0 %3897 }
0x2c97   :  { %v3900_v21 = vadd.f32 %v3898_v16, %v3890_v8  ;;  %2801 = vrot.lane.b32.xlu1 %v5801_v28, %s5089_s24 }
0x2c99   :  { %4912 = vtanh.f32 %v3900_v21 }
0x2c9b   :  { %2806 = vrot.lane.b32.xlu1 %v5825_v29, %s5088_s4 }
0x2c9f   :  { %3027 = vrot.lane.b32.xlu1 %v5869_v63, %s5088_s4 }
0x2ca3   :  { %3463 = vrot.lane.b32.xlu1 %v5930_v59, %s5089_s24 }
0x2ca6   :  { %v4913_v15 = vpop.eup %4912 }
0x2ca7   :  { %3687 = vrot.lane.b32.xlu1 %v5969_v49, %s5089_s24  ;;  %3903 = vrot.lane.b32.xlu0 %v4913_v15, %s5088_s4 }
0x2cab   :  { %2582 = vrot.lane.b32.xlu0 %v5781_v11, %s5088_s4 }
0x2caf   :  { %3022 = vrot.lane.b32.xlu0 %v5845_v34, %s5089_s24 }
0x2cb3   :  { %3247 = vrot.lane.b32.xlu0 %v5910_v25, %s5088_s4 }
0x2cb7   :  { %3468 = vrot.lane.b32.xlu0 %v5950_v45, %s5088_s4 }
0x2d0b   :  { %v4009_v54 = vpop.xlane.xlu1 %4008 }
0x2d0c   :  { %v4010_v28 = vsub.f32 %v4003_v1, %v4009_v54 }
0x2d0e   :  { %v4011_v29 = vmul.f32 1.442695, %v4010_v28 }
0x2d0f   :  { %v2578_v63 = vpop.permute.xlu1 %2577 }
0x2d10   :  { %4914 = vpow2.f32 %v4011_v29 }
0x2d13   :  { %v2802_v59 = vpop.permute.xlu1 %2801 }
0x2d17   :  { %v2807_v49 = vpop.permute.xlu1 %2806 }
0x2d19   :  { %v3904_v27 = vpop.permute.xlu0 %3903 }
0x2d1a   :  { %v3906_v17 = vmul.f32 %v4911_v14, %v3904_v27 }
0x2d1b   :  { %v3028_v30 = vpop.permute.xlu1 %3027 }
0x2d1c   :  { %3913 = vrot.lane.b32.xlu1 %v3906_v17, %s5088_s4 }
0x2d1d   :  { %v4915_v11 = vpop.eup %4914  ;;  %v2583_v34 = vpop.permute.xlu0 %2582 }
0x2d1e   :  { %v4013_v19 = vsel %vm4006_vm0, %v4915_v11, 0.0 }
0x2d1f   :  { %4014 = vadd.xlane.f32.xlu0 %v4013_v19  ;;  %v3464_v25 = vpop.permute.xlu1 %3463 }
0x2d21   :  { %v3023_v31 = vpop.permute.xlu0 %3022 }
0x2d23   :  { %v3688_v45 = vpop.permute.xlu1 %3687 }
0x2d25   :  { %v3248_v62 = vpop.permute.xlu0 %3247 }
0x2d29   :  { %v3469_v44 = vpop.permute.xlu0 %3468 }
0x2d35   :  { %3692 = vrot.lane.b32.xlu0 %v5985_v5, %s5088_s4 }
0x2d8e   :  { %v3914_v4 = vpop.permute.xlu1 %3913 }
0x2da8   :  { %v4015_v6 = vpop.xlane.xlu0 %4014 }
0x2da9   :  { %4916 = vrcp.f32 %v4015_v6 }
0x2dac   :  { %v3693_v33 = vpop.permute.xlu0 %3692 }
0x2db6   :  { %v4917_v35 = vpop.eup %4916 }
0x2db7   :  { %v4017_v20 = vmul.f32 %v4917_v35, %v4915_v11 }
0x2db9   :  { %4018 = vst.msk [vmem:[#allocation17] sm:$0x3] %vm4006_vm0, %v4017_v20 }
0x2dba   :  { %5057 = shalt.err (!%p5054_p6)
}
0x2dbb   :  { %4028 = dma.vmem_to_hbm [thread:$0]  %s4026_s17, 32, %s6076_s11, [#allocation8]  }
0x2dbc   :  { %5074 = dma.done.wait [#allocation8], 32  }
0x2dbd   :  { %5075 = vsyncadd [#allocation8], 4294967264 }
0x2dbe   :  { %4032 = vsyncpa [#allocation7], 1 }
0x2dbf   :  { %4033 = vsyncpa [#allocation10], 1 }
0x2dc0   :  { %4034 = vsyncpa [#allocation13], 1 }
0x2dc1   :  { %4035 = vsyncpa [#allocation16], 1 }
0x2dc2   :  { %4036 = vsyncpa [#allocation8], 1 }

</bundles_post_ra>
